<compile_context>
chip_gen: v7x
topology: tpu7x:2x2x1
jax: 0.10.0
libtpu: 0.0.40
codegen_flags: <defaults>
</compile_context>

<pallas_src>
import functools
import math

import jax
import jax.numpy as jnp
import numpy as np
from jax.experimental import pallas as pl
from jax.experimental.pallas import tpu as pltpu


# ------------------------------ fused Pallas kernel ------------------------------


def _cae_kernel(x_ref, bns_ref, bnb_ref,
                g1_ref, g2_ref, g3_ref, b1_ref, b2_ref, b3x2_ref,
                wle_ref, ble_ref, wld_ref, bld_ref, wd_ref, bd_ref,
                z_ref, xh_ref,
                act_e0, act_e1, act_e2, lin_flat, act_d, dec_lhs,
                *, B, Bp, T, M, Z):
    """BN -> 3x Conv(3x3,s=(1,2)) -> max+mean pool -> Linear  ==> z
       z -> Linear -> 5x ConvTranspose(3x3,s=(1,2)) ==> x_hat, all VMEM-resident.

    Activations are [(T+2)*Bp, W*C] slabs: rows = (H-padded time, padded batch),
    lanes = (width, channel). Weights are banded matrices that fold the width
    taps + stride; each conv is 3 accumulating matmuls (one per height tap),
    each deconv is a single matmul against K-concatenated taps."""
    f32 = jnp.float32
    TB = T * Bp

    # -- zero only the H-padding rows (top/bottom Bp rows); interiors are fully
    #    overwritten below, so no full-slab zeroing.
    def zero_pads(ref):
        pad = jnp.zeros((Bp, ref.shape[1]), f32)
        ref[0:Bp, :] = pad
        ref[(T + 1) * Bp:(T + 2) * Bp, :] = pad

    zero_pads(act_e0)
    zero_pads(act_e1)
    zero_pads(act_e2)
    zero_pads(act_d)

    def taps(ref):
        # 3 kernel-height shifted views; offsets are multiples of Bp=8 -> free.
        return ref[0:TB, :], ref[Bp:TB + Bp, :], ref[2 * Bp:TB + 2 * Bp, :]

    def conv3x3(src_ref, g_ref):
        # Conv2d(3x3, stride (1,2), pad 1): 3 accumulating MXU matmuls; width
        # taps + stride are folded into the banded (bf16-stored) g matrices.
        x0, x1, x2 = taps(src_ref)
        acc = jnp.dot(x0, g_ref[0].astype(f32), preferred_element_type=f32)
        acc = acc + jnp.dot(x1, g_ref[1].astype(f32), preferred_element_type=f32)
        acc = acc + jnp.dot(x2, g_ref[2].astype(f32), preferred_element_type=f32)
        return acc

    # ---------------------------------- encoder ----------------------------------
    # eval-mode BatchNorm as one lane-dense affine on [Bp, T*M], then unscatter
    # into the (t, b) rows of the H-padded act_e0 slab.
    xbn = x_ref[...] * bns_ref[...] + bnb_ref[...]
    for t in range(T):
        act_e0[(t + 1) * Bp:(t + 2) * Bp, :] = xbn[:, t * M:(t + 1) * M]

    act_e1[Bp:(T + 1) * Bp, :] = jnp.maximum(conv3x3(act_e0, g1_ref) + b1_ref[...], 0.0)
    act_e2[Bp:(T + 1) * Bp, :] = jnp.maximum(conv3x3(act_e1, g2_ref) + b2_ref[...], 0.0)

    # last conv at full output width (lanes = (wo, cout)); bias hoisted out of
    # the max+mean pool: pooled = max(acc) + mean(acc) + 2*b3.
    acc3 = conv3x3(act_e2, g3_ref)                         # [TB, W3*64]
    W3 = M // 8
    groups = [acc3[:, wo * 64:(wo + 1) * 64] for wo in range(W3)]
    mx, sm = groups[0], groups[0]
    for g in groups[1:]:
        mx = jnp.maximum(mx, g)
        sm = sm + g
    pooled = mx + sm * (1.0 / W3) + b3x2_ref[...]          # [TB, 64]

    # lin_enc: assemble the flat [Bp, T*64] LHS (lanes = (t, c)) with 13 cheap
    # VMEM copies, then ONE matmul.
    for t in range(T):
        lin_flat[:, t * 64:(t + 1) * 64] = pooled[t * Bp:(t + 1) * Bp, :]
    zval = jnp.dot(lin_flat[...], wle_ref[...].astype(f32),
                   preferred_element_type=f32) + ble_ref[...]        # [Bp, Z]
    z_ref[...] = zval[0:B, :]

    # ---------------------------------- decoder ----------------------------------
    # lin_dec: ONE matmul; columns pre-permuted to (t, m) lanes, then 13-row
    # scatter into the (t, b) rows of the shared decoder slab.
    xh0 = jnp.dot(zval, wld_ref[...].astype(f32),
                  preferred_element_type=f32) + bld_ref[...]         # [Bp, T*M]
    for t in range(T):
        act_d[(t + 1) * Bp:(t + 2) * Bp, :] = xh0[:, t * M:(t + 1) * M]

    # 5 transposed convs, each a single matmul: the 3 height-tap views are
    # lane-concatenated into dec_lhs and multiplied by the K-concatenated
    # banded weight (width scatter + stride 2 + output_padding folded in).
    n_dec = wd_ref.shape[0]
    for i in range(n_dec):
        x0, x1, x2 = taps(act_d)
        dec_lhs[:, 0:M] = x0
        dec_lhs[:, M:2 * M] = x1
        dec_lhs[:, 2 * M:3 * M] = x2
        acc = jnp.dot(dec_lhs[...], wd_ref[i].astype(f32),
                      preferred_element_type=f32) + bd_ref[i]        # [TB, M]
        if i < n_dec - 1:
            act_d[Bp:(T + 1) * Bp, :] = jnp.maximum(acc, 0.0)
        else:
            # emit lane-dense [B, T*M] (lanes = (t, m)): free reshape outside.
            for t in range(T):
                xh_ref[:, t * M:(t + 1) * M] = acc[t * Bp:t * Bp + B, :]


# -------------------------------- pallas wrapper ---------------------------------


def _vmem_specs(n):
    return [pl.BlockSpec(memory_space=pltpu.MemorySpace.VMEM) for _ in range(n)]


@functools.partial(jax.jit, static_argnames=("t_steps", "z_dim", "mel_bins"))
def mini_cae_forward(kp, x, *, t_steps, z_dim, mel_bins):
    B = x.shape[0]
    T, M, Z = t_steps, mel_bins, z_dim
    Bp = max(8, ((B + 7) // 8) * 8)          # pad batch to a sublane multiple

    # free reshape: [B,1,T,M] -> [B, T*M] (lanes = (t, m)); tiny zero-pad to Bp rows
    x_flat = x.reshape(B, T * M)
    x_pad = jnp.zeros((Bp, T * M), x.dtype).at[:B, :].set(x_flat)

    kern = functools.partial(_cae_kernel, B=B, Bp=Bp, T=T, M=M, Z=Z)
    z, xh = pl.pallas_call(
        kern,
        out_shape=(jax.ShapeDtypeStruct((B, Z), jnp.float32),
                   jax.ShapeDtypeStruct((B, T * M), jnp.float32)),
        in_specs=_vmem_specs(15),
        out_specs=(pl.BlockSpec(memory_space=pltpu.MemorySpace.VMEM),
                   pl.BlockSpec(memory_space=pltpu.MemorySpace.VMEM)),
        scratch_shapes=[
            pltpu.VMEM(((T + 2) * Bp, M), jnp.float32),               # BN'd input (H-padded)
            pltpu.VMEM(((T + 2) * Bp, (M // 2) * 16), jnp.float32),   # conv1 out
            pltpu.VMEM(((T + 2) * Bp, (M // 4) * 32), jnp.float32),   # conv2 out
            pltpu.VMEM((Bp, T * 64), jnp.float32),                    # lin_enc flat LHS
            pltpu.VMEM(((T + 2) * Bp, M), jnp.float32),               # shared decoder slab
            pltpu.VMEM((T * Bp, 3 * M), jnp.float32),                 # deconv LHS (3 taps)
        ],
    )(x_pad, kp["bn_scale"], kp["bn_shift"],
      kp["enc_g1"], kp["enc_g2"], kp["enc_g3"],
      kp["enc_b1"], kp["enc_b2"], kp["enc_b3x2"],
      kp["lin_enc_w"], kp["lin_enc_b"], kp["lin_dec_w"], kp["lin_dec_b"],
      kp["dec_w"], kp["dec_b"])

    x_hat = xh.reshape(B, 1, T, M)           # free reshape, lanes already (t, m)
    return x_hat, z


# ----------------------- parameters (synthetic) & packing ------------------------


def _xavier_uniform(key, shape, fan_in, fan_out):
    bound = math.sqrt(6.0 / (fan_in + fan_out))
    return jax.random.uniform(key, shape, jnp.float32, -bound, bound)


def init_raw_params(key, t_steps, z_dim, mel_bins):
    """Parameters in the original PyTorch layouts (Conv2d: [Cout,Cin,kh,kw],
    ConvTranspose2d: [Cin,Cout,kh,kw], Linear: [out,in])."""
    keys = jax.random.split(key, 16)
    p = {}
    p["bn_gamma"] = jnp.ones((mel_bins,), jnp.float32)
    p["bn_beta"] = jnp.zeros((mel_bins,), jnp.float32)
    p["bn_mean"] = jnp.zeros((mel_bins,), jnp.float32)
    p["bn_var"] = jnp.ones((mel_bins,), jnp.float32)
    enc_ch = [(1, 16), (16, 32), (32, 64)]
    p["enc_w"] = [_xavier_uniform(keys[i], (co, ci, 3, 3), ci * 9, co * 9)
                  for i, (ci, co) in enumerate(enc_ch)]
    p["enc_b"] = [jnp.zeros((co,), jnp.float32) for _, co in enc_ch]
    p["lin_enc_w"] = _xavier_uniform(keys[3], (z_dim, t_steps * 64),
                                     t_steps * 64, z_dim)
    p["lin_enc_b"] = jnp.zeros((z_dim,), jnp.float32)
    p["lin_dec_w"] = _xavier_uniform(keys[4], (t_steps * mel_bins, z_dim),
                                     z_dim, t_steps * mel_bins)
    p["lin_dec_b"] = jnp.zeros((t_steps * mel_bins,), jnp.float32)
    dec_ch = [(32, 16), (16, 8), (8, 4), (4, 2), (2, 1)]
    p["dec_w"] = [_xavier_uniform(keys[5 + i], (ci, co, 3, 3), co * 9, ci * 9)
                  for i, (ci, co) in enumerate(dec_ch)]
    p["dec_b"] = [jnp.zeros((co,), jnp.float32) for _, co in dec_ch]
    return p


def _conv_tap_mats(w, W):
    """Conv2d weight [Cout,Cin,3,3] (stride (1,2), pad 1) -> 3 banded matrices
    [W*Cin, (W//2)*Cout] (one per kernel-height tap) acting on lanes (w, ci)."""
    w = np.asarray(w)
    Cout, Cin, _, _ = w.shape
    Wo = W // 2
    g = np.zeros((3, W * Cin, Wo * Cout), np.float32)
    for i in range(3):
        for wo in range(Wo):
            for j in range(3):
                win = 2 * wo - 1 + j            # input width index for this tap
                if 0 <= win < W:
                    g[i, win * Cin:(win + 1) * Cin,
                      wo * Cout:(wo + 1) * Cout] = w[:, :, i, j].T
    return jnp.asarray(g)


def _deconv_tap_mats(w, W):
    """ConvTranspose2d weight [Cin,Cout,3,3] (stride (1,2), pad 1, out_pad (0,1))
    -> 3 banded scatter matrices [W*Cin, (2*W)*Cout]."""
    w = np.asarray(w)
    Cin, Cout, _, _ = w.shape
    g = np.zeros((3, W * Cin, 2 * W * Cout), np.float32)
    for i in range(3):
        for win in range(W):
            for j in range(3):
                wo = 2 * win - 1 + j            # output width index scattered to
                if 0 <= wo < 2 * W:
                    g[i, win * Cin:(win + 1) * Cin,
                      wo * Cout:(wo + 1) * Cout] = w[:, :, i, j]
    return jnp.asarray(g)


def pack_params(raw, t_steps, z_dim, mel_bins):
    """One-time weight preprocessing: banded conv matrices, linear permutations,
    BN folding, bias tiling. Matmul weights are stored in bf16 (activations and
    accumulation stay f32 inside the kernel)."""
    T, Z, M = t_steps, z_dim, mel_bins
    eps = 1e-5
    wdt = jnp.bfloat16
    kp = {}

    scale = raw["bn_gamma"] / jnp.sqrt(raw["bn_var"] + eps)
    shift = raw["bn_beta"] - raw["bn_mean"] * scale
    kp["bn_scale"] = jnp.tile(scale, T).reshape(1, T * M)     # lanes = (t, m)
    kp["bn_shift"] = jnp.tile(shift, T).reshape(1, T * M)

    enc_W = [M, M // 2, M // 4]
    kp["enc_g1"] = _conv_tap_mats(raw["enc_w"][0], enc_W[0]).astype(wdt)
    kp["enc_g2"] = _conv_tap_mats(raw["enc_w"][1], enc_W[1]).astype(wdt)
    kp["enc_g3"] = _conv_tap_mats(raw["enc_w"][2], enc_W[2]).astype(wdt)
    kp["enc_b1"] = jnp.tile(raw["enc_b"][0], enc_W[0] // 2).reshape(1, -1)
    kp["enc_b2"] = jnp.tile(raw["enc_b"][1], enc_W[1] // 2).reshape(1, -1)
    kp["enc_b3x2"] = (2.0 * raw["enc_b"][2]).reshape(1, -1)   # bias hoisted past pool

    # lin_enc: torch flattens (channel, t); rows re-ordered to (t, c) so a single
    # [Bp, T*64] x [T*64, Z] matmul matches the kernel's flat LHS layout.
    wl = raw["lin_enc_w"]                                     # [Z, 64*T], col = c*T+t
    kp["lin_enc_w"] = (jnp.transpose(wl.reshape(Z, 64, T), (2, 1, 0))
                       .reshape(T * 64, Z).astype(wdt))
    kp["lin_enc_b"] = raw["lin_enc_b"].reshape(1, Z)

    # lin_dec: torch views its output as (B, M, T, 1); columns re-ordered to (t, m).
    wd = raw["lin_dec_w"]                                     # [T*M, Z], row = m*T+t
    kp["lin_dec_w"] = (jnp.transpose(wd.reshape(M, T, Z), (2, 1, 0))
                       .reshape(Z, T * M).astype(wdt))
    kp["lin_dec_b"] = (jnp.transpose(raw["lin_dec_b"].reshape(M, T))
                       .reshape(1, T * M))

    # decoder banded weights: K-concatenate the 3 height taps (order matches the
    # LHS lane-concat [x(t-1) | x(t) | x(t+1)]) so each deconv is ONE matmul.
    dec_W = [1, 2, 4, 8, 16]
    gs, bs = [], []
    for w, b, W in zip(raw["dec_w"], raw["dec_b"], dec_W):
        g = _deconv_tap_mats(w, W)                            # [3, W*Cin, 2W*Cout]
        gs.append(jnp.concatenate([g[2], g[1], g[0]], axis=0).astype(wdt))
        bs.append(jnp.tile(b, 2 * W).reshape(1, -1))
    kp["dec_w"] = jnp.stack(gs)                               # [5, 3*M, M]
    kp["dec_b"] = jnp.stack(bs)                               # [5, 1, M]
    return kp


def quantize_weights_like_kernel(raw):
    """bf16-round the matmul weights exactly as the packed kernel stores them
    (banding/permutation only copies values, so rounding commutes)."""
    def q(w):
        return jnp.asarray(w, jnp.bfloat16).astype(jnp.float32)
    out = dict(raw)
    out["enc_w"] = [q(w) for w in raw["enc_w"]]
    out["dec_w"] = [q(w) for w in raw["dec_w"]]
    out["lin_enc_w"] = q(raw["lin_enc_w"])
    out["lin_dec_w"] = q(raw["lin_dec_w"])
    return out


# ------------------------------- pure-JAX reference -------------------------------


def reference_forward(raw, x, t_steps, z_dim, mel_bins):
    """Pure-JAX (lax.conv, Precision.HIGHEST) reference with identical semantics."""
    B = x.shape[0]
    T, M = t_steps, mel_bins
    eps = 1e-5
    hp = jax.lax.Precision.HIGHEST
    scale = raw["bn_gamma"] / jnp.sqrt(raw["bn_var"] + eps)
    shift = raw["bn_beta"] - raw["bn_mean"] * scale
    dn = ("NCHW", "OIHW", "NCHW")

    h = x * scale.reshape(1, 1, 1, M) + shift.reshape(1, 1, 1, M)
    for i, (w, b) in enumerate(zip(raw["enc_w"], raw["enc_b"])):
        h = jax.lax.conv_general_dilated(h, w, (1, 2), ((1, 1), (1, 1)),
                                         dimension_numbers=dn, precision=hp)
        h = h + b.reshape(1, -1, 1, 1)
        if i < 2:
            h = jnp.maximum(h, 0.0)
    pooled = jnp.max(h, axis=3) + jnp.mean(h, axis=3)          # [B, 64, T]
    z = (jnp.dot(pooled.reshape(B, 64 * T), raw["lin_enc_w"].T, precision=hp)
         + raw["lin_enc_b"])

    xh = jnp.dot(z, raw["lin_dec_w"].T, precision=hp) + raw["lin_dec_b"]
    h = xh.reshape(B, M, T, 1)
    for i, (w, b) in enumerate(zip(raw["dec_w"], raw["dec_b"])):
        wf = jnp.flip(w, (2, 3)).transpose(1, 0, 2, 3)         # -> [Cout, Cin, 3, 3]
        h = jax.lax.conv_general_dilated(h, wf, (1, 1), ((1, 1), (1, 2)),
                                         lhs_dilation=(1, 2),
                                         dimension_numbers=dn, precision=hp)
        h = h + b.reshape(1, -1, 1, 1)
        if i < 4:
            h = jnp.maximum(h, 0.0)
    return h, z


# -------------------------------------- main ---------------------------------------

if __name__ == "__main__":
    T_STEPS, Z_DIM, MEL_BINS, BATCH = 13, 64, 32, 2   # mel_bins=32 (see NOTE above)
    assert MEL_BINS == 32

    key = jax.random.PRNGKey(0)
    kx, kparam = jax.random.split(key)
    x = jax.random.normal(kx, (BATCH, 1, T_STEPS, MEL_BINS), jnp.float32)

    raw = init_raw_params(kparam, T_STEPS, Z_DIM, MEL_BINS)
    packed = pack_params(raw, T_STEPS, Z_DIM, MEL_BINS)        # one-time preprocessing

    x_hat, z = mini_cae_forward(packed, x, t_steps=T_STEPS, z_dim=Z_DIM,
                                mel_bins=MEL_BINS)
    jax.block_until_ready((x_hat, z))

    assert x_hat.shape == (BATCH, 1, T_STEPS, MEL_BINS), x_hat.shape
    assert z.shape == (BATCH, Z_DIM), z.shape
    assert not bool(jnp.isnan(x_hat).any())
    assert not bool(jnp.isnan(z).any())

    # Validate against the pure-JAX reference using the SAME bf16-stored weights,
    # so the comparison isolates packing/layout bugs (O(1) errors) from the
    # deliberate weight quantization. Tolerance tightened 50x vs the previous
    # 5e-2; the residual difference is only MXU-multipass vs XLA-conv rounding.
    raw_eff = quantize_weights_like_kernel(raw)
    x_hat_ref, z_ref_val = reference_forward(raw_eff, x, T_STEPS, Z_DIM, MEL_BINS)

    def _close(a, b, tol=1e-3):
        return float(jnp.max(jnp.abs(a - b))) <= tol * (float(jnp.max(jnp.abs(b))) + 1e-6)

    assert _close(z, z_ref_val), "encoder output mismatch vs pure-JAX reference"
    assert _close(x_hat, x_hat_ref), "decoder output mismatch vs pure-JAX reference"

    print("KERNEL_OK")
</pallas_src>

<mosaic_0001>
module attributes {stable_mosaic.version = 11 : i64} {
  func.func @_cae_kernel(%arg0: memref<8x416xf32, #tpu.memory_space<vmem>>, %arg1: memref<1x416xf32, #tpu.memory_space<vmem>>, %arg2: memref<1x416xf32, #tpu.memory_space<vmem>>, %arg3: memref<3x32x256xbf16, #tpu.memory_space<vmem>>, %arg4: memref<3x256x256xbf16, #tpu.memory_space<vmem>>, %arg5: memref<3x256x256xbf16, #tpu.memory_space<vmem>>, %arg6: memref<1x256xf32, #tpu.memory_space<vmem>>, %arg7: memref<1x256xf32, #tpu.memory_space<vmem>>, %arg8: memref<1x64xf32, #tpu.memory_space<vmem>>, %arg9: memref<832x64xbf16, #tpu.memory_space<vmem>>, %arg10: memref<1x64xf32, #tpu.memory_space<vmem>>, %arg11: memref<64x416xbf16, #tpu.memory_space<vmem>>, %arg12: memref<1x416xf32, #tpu.memory_space<vmem>>, %arg13: memref<5x96x32xbf16, #tpu.memory_space<vmem>>, %arg14: memref<5x1x32xf32, #tpu.memory_space<vmem>>, %arg15: memref<2x64xf32, #tpu.memory_space<vmem>>, %arg16: memref<2x416xf32, #tpu.memory_space<vmem>>, %arg17: memref<120x32xf32, #tpu.memory_space<vmem>>, %arg18: memref<120x256xf32, #tpu.memory_space<vmem>>, %arg19: memref<120x256xf32, #tpu.memory_space<vmem>>, %arg20: memref<8x832xf32, #tpu.memory_space<vmem>>, %arg21: memref<120x32xf32, #tpu.memory_space<vmem>>, %arg22: memref<104x96xf32, #tpu.memory_space<vmem>>) attributes {dimension_semantics = [], scalar_prefetch = 0 : i64, scratch_operands = 6 : i64, tpu.core_type = #tpu.core_type<tc>} {
    %cst = arith.constant 0.000000e+00 : f32
    %0 = vector.broadcast %cst : f32 to vector<8x32xf32>
    %c0 = arith.constant 0 : index
    %c0_0 = arith.constant 0 : index
    %1 = vector.load %arg17[%c0, %c0_0] : memref<120x32xf32, #tpu.memory_space<vmem>>, vector<8x32xf32>
    tpu.vector_store %arg17[%c0, %c0_0], %0 {strides = array<i32>} : memref<120x32xf32, #tpu.memory_space<vmem>>, vector<8x32xf32>,
    %c112 = arith.constant 112 : index
    %c0_1 = arith.constant 0 : index
    %2 = vector.load %arg17[%c112, %c0_1] : memref<120x32xf32, #tpu.memory_space<vmem>>, vector<8x32xf32>
    tpu.vector_store %arg17[%c112, %c0_1], %0 {strides = array<i32>} : memref<120x32xf32, #tpu.memory_space<vmem>>, vector<8x32xf32>,
    %cst_2 = arith.constant 0.000000e+00 : f32
    %3 = vector.broadcast %cst_2 : f32 to vector<8x256xf32>
    %c0_3 = arith.constant 0 : index
    %c0_4 = arith.constant 0 : index
    %4 = vector.load %arg18[%c0_3, %c0_4] : memref<120x256xf32, #tpu.memory_space<vmem>>, vector<8x256xf32>
    tpu.vector_store %arg18[%c0_3, %c0_4], %3 {strides = array<i32>} : memref<120x256xf32, #tpu.memory_space<vmem>>, vector<8x256xf32>,
    %c112_5 = arith.constant 112 : index
    %c0_6 = arith.constant 0 : index
    %5 = vector.load %arg18[%c112_5, %c0_6] : memref<120x256xf32, #tpu.memory_space<vmem>>, vector<8x256xf32>
    tpu.vector_store %arg18[%c112_5, %c0_6], %3 {strides = array<i32>} : memref<120x256xf32, #tpu.memory_space<vmem>>, vector<8x256xf32>,
    %cst_7 = arith.constant 0.000000e+00 : f32
    %6 = vector.broadcast %cst_7 : f32 to vector<8x256xf32>
    %c0_8 = arith.constant 0 : index
    %c0_9 = arith.constant 0 : index
    %7 = vector.load %arg19[%c0_8, %c0_9] : memref<120x256xf32, #tpu.memory_space<vmem>>, vector<8x256xf32>
    tpu.vector_store %arg19[%c0_8, %c0_9], %6 {strides = array<i32>} : memref<120x256xf32, #tpu.memory_space<vmem>>, vector<8x256xf32>,
    %c112_10 = arith.constant 112 : index
    %c0_11 = arith.constant 0 : index
    %8 = vector.load %arg19[%c112_10, %c0_11] : memref<120x256xf32, #tpu.memory_space<vmem>>, vector<8x256xf32>
    tpu.vector_store %arg19[%c112_10, %c0_11], %6 {strides = array<i32>} : memref<120x256xf32, #tpu.memory_space<vmem>>, vector<8x256xf32>,
    %cst_12 = arith.constant 0.000000e+00 : f32
    %9 = vector.broadcast %cst_12 : f32 to vector<8x32xf32>
    %c0_13 = arith.constant 0 : index
    %c0_14 = arith.constant 0 : index
    %10 = vector.load %arg21[%c0_13, %c0_14] : memref<120x32xf32, #tpu.memory_space<vmem>>, vector<8x32xf32>
    tpu.vector_store %arg21[%c0_13, %c0_14], %9 {strides = array<i32>} : memref<120x32xf32, #tpu.memory_space<vmem>>, vector<8x32xf32>,
    %c112_15 = arith.constant 112 : index
    %c0_16 = arith.constant 0 : index
    %11 = vector.load %arg21[%c112_15, %c0_16] : memref<120x32xf32, #tpu.memory_space<vmem>>, vector<8x32xf32>
    tpu.vector_store %arg21[%c112_15, %c0_16], %9 {strides = array<i32>} : memref<120x32xf32, #tpu.memory_space<vmem>>, vector<8x32xf32>,
    %c0_17 = arith.constant 0 : index
    %c0_18 = arith.constant 0 : index
    %12 = vector.load %arg0[%c0_17, %c0_18] : memref<8x416xf32, #tpu.memory_space<vmem>>, vector<8x416xf32>
    %c0_19 = arith.constant 0 : index
    %c0_20 = arith.constant 0 : index
    %13 = vector.load %arg1[%c0_19, %c0_20] : memref<1x416xf32, #tpu.memory_space<vmem>>, vector<1x416xf32>
    %14 = vector.broadcast %13 : vector<1x416xf32> to vector<8x416xf32>
    %15 = arith.mulf %12, %14 : vector<8x416xf32>
    %c0_21 = arith.constant 0 : index
    %c0_22 = arith.constant 0 : index
    %16 = vector.load %arg2[%c0_21, %c0_22] : memref<1x416xf32, #tpu.memory_space<vmem>>, vector<1x416xf32>
    %17 = vector.broadcast %16 : vector<1x416xf32> to vector<8x416xf32>
    %18 = arith.addf %15, %17 : vector<8x416xf32>
    %19 = vector.extract_strided_slice %18 {offsets = [0, 0], sizes = [8, 32], strides = [1, 1]} : vector<8x416xf32> to vector<8x32xf32>
    %c8 = arith.constant 8 : index
    %c0_23 = arith.constant 0 : index
    %20 = vector.load %arg17[%c8, %c0_23] : memref<120x32xf32, #tpu.memory_space<vmem>>, vector<8x32xf32>
    tpu.vector_store %arg17[%c8, %c0_23], %19 {strides = array<i32>} : memref<120x32xf32, #tpu.memory_space<vmem>>, vector<8x32xf32>,
    %21 = vector.extract_strided_slice %18 {offsets = [0, 32], sizes = [8, 32], strides = [1, 1]} : vector<8x416xf32> to vector<8x32xf32>
    %c16 = arith.constant 16 : index
    %c0_24 = arith.constant 0 : index
    %22 = vector.load %arg17[%c16, %c0_24] : memref<120x32xf32, #tpu.memory_space<vmem>>, vector<8x32xf32>
    tpu.vector_store %arg17[%c16, %c0_24], %21 {strides = array<i32>} : memref<120x32xf32, #tpu.memory_space<vmem>>, vector<8x32xf32>,
    %23 = vector.extract_strided_slice %18 {offsets = [0, 64], sizes = [8, 32], strides = [1, 1]} : vector<8x416xf32> to vector<8x32xf32>
    %c24 = arith.constant 24 : index
    %c0_25 = arith.constant 0 : index
    %24 = vector.load %arg17[%c24, %c0_25] : memref<120x32xf32, #tpu.memory_space<vmem>>, vector<8x32xf32>
    tpu.vector_store %arg17[%c24, %c0_25], %23 {strides = array<i32>} : memref<120x32xf32, #tpu.memory_space<vmem>>, vector<8x32xf32>,
    %25 = vector.extract_strided_slice %18 {offsets = [0, 96], sizes = [8, 32], strides = [1, 1]} : vector<8x416xf32> to vector<8x32xf32>
    %c32 = arith.constant 32 : index
    %c0_26 = arith.constant 0 : index
    %26 = vector.load %arg17[%c32, %c0_26] : memref<120x32xf32, #tpu.memory_space<vmem>>, vector<8x32xf32>
    tpu.vector_store %arg17[%c32, %c0_26], %25 {strides = array<i32>} : memref<120x32xf32, #tpu.memory_space<vmem>>, vector<8x32xf32>,
    %27 = vector.extract_strided_slice %18 {offsets = [0, 128], sizes = [8, 32], strides = [1, 1]} : vector<8x416xf32> to vector<8x32xf32>
    %c40 = arith.constant 40 : index
    %c0_27 = arith.constant 0 : index
    %28 = vector.load %arg17[%c40, %c0_27] : memref<120x32xf32, #tpu.memory_space<vmem>>, vector<8x32xf32>
    tpu.vector_store %arg17[%c40, %c0_27], %27 {strides = array<i32>} : memref<120x32xf32, #tpu.memory_space<vmem>>, vector<8x32xf32>,
    %29 = vector.extract_strided_slice %18 {offsets = [0, 160], sizes = [8, 32], strides = [1, 1]} : vector<8x416xf32> to vector<8x32xf32>
    %c48 = arith.constant 48 : index
    %c0_28 = arith.constant 0 : index
    %30 = vector.load %arg17[%c48, %c0_28] : memref<120x32xf32, #tpu.memory_space<vmem>>, vector<8x32xf32>
    tpu.vector_store %arg17[%c48, %c0_28], %29 {strides = array<i32>} : memref<120x32xf32, #tpu.memory_space<vmem>>, vector<8x32xf32>,
    %31 = vector.extract_strided_slice %18 {offsets = [0, 192], sizes = [8, 32], strides = [1, 1]} : vector<8x416xf32> to vector<8x32xf32>
    %c56 = arith.constant 56 : index
    %c0_29 = arith.constant 0 : index
    %32 = vector.load %arg17[%c56, %c0_29] : memref<120x32xf32, #tpu.memory_space<vmem>>, vector<8x32xf32>
    tpu.vector_store %arg17[%c56, %c0_29], %31 {strides = array<i32>} : memref<120x32xf32, #tpu.memory_space<vmem>>, vector<8x32xf32>,
    %33 = vector.extract_strided_slice %18 {offsets = [0, 224], sizes = [8, 32], strides = [1, 1]} : vector<8x416xf32> to vector<8x32xf32>
    %c64 = arith.constant 64 : index
    %c0_30 = arith.constant 0 : index
    %34 = vector.load %arg17[%c64, %c0_30] : memref<120x32xf32, #tpu.memory_space<vmem>>, vector<8x32xf32>
    tpu.vector_store %arg17[%c64, %c0_30], %33 {strides = array<i32>} : memref<120x32xf32, #tpu.memory_space<vmem>>, vector<8x32xf32>,
    %35 = vector.extract_strided_slice %18 {offsets = [0, 256], sizes = [8, 32], strides = [1, 1]} : vector<8x416xf32> to vector<8x32xf32>
    %c72 = arith.constant 72 : index
    %c0_31 = arith.constant 0 : index
    %36 = vector.load %arg17[%c72, %c0_31] : memref<120x32xf32, #tpu.memory_space<vmem>>, vector<8x32xf32>
    tpu.vector_store %arg17[%c72, %c0_31], %35 {strides = array<i32>} : memref<120x32xf32, #tpu.memory_space<vmem>>, vector<8x32xf32>,
    %37 = vector.extract_strided_slice %18 {offsets = [0, 288], sizes = [8, 32], strides = [1, 1]} : vector<8x416xf32> to vector<8x32xf32>
    %c80 = arith.constant 80 : index
    %c0_32 = arith.constant 0 : index
    %38 = vector.load %arg17[%c80, %c0_32] : memref<120x32xf32, #tpu.memory_space<vmem>>, vector<8x32xf32>
    tpu.vector_store %arg17[%c80, %c0_32], %37 {strides = array<i32>} : memref<120x32xf32, #tpu.memory_space<vmem>>, vector<8x32xf32>,
    %39 = vector.extract_strided_slice %18 {offsets = [0, 320], sizes = [8, 32], strides = [1, 1]} : vector<8x416xf32> to vector<8x32xf32>
    %c88 = arith.constant 88 : index
    %c0_33 = arith.constant 0 : index
    %40 = vector.load %arg17[%c88, %c0_33] : memref<120x32xf32, #tpu.memory_space<vmem>>, vector<8x32xf32>
    tpu.vector_store %arg17[%c88, %c0_33], %39 {strides = array<i32>} : memref<120x32xf32, #tpu.memory_space<vmem>>, vector<8x32xf32>,
    %41 = vector.extract_strided_slice %18 {offsets = [0, 352], sizes = [8, 32], strides = [1, 1]} : vector<8x416xf32> to vector<8x32xf32>
    %c96 = arith.constant 96 : index
    %c0_34 = arith.constant 0 : index
    %42 = vector.load %arg17[%c96, %c0_34] : memref<120x32xf32, #tpu.memory_space<vmem>>, vector<8x32xf32>
    tpu.vector_store %arg17[%c96, %c0_34], %41 {strides = array<i32>} : memref<120x32xf32, #tpu.memory_space<vmem>>, vector<8x32xf32>,
    %43 = vector.extract_strided_slice %18 {offsets = [0, 384], sizes = [8, 32], strides = [1, 1]} : vector<8x416xf32> to vector<8x32xf32>
    %c104 = arith.constant 104 : index
    %c0_35 = arith.constant 0 : index
    %44 = vector.load %arg17[%c104, %c0_35] : memref<120x32xf32, #tpu.memory_space<vmem>>, vector<8x32xf32>
    tpu.vector_store %arg17[%c104, %c0_35], %43 {strides = array<i32>} : memref<120x32xf32, #tpu.memory_space<vmem>>, vector<8x32xf32>,
    %c0_36 = arith.constant 0 : index
    %c0_37 = arith.constant 0 : index
    %45 = vector.load %arg17[%c0_36, %c0_37] : memref<120x32xf32, #tpu.memory_space<vmem>>, vector<104x32xf32>
    %c8_38 = arith.constant 8 : index
    %c0_39 = arith.constant 0 : index
    %46 = vector.load %arg17[%c8_38, %c0_39] : memref<120x32xf32, #tpu.memory_space<vmem>>, vector<104x32xf32>
    %c16_40 = arith.constant 16 : index
    %c0_41 = arith.constant 0 : index
    %47 = vector.load %arg17[%c16_40, %c0_41] : memref<120x32xf32, #tpu.memory_space<vmem>>, vector<104x32xf32>
    %c0_42 = arith.constant 0 : index
    %c0_43 = arith.constant 0 : index
    %c0_44 = arith.constant 0 : index
    %48 = vector.load %arg3[%c0_42, %c0_43, %c0_44] : memref<3x32x256xbf16, #tpu.memory_space<vmem>>, vector<1x32x256xbf16>
    %49 = vector.shape_cast %48 : vector<1x32x256xbf16> to vector<32x256xbf16>
    %50 = arith.extf %49 : vector<32x256xbf16> to vector<32x256xf32>
    %cst_45 = arith.constant dense<0.000000e+00> : vector<104x256xf32>
    %51 = tpu.matmul %45, %50, %cst_45 {dimension_numbers = #tpu.dot_dimension_numbers<[1], [0], [0], [1], [0, 0, 1, 1], [], []>} : vector<104x32xf32>, vector<32x256xf32>, vector<104x256xf32> -> vector<104x256xf32>
    %c1 = arith.constant 1 : index
    %c0_46 = arith.constant 0 : index
    %c0_47 = arith.constant 0 : index
    %52 = vector.load %arg3[%c1, %c0_46, %c0_47] : memref<3x32x256xbf16, #tpu.memory_space<vmem>>, vector<1x32x256xbf16>
    %53 = vector.shape_cast %52 : vector<1x32x256xbf16> to vector<32x256xbf16>
    %54 = arith.extf %53 : vector<32x256xbf16> to vector<32x256xf32>
    %cst_48 = arith.constant dense<0.000000e+00> : vector<104x256xf32>
    %55 = tpu.matmul %46, %54, %cst_48 {dimension_numbers = #tpu.dot_dimension_numbers<[1], [0], [0], [1], [0, 0, 1, 1], [], []>} : vector<104x32xf32>, vector<32x256xf32>, vector<104x256xf32> -> vector<104x256xf32>
    %56 = arith.addf %51, %55 : vector<104x256xf32>
    %c2 = arith.constant 2 : index
    %c0_49 = arith.constant 0 : index
    %c0_50 = arith.constant 0 : index
    %57 = vector.load %arg3[%c2, %c0_49, %c0_50] : memref<3x32x256xbf16, #tpu.memory_space<vmem>>, vector<1x32x256xbf16>
    %58 = vector.shape_cast %57 : vector<1x32x256xbf16> to vector<32x256xbf16>
    %59 = arith.extf %58 : vector<32x256xbf16> to vector<32x256xf32>
    %cst_51 = arith.constant dense<0.000000e+00> : vector<104x256xf32>
    %60 = tpu.matmul %47, %59, %cst_51 {dimension_numbers = #tpu.dot_dimension_numbers<[1], [0], [0], [1], [0, 0, 1, 1], [], []>} : vector<104x32xf32>, vector<32x256xf32>, vector<104x256xf32> -> vector<104x256xf32>
    %61 = arith.addf %56, %60 : vector<104x256xf32>
    %c0_52 = arith.constant 0 : index
    %c0_53 = arith.constant 0 : index
    %62 = vector.load %arg6[%c0_52, %c0_53] : memref<1x256xf32, #tpu.memory_space<vmem>>, vector<1x256xf32>
    %63 = vector.broadcast %62 : vector<1x256xf32> to vector<104x256xf32>
    %64 = arith.addf %61, %63 : vector<104x256xf32>
    %cst_54 = arith.constant 0.000000e+00 : f32
    %65 = vector.broadcast %cst_54 : f32 to vector<104x256xf32>
    %66 = arith.maximumf %64, %65 : vector<104x256xf32>
    %c8_55 = arith.constant 8 : index
    %c0_56 = arith.constant 0 : index
    %67 = vector.load %arg18[%c8_55, %c0_56] : memref<120x256xf32, #tpu.memory_space<vmem>>, vector<104x256xf32>
    tpu.vector_store %arg18[%c8_55, %c0_56], %66 {strides = array<i32>} : memref<120x256xf32, #tpu.memory_space<vmem>>, vector<104x256xf32>,
    %c0_57 = arith.constant 0 : index
    %c0_58 = arith.constant 0 : index
    %68 = vector.load %arg18[%c0_57, %c0_58] : memref<120x256xf32, #tpu.memory_space<vmem>>, vector<104x256xf32>
    %c8_59 = arith.constant 8 : index
    %c0_60 = arith.constant 0 : index
    %69 = vector.load %arg18[%c8_59, %c0_60] : memref<120x256xf32, #tpu.memory_space<vmem>>, vector<104x256xf32>
    %c16_61 = arith.constant 16 : index
    %c0_62 = arith.constant 0 : index
    %70 = vector.load %arg18[%c16_61, %c0_62] : memref<120x256xf32, #tpu.memory_space<vmem>>, vector<104x256xf32>
    %c0_63 = arith.constant 0 : index
    %c0_64 = arith.constant 0 : index
    %c0_65 = arith.constant 0 : index
    %71 = vector.load %arg4[%c0_63, %c0_64, %c0_65] : memref<3x256x256xbf16, #tpu.memory_space<vmem>>, vector<1x256x256xbf16>
    %72 = vector.shape_cast %71 : vector<1x256x256xbf16> to vector<256x256xbf16>
    %73 = arith.extf %72 : vector<256x256xbf16> to vector<256x256xf32>
    %cst_66 = arith.constant dense<0.000000e+00> : vector<104x256xf32>
    %74 = tpu.matmul %68, %73, %cst_66 {dimension_numbers = #tpu.dot_dimension_numbers<[1], [0], [0], [1], [0, 0, 1, 1], [], []>} : vector<104x256xf32>, vector<256x256xf32>, vector<104x256xf32> -> vector<104x256xf32>
    %c1_67 = arith.constant 1 : index
    %c0_68 = arith.constant 0 : index
    %c0_69 = arith.constant 0 : index
    %75 = vector.load %arg4[%c1_67, %c0_68, %c0_69] : memref<3x256x256xbf16, #tpu.memory_space<vmem>>, vector<1x256x256xbf16>
    %76 = vector.shape_cast %75 : vector<1x256x256xbf16> to vector<256x256xbf16>
    %77 = arith.extf %76 : vector<256x256xbf16> to vector<256x256xf32>
    %cst_70 = arith.constant dense<0.000000e+00> : vector<104x256xf32>
    %78 = tpu.matmul %69, %77, %cst_70 {dimension_numbers = #tpu.dot_dimension_numbers<[1], [0], [0], [1], [0, 0, 1, 1], [], []>} : vector<104x256xf32>, vector<256x256xf32>, vector<104x256xf32> -> vector<104x256xf32>
    %79 = arith.addf %74, %78 : vector<104x256xf32>
    %c2_71 = arith.constant 2 : index
    %c0_72 = arith.constant 0 : index
    %c0_73 = arith.constant 0 : index
    %80 = vector.load %arg4[%c2_71, %c0_72, %c0_73] : memref<3x256x256xbf16, #tpu.memory_space<vmem>>, vector<1x256x256xbf16>
    %81 = vector.shape_cast %80 : vector<1x256x256xbf16> to vector<256x256xbf16>
    %82 = arith.extf %81 : vector<256x256xbf16> to vector<256x256xf32>
    %cst_74 = arith.constant dense<0.000000e+00> : vector<104x256xf32>
    %83 = tpu.matmul %70, %82, %cst_74 {dimension_numbers = #tpu.dot_dimension_numbers<[1], [0], [0], [1], [0, 0, 1, 1], [], []>} : vector<104x256xf32>, vector<256x256xf32>, vector<104x256xf32> -> vector<104x256xf32>
    %84 = arith.addf %79, %83 : vector<104x256xf32>
    %c0_75 = arith.constant 0 : index
    %c0_76 = arith.constant 0 : index
    %85 = vector.load %arg7[%c0_75, %c0_76] : memref<1x256xf32, #tpu.memory_space<vmem>>, vector<1x256xf32>
    %86 = vector.broadcast %85 : vector<1x256xf32> to vector<104x256xf32>
    %87 = arith.addf %84, %86 : vector<104x256xf32>
    %cst_77 = arith.constant 0.000000e+00 : f32
    %88 = vector.broadcast %cst_77 : f32 to vector<104x256xf32>
    %89 = arith.maximumf %87, %88 : vector<104x256xf32>
    %c8_78 = arith.constant 8 : index
    %c0_79 = arith.constant 0 : index
    %90 = vector.load %arg19[%c8_78, %c0_79] : memref<120x256xf32, #tpu.memory_space<vmem>>, vector<104x256xf32>
    tpu.vector_store %arg19[%c8_78, %c0_79], %89 {strides = array<i32>} : memref<120x256xf32, #tpu.memory_space<vmem>>, vector<104x256xf32>,
    %c0_80 = arith.constant 0 : index
    %c0_81 = arith.constant 0 : index
    %91 = vector.load %arg19[%c0_80, %c0_81] : memref<120x256xf32, #tpu.memory_space<vmem>>, vector<104x256xf32>
    %c8_82 = arith.constant 8 : index
    %c0_83 = arith.constant 0 : index
    %92 = vector.load %arg19[%c8_82, %c0_83] : memref<120x256xf32, #tpu.memory_space<vmem>>, vector<104x256xf32>
    %c16_84 = arith.constant 16 : index
    %c0_85 = arith.constant 0 : index
    %93 = vector.load %arg19[%c16_84, %c0_85] : memref<120x256xf32, #tpu.memory_space<vmem>>, vector<104x256xf32>
    %c0_86 = arith.constant 0 : index
    %c0_87 = arith.constant 0 : index
    %c0_88 = arith.constant 0 : index
    %94 = vector.load %arg5[%c0_86, %c0_87, %c0_88] : memref<3x256x256xbf16, #tpu.memory_space<vmem>>, vector<1x256x256xbf16>
    %95 = vector.shape_cast %94 : vector<1x256x256xbf16> to vector<256x256xbf16>
    %96 = arith.extf %95 : vector<256x256xbf16> to vector<256x256xf32>
    %cst_89 = arith.constant dense<0.000000e+00> : vector<104x256xf32>
    %97 = tpu.matmul %91, %96, %cst_89 {dimension_numbers = #tpu.dot_dimension_numbers<[1], [0], [0], [1], [0, 0, 1, 1], [], []>} : vector<104x256xf32>, vector<256x256xf32>, vector<104x256xf32> -> vector<104x256xf32>
    %c1_90 = arith.constant 1 : index
    %c0_91 = arith.constant 0 : index
    %c0_92 = arith.constant 0 : index
    %98 = vector.load %arg5[%c1_90, %c0_91, %c0_92] : memref<3x256x256xbf16, #tpu.memory_space<vmem>>, vector<1x256x256xbf16>
    %99 = vector.shape_cast %98 : vector<1x256x256xbf16> to vector<256x256xbf16>
    %100 = arith.extf %99 : vector<256x256xbf16> to vector<256x256xf32>
    %cst_93 = arith.constant dense<0.000000e+00> : vector<104x256xf32>
    %101 = tpu.matmul %92, %100, %cst_93 {dimension_numbers = #tpu.dot_dimension_numbers<[1], [0], [0], [1], [0, 0, 1, 1], [], []>} : vector<104x256xf32>, vector<256x256xf32>, vector<104x256xf32> -> vector<104x256xf32>
    %102 = arith.addf %97, %101 : vector<104x256xf32>
    %c2_94 = arith.constant 2 : index
    %c0_95 = arith.constant 0 : index
    %c0_96 = arith.constant 0 : index
    %103 = vector.load %arg5[%c2_94, %c0_95, %c0_96] : memref<3x256x256xbf16, #tpu.memory_space<vmem>>, vector<1x256x256xbf16>
    %104 = vector.shape_cast %103 : vector<1x256x256xbf16> to vector<256x256xbf16>
    %105 = arith.extf %104 : vector<256x256xbf16> to vector<256x256xf32>
    %cst_97 = arith.constant dense<0.000000e+00> : vector<104x256xf32>
    %106 = tpu.matmul %93, %105, %cst_97 {dimension_numbers = #tpu.dot_dimension_numbers<[1], [0], [0], [1], [0, 0, 1, 1], [], []>} : vector<104x256xf32>, vector<256x256xf32>, vector<104x256xf32> -> vector<104x256xf32>
    %107 = arith.addf %102, %106 : vector<104x256xf32>
    %108 = vector.extract_strided_slice %107 {offsets = [0, 0], sizes = [104, 64], strides = [1, 1]} : vector<104x256xf32> to vector<104x64xf32>
    %109 = vector.extract_strided_slice %107 {offsets = [0, 64], sizes = [104, 64], strides = [1, 1]} : vector<104x256xf32> to vector<104x64xf32>
    %110 = vector.extract_strided_slice %107 {offsets = [0, 128], sizes = [104, 64], strides = [1, 1]} : vector<104x256xf32> to vector<104x64xf32>
    %111 = vector.extract_strided_slice %107 {offsets = [0, 192], sizes = [104, 64], strides = [1, 1]} : vector<104x256xf32> to vector<104x64xf32>
    %112 = arith.maximumf %108, %109 : vector<104x64xf32>
    %113 = arith.addf %108, %109 : vector<104x64xf32>
    %114 = arith.maximumf %112, %110 : vector<104x64xf32>
    %115 = arith.addf %113, %110 : vector<104x64xf32>
    %116 = arith.maximumf %114, %111 : vector<104x64xf32>
    %117 = arith.addf %115, %111 : vector<104x64xf32>
    %cst_98 = arith.constant 2.500000e-01 : f32
    %118 = vector.broadcast %cst_98 : f32 to vector<104x64xf32>
    %119 = arith.mulf %117, %118 : vector<104x64xf32>
    %120 = arith.addf %116, %119 : vector<104x64xf32>
    %c0_99 = arith.constant 0 : index
    %c0_100 = arith.constant 0 : index
    %121 = vector.load %arg8[%c0_99, %c0_100] : memref<1x64xf32, #tpu.memory_space<vmem>>, vector<1x64xf32>
    %122 = vector.broadcast %121 : vector<1x64xf32> to vector<104x64xf32>
    %123 = arith.addf %120, %122 : vector<104x64xf32>
    %124 = vector.extract_strided_slice %123 {offsets = [0, 0], sizes = [8, 64], strides = [1, 1]} : vector<104x64xf32> to vector<8x64xf32>
    %c0_101 = arith.constant 0 : index
    %c0_102 = arith.constant 0 : index
    %125 = vector.load %arg20[%c0_101, %c0_102] : memref<8x832xf32, #tpu.memory_space<vmem>>, vector<8x64xf32>
    tpu.vector_store %arg20[%c0_101, %c0_102], %124 {strides = array<i32>} : memref<8x832xf32, #tpu.memory_space<vmem>>, vector<8x64xf32>,
    %126 = vector.extract_strided_slice %123 {offsets = [8, 0], sizes = [8, 64], strides = [1, 1]} : vector<104x64xf32> to vector<8x64xf32>
    %c0_103 = arith.constant 0 : index
    %c64_104 = arith.constant 64 : index
    %127 = vector.load %arg20[%c0_103, %c64_104] : memref<8x832xf32, #tpu.memory_space<vmem>>, vector<8x64xf32>
    tpu.vector_store %arg20[%c0_103, %c64_104], %126 {strides = array<i32>} : memref<8x832xf32, #tpu.memory_space<vmem>>, vector<8x64xf32>,
    %128 = vector.extract_strided_slice %123 {offsets = [16, 0], sizes = [8, 64], strides = [1, 1]} : vector<104x64xf32> to vector<8x64xf32>
    %c0_105 = arith.constant 0 : index
    %c128 = arith.constant 128 : index
    %129 = vector.load %arg20[%c0_105, %c128] : memref<8x832xf32, #tpu.memory_space<vmem>>, vector<8x64xf32>
    tpu.vector_store %arg20[%c0_105, %c128], %128 {strides = array<i32>} : memref<8x832xf32, #tpu.memory_space<vmem>>, vector<8x64xf32>,
    %130 = vector.extract_strided_slice %123 {offsets = [24, 0], sizes = [8, 64], strides = [1, 1]} : vector<104x64xf32> to vector<8x64xf32>
    %c0_106 = arith.constant 0 : index
    %c192 = arith.constant 192 : index
    %131 = vector.load %arg20[%c0_106, %c192] : memref<8x832xf32, #tpu.memory_space<vmem>>, vector<8x64xf32>
    tpu.vector_store %arg20[%c0_106, %c192], %130 {strides = array<i32>} : memref<8x832xf32, #tpu.memory_space<vmem>>, vector<8x64xf32>,
    %132 = vector.extract_strided_slice %123 {offsets = [32, 0], sizes = [8, 64], strides = [1, 1]} : vector<104x64xf32> to vector<8x64xf32>
    %c0_107 = arith.constant 0 : index
    %c256 = arith.constant 256 : index
    %133 = vector.load %arg20[%c0_107, %c256] : memref<8x832xf32, #tpu.memory_space<vmem>>, vector<8x64xf32>
    tpu.vector_store %arg20[%c0_107, %c256], %132 {strides = array<i32>} : memref<8x832xf32, #tpu.memory_space<vmem>>, vector<8x64xf32>,
    %134 = vector.extract_strided_slice %123 {offsets = [40, 0], sizes = [8, 64], strides = [1, 1]} : vector<104x64xf32> to vector<8x64xf32>
    %c0_108 = arith.constant 0 : index
    %c320 = arith.constant 320 : index
    %135 = vector.load %arg20[%c0_108, %c320] : memref<8x832xf32, #tpu.memory_space<vmem>>, vector<8x64xf32>
    tpu.vector_store %arg20[%c0_108, %c320], %134 {strides = array<i32>} : memref<8x832xf32, #tpu.memory_space<vmem>>, vector<8x64xf32>,
    %136 = vector.extract_strided_slice %123 {offsets = [48, 0], sizes = [8, 64], strides = [1, 1]} : vector<104x64xf32> to vector<8x64xf32>
    %c0_109 = arith.constant 0 : index
    %c384 = arith.constant 384 : index
    %137 = vector.load %arg20[%c0_109, %c384] : memref<8x832xf32, #tpu.memory_space<vmem>>, vector<8x64xf32>
    tpu.vector_store %arg20[%c0_109, %c384], %136 {strides = array<i32>} : memref<8x832xf32, #tpu.memory_space<vmem>>, vector<8x64xf32>,
    %138 = vector.extract_strided_slice %123 {offsets = [56, 0], sizes = [8, 64], strides = [1, 1]} : vector<104x64xf32> to vector<8x64xf32>
    %c0_110 = arith.constant 0 : index
    %c448 = arith.constant 448 : index
    %139 = vector.load %arg20[%c0_110, %c448] : memref<8x832xf32, #tpu.memory_space<vmem>>, vector<8x64xf32>
    tpu.vector_store %arg20[%c0_110, %c448], %138 {strides = array<i32>} : memref<8x832xf32, #tpu.memory_space<vmem>>, vector<8x64xf32>,
    %140 = vector.extract_strided_slice %123 {offsets = [64, 0], sizes = [8, 64], strides = [1, 1]} : vector<104x64xf32> to vector<8x64xf32>
    %c0_111 = arith.constant 0 : index
    %c512 = arith.constant 512 : index
    %141 = vector.load %arg20[%c0_111, %c512] : memref<8x832xf32, #tpu.memory_space<vmem>>, vector<8x64xf32>
    tpu.vector_store %arg20[%c0_111, %c512], %140 {strides = array<i32>} : memref<8x832xf32, #tpu.memory_space<vmem>>, vector<8x64xf32>,
    %142 = vector.extract_strided_slice %123 {offsets = [72, 0], sizes = [8, 64], strides = [1, 1]} : vector<104x64xf32> to vector<8x64xf32>
    %c0_112 = arith.constant 0 : index
    %c576 = arith.constant 576 : index
    %143 = vector.load %arg20[%c0_112, %c576] : memref<8x832xf32, #tpu.memory_space<vmem>>, vector<8x64xf32>
    tpu.vector_store %arg20[%c0_112, %c576], %142 {strides = array<i32>} : memref<8x832xf32, #tpu.memory_space<vmem>>, vector<8x64xf32>,
    %144 = vector.extract_strided_slice %123 {offsets = [80, 0], sizes = [8, 64], strides = [1, 1]} : vector<104x64xf32> to vector<8x64xf32>
    %c0_113 = arith.constant 0 : index
    %c640 = arith.constant 640 : index
    %145 = vector.load %arg20[%c0_113, %c640] : memref<8x832xf32, #tpu.memory_space<vmem>>, vector<8x64xf32>
    tpu.vector_store %arg20[%c0_113, %c640], %144 {strides = array<i32>} : memref<8x832xf32, #tpu.memory_space<vmem>>, vector<8x64xf32>,
    %146 = vector.extract_strided_slice %123 {offsets = [88, 0], sizes = [8, 64], strides = [1, 1]} : vector<104x64xf32> to vector<8x64xf32>
    %c0_114 = arith.constant 0 : index
    %c704 = arith.constant 704 : index
    %147 = vector.load %arg20[%c0_114, %c704] : memref<8x832xf32, #tpu.memory_space<vmem>>, vector<8x64xf32>
    tpu.vector_store %arg20[%c0_114, %c704], %146 {strides = array<i32>} : memref<8x832xf32, #tpu.memory_space<vmem>>, vector<8x64xf32>,
    %148 = vector.extract_strided_slice %123 {offsets = [96, 0], sizes = [8, 64], strides = [1, 1]} : vector<104x64xf32> to vector<8x64xf32>
    %c0_115 = arith.constant 0 : index
    %c768 = arith.constant 768 : index
    %149 = vector.load %arg20[%c0_115, %c768] : memref<8x832xf32, #tpu.memory_space<vmem>>, vector<8x64xf32>
    tpu.vector_store %arg20[%c0_115, %c768], %148 {strides = array<i32>} : memref<8x832xf32, #tpu.memory_space<vmem>>, vector<8x64xf32>,
    %c0_116 = arith.constant 0 : index
    %c0_117 = arith.constant 0 : index
    %150 = vector.load %arg20[%c0_116, %c0_117] : memref<8x832xf32, #tpu.memory_space<vmem>>, vector<8x832xf32>
    %c0_118 = arith.constant 0 : index
    %c0_119 = arith.constant 0 : index
    %151 = vector.load %arg9[%c0_118, %c0_119] : memref<832x64xbf16, #tpu.memory_space<vmem>>, vector<832x64xbf16>
    %152 = arith.extf %151 : vector<832x64xbf16> to vector<832x64xf32>
    %cst_120 = arith.constant dense<0.000000e+00> : vector<8x64xf32>
    %153 = tpu.matmul %150, %152, %cst_120 {dimension_numbers = #tpu.dot_dimension_numbers<[1], [0], [0], [1], [0, 0, 1, 1], [], []>} : vector<8x832xf32>, vector<832x64xf32>, vector<8x64xf32> -> vector<8x64xf32>
    %c0_121 = arith.constant 0 : index
    %c0_122 = arith.constant 0 : index
    %154 = vector.load %arg10[%c0_121, %c0_122] : memref<1x64xf32, #tpu.memory_space<vmem>>, vector<1x64xf32>
    %155 = vector.broadcast %154 : vector<1x64xf32> to vector<8x64xf32>
    %156 = arith.addf %153, %155 : vector<8x64xf32>
    %157 = vector.extract_strided_slice %156 {offsets = [0, 0], sizes = [2, 64], strides = [1, 1]} : vector<8x64xf32> to vector<2x64xf32>
    %c0_123 = arith.constant 0 : index
    %c0_124 = arith.constant 0 : index
    %158 = vector.load %arg15[%c0_123, %c0_124] : memref<2x64xf32, #tpu.memory_space<vmem>>, vector<2x64xf32>
    tpu.vector_store %arg15[%c0_123, %c0_124], %157 {strides = array<i32>} : memref<2x64xf32, #tpu.memory_space<vmem>>, vector<2x64xf32>,
    %c0_125 = arith.constant 0 : index
    %c0_126 = arith.constant 0 : index
    %159 = vector.load %arg11[%c0_125, %c0_126] : memref<64x416xbf16, #tpu.memory_space<vmem>>, vector<64x416xbf16>
    %160 = arith.extf %159 : vector<64x416xbf16> to vector<64x416xf32>
    %cst_127 = arith.constant dense<0.000000e+00> : vector<8x416xf32>
    %161 = tpu.matmul %156, %160, %cst_127 {dimension_numbers = #tpu.dot_dimension_numbers<[1], [0], [0], [1], [0, 0, 1, 1], [], []>} : vector<8x64xf32>, vector<64x416xf32>, vector<8x416xf32> -> vector<8x416xf32>
    %c0_128 = arith.constant 0 : index
    %c0_129 = arith.constant 0 : index
    %162 = vector.load %arg12[%c0_128, %c0_129] : memref<1x416xf32, #tpu.memory_space<vmem>>, vector<1x416xf32>
    %163 = vector.broadcast %162 : vector<1x416xf32> to vector<8x416xf32>
    %164 = arith.addf %161, %163 : vector<8x416xf32>
    %165 = vector.extract_strided_slice %164 {offsets = [0, 0], sizes = [8, 32], strides = [1, 1]} : vector<8x416xf32> to vector<8x32xf32>
    %c8_130 = arith.constant 8 : index
    %c0_131 = arith.constant 0 : index
    %166 = vector.load %arg21[%c8_130, %c0_131] : memref<120x32xf32, #tpu.memory_space<vmem>>, vector<8x32xf32>
    tpu.vector_store %arg21[%c8_130, %c0_131], %165 {strides = array<i32>} : memref<120x32xf32, #tpu.memory_space<vmem>>, vector<8x32xf32>,
    %167 = vector.extract_strided_slice %164 {offsets = [0, 32], sizes = [8, 32], strides = [1, 1]} : vector<8x416xf32> to vector<8x32xf32>
    %c16_132 = arith.constant 16 : index
    %c0_133 = arith.constant 0 : index
    %168 = vector.load %arg21[%c16_132, %c0_133] : memref<120x32xf32, #tpu.memory_space<vmem>>, vector<8x32xf32>
    tpu.vector_store %arg21[%c16_132, %c0_133], %167 {strides = array<i32>} : memref<120x32xf32, #tpu.memory_space<vmem>>, vector<8x32xf32>,
    %169 = vector.extract_strided_slice %164 {offsets = [0, 64], sizes = [8, 32], strides = [1, 1]} : vector<8x416xf32> to vector<8x32xf32>
    %c24_134 = arith.constant 24 : index
    %c0_135 = arith.constant 0 : index
    %170 = vector.load %arg21[%c24_134, %c0_135] : memref<120x32xf32, #tpu.memory_space<vmem>>, vector<8x32xf32>
    tpu.vector_store %arg21[%c24_134, %c0_135], %169 {strides = array<i32>} : memref<120x32xf32, #tpu.memory_space<vmem>>, vector<8x32xf32>,
    %171 = vector.extract_strided_slice %164 {offsets = [0, 96], sizes = [8, 32], strides = [1, 1]} : vector<8x416xf32> to vector<8x32xf32>
    %c32_136 = arith.constant 32 : index
    %c0_137 = arith.constant 0 : index
    %172 = vector.load %arg21[%c32_136, %c0_137] : memref<120x32xf32, #tpu.memory_space<vmem>>, vector<8x32xf32>
    tpu.vector_store %arg21[%c32_136, %c0_137], %171 {strides = array<i32>} : memref<120x32xf32, #tpu.memory_space<vmem>>, vector<8x32xf32>,
    %173 = vector.extract_strided_slice %164 {offsets = [0, 128], sizes = [8, 32], strides = [1, 1]} : vector<8x416xf32> to vector<8x32xf32>
    %c40_138 = arith.constant 40 : index
    %c0_139 = arith.constant 0 : index
    %174 = vector.load %arg21[%c40_138, %c0_139] : memref<120x32xf32, #tpu.memory_space<vmem>>, vector<8x32xf32>
    tpu.vector_store %arg21[%c40_138, %c0_139], %173 {strides = array<i32>} : memref<120x32xf32, #tpu.memory_space<vmem>>, vector<8x32xf32>,
    %175 = vector.extract_strided_slice %164 {offsets = [0, 160], sizes = [8, 32], strides = [1, 1]} : vector<8x416xf32> to vector<8x32xf32>
    %c48_140 = arith.constant 48 : index
    %c0_141 = arith.constant 0 : index
    %176 = vector.load %arg21[%c48_140, %c0_141] : memref<120x32xf32, #tpu.memory_space<vmem>>, vector<8x32xf32>
    tpu.vector_store %arg21[%c48_140, %c0_141], %175 {strides = array<i32>} : memref<120x32xf32, #tpu.memory_space<vmem>>, vector<8x32xf32>,
    %177 = vector.extract_strided_slice %164 {offsets = [0, 192], sizes = [8, 32], strides = [1, 1]} : vector<8x416xf32> to vector<8x32xf32>
    %c56_142 = arith.constant 56 : index
    %c0_143 = arith.constant 0 : index
    %178 = vector.load %arg21[%c56_142, %c0_143] : memref<120x32xf32, #tpu.memory_space<vmem>>, vector<8x32xf32>
    tpu.vector_store %arg21[%c56_142, %c0_143], %177 {strides = array<i32>} : memref<120x32xf32, #tpu.memory_space<vmem>>, vector<8x32xf32>,
    %179 = vector.extract_strided_slice %164 {offsets = [0, 224], sizes = [8, 32], strides = [1, 1]} : vector<8x416xf32> to vector<8x32xf32>
    %c64_144 = arith.constant 64 : index
    %c0_145 = arith.constant 0 : index
    %180 = vector.load %arg21[%c64_144, %c0_145] : memref<120x32xf32, #tpu.memory_space<vmem>>, vector<8x32xf32>
    tpu.vector_store %arg21[%c64_144, %c0_145], %179 {strides = array<i32>} : memref<120x32xf32, #tpu.memory_space<vmem>>, vector<8x32xf32>,
    %181 = vector.extract_strided_slice %164 {offsets = [0, 256], sizes = [8, 32], strides = [1, 1]} : vector<8x416xf32> to vector<8x32xf32>
    %c72_146 = arith.constant 72 : index
    %c0_147 = arith.constant 0 : index
    %182 = vector.load %arg21[%c72_146, %c0_147] : memref<120x32xf32, #tpu.memory_space<vmem>>, vector<8x32xf32>
    tpu.vector_store %arg21[%c72_146, %c0_147], %181 {strides = array<i32>} : memref<120x32xf32, #tpu.memory_space<vmem>>, vector<8x32xf32>,
    %183 = vector.extract_strided_slice %164 {offsets = [0, 288], sizes = [8, 32], strides = [1, 1]} : vector<8x416xf32> to vector<8x32xf32>
    %c80_148 = arith.constant 80 : index
    %c0_149 = arith.constant 0 : index
    %184 = vector.load %arg21[%c80_148, %c0_149] : memref<120x32xf32, #tpu.memory_space<vmem>>, vector<8x32xf32>
    tpu.vector_store %arg21[%c80_148, %c0_149], %183 {strides = array<i32>} : memref<120x32xf32, #tpu.memory_space<vmem>>, vector<8x32xf32>,
    %185 = vector.extract_strided_slice %164 {offsets = [0, 320], sizes = [8, 32], strides = [1, 1]} : vector<8x416xf32> to vector<8x32xf32>
    %c88_150 = arith.constant 88 : index
    %c0_151 = arith.constant 0 : index
    %186 = vector.load %arg21[%c88_150, %c0_151] : memref<120x32xf32, #tpu.memory_space<vmem>>, vector<8x32xf32>
    tpu.vector_store %arg21[%c88_150, %c0_151], %185 {strides = array<i32>} : memref<120x32xf32, #tpu.memory_space<vmem>>, vector<8x32xf32>,
    %187 = vector.extract_strided_slice %164 {offsets = [0, 352], sizes = [8, 32], strides = [1, 1]} : vector<8x416xf32> to vector<8x32xf32>
    %c96_152 = arith.constant 96 : index
    %c0_153 = arith.constant 0 : index
    %188 = vector.load %arg21[%c96_152, %c0_153] : memref<120x32xf32, #tpu.memory_space<vmem>>, vector<8x32xf32>
    tpu.vector_store %arg21[%c96_152, %c0_153], %187 {strides = array<i32>} : memref<120x32xf32, #tpu.memory_space<vmem>>, vector<8x32xf32>,
    %189 = vector.extract_strided_slice %164 {offsets = [0, 384], sizes = [8, 32], strides = [1, 1]} : vector<8x416xf32> to vector<8x32xf32>
    %c104_154 = arith.constant 104 : index
    %c0_155 = arith.constant 0 : index
    %190 = vector.load %arg21[%c104_154, %c0_155] : memref<120x32xf32, #tpu.memory_space<vmem>>, vector<8x32xf32>
    tpu.vector_store %arg21[%c104_154, %c0_155], %189 {strides = array<i32>} : memref<120x32xf32, #tpu.memory_space<vmem>>, vector<8x32xf32>,
    %c0_156 = arith.constant 0 : index
    %c0_157 = arith.constant 0 : index
    %191 = vector.load %arg21[%c0_156, %c0_157] : memref<120x32xf32, #tpu.memory_space<vmem>>, vector<104x32xf32>
    %c8_158 = arith.constant 8 : index
    %c0_159 = arith.constant 0 : index
    %192 = vector.load %arg21[%c8_158, %c0_159] : memref<120x32xf32, #tpu.memory_space<vmem>>, vector<104x32xf32>
    %c16_160 = arith.constant 16 : index
    %c0_161 = arith.constant 0 : index
    %193 = vector.load %arg21[%c16_160, %c0_161] : memref<120x32xf32, #tpu.memory_space<vmem>>, vector<104x32xf32>
    %c0_162 = arith.constant 0 : index
    %c0_163 = arith.constant 0 : index
    %194 = vector.load %arg22[%c0_162, %c0_163] : memref<104x96xf32, #tpu.memory_space<vmem>>, vector<104x32xf32>
    tpu.vector_store %arg22[%c0_162, %c0_163], %191 {strides = array<i32>} : memref<104x96xf32, #tpu.memory_space<vmem>>, vector<104x32xf32>,
    %c0_164 = arith.constant 0 : index
    %c32_165 = arith.constant 32 : index
    %195 = vector.load %arg22[%c0_164, %c32_165] : memref<104x96xf32, #tpu.memory_space<vmem>>, vector<104x32xf32>
    tpu.vector_store %arg22[%c0_164, %c32_165], %192 {strides = array<i32>} : memref<104x96xf32, #tpu.memory_space<vmem>>, vector<104x32xf32>,
    %c0_166 = arith.constant 0 : index
    %c64_167 = arith.constant 64 : index
    %196 = vector.load %arg22[%c0_166, %c64_167] : memref<104x96xf32, #tpu.memory_space<vmem>>, vector<104x32xf32>
    tpu.vector_store %arg22[%c0_166, %c64_167], %193 {strides = array<i32>} : memref<104x96xf32, #tpu.memory_space<vmem>>, vector<104x32xf32>,
    %c0_168 = arith.constant 0 : index
    %c0_169 = arith.constant 0 : index
    %197 = vector.load %arg22[%c0_168, %c0_169] : memref<104x96xf32, #tpu.memory_space<vmem>>, vector<104x96xf32>
    %c0_170 = arith.constant 0 : index
    %c0_171 = arith.constant 0 : index
    %c0_172 = arith.constant 0 : index
    %198 = vector.load %arg13[%c0_170, %c0_171, %c0_172] : memref<5x96x32xbf16, #tpu.memory_space<vmem>>, vector<1x96x32xbf16>
    %199 = vector.shape_cast %198 : vector<1x96x32xbf16> to vector<96x32xbf16>
    %200 = arith.extf %199 : vector<96x32xbf16> to vector<96x32xf32>
    %cst_173 = arith.constant dense<0.000000e+00> : vector<104x32xf32>
    %201 = tpu.matmul %197, %200, %cst_173 {dimension_numbers = #tpu.dot_dimension_numbers<[1], [0], [0], [1], [0, 0, 1, 1], [], []>} : vector<104x96xf32>, vector<96x32xf32>, vector<104x32xf32> -> vector<104x32xf32>
    %c0_174 = arith.constant 0 : index
    %c0_175 = arith.constant 0 : index
    %c0_176 = arith.constant 0 : index
    %202 = vector.load %arg14[%c0_174, %c0_175, %c0_176] : memref<5x1x32xf32, #tpu.memory_space<vmem>>, vector<1x1x32xf32>
    %203 = vector.shape_cast %202 : vector<1x1x32xf32> to vector<1x32xf32>
    %204 = vector.broadcast %203 : vector<1x32xf32> to vector<104x32xf32>
    %205 = arith.addf %201, %204 : vector<104x32xf32>
    %cst_177 = arith.constant 0.000000e+00 : f32
    %206 = vector.broadcast %cst_177 : f32 to vector<104x32xf32>
    %207 = arith.maximumf %205, %206 : vector<104x32xf32>
    %c8_178 = arith.constant 8 : index
    %c0_179 = arith.constant 0 : index
    %208 = vector.load %arg21[%c8_178, %c0_179] : memref<120x32xf32, #tpu.memory_space<vmem>>, vector<104x32xf32>
    tpu.vector_store %arg21[%c8_178, %c0_179], %207 {strides = array<i32>} : memref<120x32xf32, #tpu.memory_space<vmem>>, vector<104x32xf32>,
    %c0_180 = arith.constant 0 : index
    %c0_181 = arith.constant 0 : index
    %209 = vector.load %arg21[%c0_180, %c0_181] : memref<120x32xf32, #tpu.memory_space<vmem>>, vector<104x32xf32>
    %c8_182 = arith.constant 8 : index
    %c0_183 = arith.constant 0 : index
    %210 = vector.load %arg21[%c8_182, %c0_183] : memref<120x32xf32, #tpu.memory_space<vmem>>, vector<104x32xf32>
    %c16_184 = arith.constant 16 : index
    %c0_185 = arith.constant 0 : index
    %211 = vector.load %arg21[%c16_184, %c0_185] : memref<120x32xf32, #tpu.memory_space<vmem>>, vector<104x32xf32>
    %c0_186 = arith.constant 0 : index
    %c0_187 = arith.constant 0 : index
    %212 = vector.load %arg22[%c0_186, %c0_187] : memref<104x96xf32, #tpu.memory_space<vmem>>, vector<104x32xf32>
    tpu.vector_store %arg22[%c0_186, %c0_187], %209 {strides = array<i32>} : memref<104x96xf32, #tpu.memory_space<vmem>>, vector<104x32xf32>,
    %c0_188 = arith.constant 0 : index
    %c32_189 = arith.constant 32 : index
    %213 = vector.load %arg22[%c0_188, %c32_189] : memref<104x96xf32, #tpu.memory_space<vmem>>, vector<104x32xf32>
    tpu.vector_store %arg22[%c0_188, %c32_189], %210 {strides = array<i32>} : memref<104x96xf32, #tpu.memory_space<vmem>>, vector<104x32xf32>,
    %c0_190 = arith.constant 0 : index
    %c64_191 = arith.constant 64 : index
    %214 = vector.load %arg22[%c0_190, %c64_191] : memref<104x96xf32, #tpu.memory_space<vmem>>, vector<104x32xf32>
    tpu.vector_store %arg22[%c0_190, %c64_191], %211 {strides = array<i32>} : memref<104x96xf32, #tpu.memory_space<vmem>>, vector<104x32xf32>,
    %c0_192 = arith.constant 0 : index
    %c0_193 = arith.constant 0 : index
    %215 = vector.load %arg22[%c0_192, %c0_193] : memref<104x96xf32, #tpu.memory_space<vmem>>, vector<104x96xf32>
    %c1_194 = arith.constant 1 : index
    %c0_195 = arith.constant 0 : index
    %c0_196 = arith.constant 0 : index
    %216 = vector.load %arg13[%c1_194, %c0_195, %c0_196] : memref<5x96x32xbf16, #tpu.memory_space<vmem>>, vector<1x96x32xbf16>
    %217 = vector.shape_cast %216 : vector<1x96x32xbf16> to vector<96x32xbf16>
    %218 = arith.extf %217 : vector<96x32xbf16> to vector<96x32xf32>
    %cst_197 = arith.constant dense<0.000000e+00> : vector<104x32xf32>
    %219 = tpu.matmul %215, %218, %cst_197 {dimension_numbers = #tpu.dot_dimension_numbers<[1], [0], [0], [1], [0, 0, 1, 1], [], []>} : vector<104x96xf32>, vector<96x32xf32>, vector<104x32xf32> -> vector<104x32xf32>
    %c1_198 = arith.constant 1 : index
    %c0_199 = arith.constant 0 : index
    %c0_200 = arith.constant 0 : index
    %220 = vector.load %arg14[%c1_198, %c0_199, %c0_200] : memref<5x1x32xf32, #tpu.memory_space<vmem>>, vector<1x1x32xf32>
    %221 = vector.shape_cast %220 : vector<1x1x32xf32> to vector<1x32xf32>
    %222 = vector.broadcast %221 : vector<1x32xf32> to vector<104x32xf32>
    %223 = arith.addf %219, %222 : vector<104x32xf32>
    %cst_201 = arith.constant 0.000000e+00 : f32
    %224 = vector.broadcast %cst_201 : f32 to vector<104x32xf32>
    %225 = arith.maximumf %223, %224 : vector<104x32xf32>
    %c8_202 = arith.constant 8 : index
    %c0_203 = arith.constant 0 : index
    %226 = vector.load %arg21[%c8_202, %c0_203] : memref<120x32xf32, #tpu.memory_space<vmem>>, vector<104x32xf32>
    tpu.vector_store %arg21[%c8_202, %c0_203], %225 {strides = array<i32>} : memref<120x32xf32, #tpu.memory_space<vmem>>, vector<104x32xf32>,
    %c0_204 = arith.constant 0 : index
    %c0_205 = arith.constant 0 : index
    %227 = vector.load %arg21[%c0_204, %c0_205] : memref<120x32xf32, #tpu.memory_space<vmem>>, vector<104x32xf32>
    %c8_206 = arith.constant 8 : index
    %c0_207 = arith.constant 0 : index
    %228 = vector.load %arg21[%c8_206, %c0_207] : memref<120x32xf32, #tpu.memory_space<vmem>>, vector<104x32xf32>
    %c16_208 = arith.constant 16 : index
    %c0_209 = arith.constant 0 : index
    %229 = vector.load %arg21[%c16_208, %c0_209] : memref<120x32xf32, #tpu.memory_space<vmem>>, vector<104x32xf32>
    %c0_210 = arith.constant 0 : index
    %c0_211 = arith.constant 0 : index
    %230 = vector.load %arg22[%c0_210, %c0_211] : memref<104x96xf32, #tpu.memory_space<vmem>>, vector<104x32xf32>
    tpu.vector_store %arg22[%c0_210, %c0_211], %227 {strides = array<i32>} : memref<104x96xf32, #tpu.memory_space<vmem>>, vector<104x32xf32>,
    %c0_212 = arith.constant 0 : index
    %c32_213 = arith.constant 32 : index
    %231 = vector.load %arg22[%c0_212, %c32_213] : memref<104x96xf32, #tpu.memory_space<vmem>>, vector<104x32xf32>
    tpu.vector_store %arg22[%c0_212, %c32_213], %228 {strides = array<i32>} : memref<104x96xf32, #tpu.memory_space<vmem>>, vector<104x32xf32>,
    %c0_214 = arith.constant 0 : index
    %c64_215 = arith.constant 64 : index
    %232 = vector.load %arg22[%c0_214, %c64_215] : memref<104x96xf32, #tpu.memory_space<vmem>>, vector<104x32xf32>
    tpu.vector_store %arg22[%c0_214, %c64_215], %229 {strides = array<i32>} : memref<104x96xf32, #tpu.memory_space<vmem>>, vector<104x32xf32>,
    %c0_216 = arith.constant 0 : index
    %c0_217 = arith.constant 0 : index
    %233 = vector.load %arg22[%c0_216, %c0_217] : memref<104x96xf32, #tpu.memory_space<vmem>>, vector<104x96xf32>
    %c2_218 = arith.constant 2 : index
    %c0_219 = arith.constant 0 : index
    %c0_220 = arith.constant 0 : index
    %234 = vector.load %arg13[%c2_218, %c0_219, %c0_220] : memref<5x96x32xbf16, #tpu.memory_space<vmem>>, vector<1x96x32xbf16>
    %235 = vector.shape_cast %234 : vector<1x96x32xbf16> to vector<96x32xbf16>
    %236 = arith.extf %235 : vector<96x32xbf16> to vector<96x32xf32>
    %cst_221 = arith.constant dense<0.000000e+00> : vector<104x32xf32>
    %237 = tpu.matmul %233, %236, %cst_221 {dimension_numbers = #tpu.dot_dimension_numbers<[1], [0], [0], [1], [0, 0, 1, 1], [], []>} : vector<104x96xf32>, vector<96x32xf32>, vector<104x32xf32> -> vector<104x32xf32>
    %c2_222 = arith.constant 2 : index
    %c0_223 = arith.constant 0 : index
    %c0_224 = arith.constant 0 : index
    %238 = vector.load %arg14[%c2_222, %c0_223, %c0_224] : memref<5x1x32xf32, #tpu.memory_space<vmem>>, vector<1x1x32xf32>
    %239 = vector.shape_cast %238 : vector<1x1x32xf32> to vector<1x32xf32>
    %240 = vector.broadcast %239 : vector<1x32xf32> to vector<104x32xf32>
    %241 = arith.addf %237, %240 : vector<104x32xf32>
    %cst_225 = arith.constant 0.000000e+00 : f32
    %242 = vector.broadcast %cst_225 : f32 to vector<104x32xf32>
    %243 = arith.maximumf %241, %242 : vector<104x32xf32>
    %c8_226 = arith.constant 8 : index
    %c0_227 = arith.constant 0 : index
    %244 = vector.load %arg21[%c8_226, %c0_227] : memref<120x32xf32, #tpu.memory_space<vmem>>, vector<104x32xf32>
    tpu.vector_store %arg21[%c8_226, %c0_227], %243 {strides = array<i32>} : memref<120x32xf32, #tpu.memory_space<vmem>>, vector<104x32xf32>,
    %c0_228 = arith.constant 0 : index
    %c0_229 = arith.constant 0 : index
    %245 = vector.load %arg21[%c0_228, %c0_229] : memref<120x32xf32, #tpu.memory_space<vmem>>, vector<104x32xf32>
    %c8_230 = arith.constant 8 : index
    %c0_231 = arith.constant 0 : index
    %246 = vector.load %arg21[%c8_230, %c0_231] : memref<120x32xf32, #tpu.memory_space<vmem>>, vector<104x32xf32>
    %c16_232 = arith.constant 16 : index
    %c0_233 = arith.constant 0 : index
    %247 = vector.load %arg21[%c16_232, %c0_233] : memref<120x32xf32, #tpu.memory_space<vmem>>, vector<104x32xf32>
    %c0_234 = arith.constant 0 : index
    %c0_235 = arith.constant 0 : index
    %248 = vector.load %arg22[%c0_234, %c0_235] : memref<104x96xf32, #tpu.memory_space<vmem>>, vector<104x32xf32>
    tpu.vector_store %arg22[%c0_234, %c0_235], %245 {strides = array<i32>} : memref<104x96xf32, #tpu.memory_space<vmem>>, vector<104x32xf32>,
    %c0_236 = arith.constant 0 : index
    %c32_237 = arith.constant 32 : index
    %249 = vector.load %arg22[%c0_236, %c32_237] : memref<104x96xf32, #tpu.memory_space<vmem>>, vector<104x32xf32>
    tpu.vector_store %arg22[%c0_236, %c32_237], %246 {strides = array<i32>} : memref<104x96xf32, #tpu.memory_space<vmem>>, vector<104x32xf32>,
    %c0_238 = arith.constant 0 : index
    %c64_239 = arith.constant 64 : index
    %250 = vector.load %arg22[%c0_238, %c64_239] : memref<104x96xf32, #tpu.memory_space<vmem>>, vector<104x32xf32>
    tpu.vector_store %arg22[%c0_238, %c64_239], %247 {strides = array<i32>} : memref<104x96xf32, #tpu.memory_space<vmem>>, vector<104x32xf32>,
    %c0_240 = arith.constant 0 : index
    %c0_241 = arith.constant 0 : index
    %251 = vector.load %arg22[%c0_240, %c0_241] : memref<104x96xf32, #tpu.memory_space<vmem>>, vector<104x96xf32>
    %c3 = arith.constant 3 : index
    %c0_242 = arith.constant 0 : index
    %c0_243 = arith.constant 0 : index
    %252 = vector.load %arg13[%c3, %c0_242, %c0_243] : memref<5x96x32xbf16, #tpu.memory_space<vmem>>, vector<1x96x32xbf16>
    %253 = vector.shape_cast %252 : vector<1x96x32xbf16> to vector<96x32xbf16>
    %254 = arith.extf %253 : vector<96x32xbf16> to vector<96x32xf32>
    %cst_244 = arith.constant dense<0.000000e+00> : vector<104x32xf32>
    %255 = tpu.matmul %251, %254, %cst_244 {dimension_numbers = #tpu.dot_dimension_numbers<[1], [0], [0], [1], [0, 0, 1, 1], [], []>} : vector<104x96xf32>, vector<96x32xf32>, vector<104x32xf32> -> vector<104x32xf32>
    %c3_245 = arith.constant 3 : index
    %c0_246 = arith.constant 0 : index
    %c0_247 = arith.constant 0 : index
    %256 = vector.load %arg14[%c3_245, %c0_246, %c0_247] : memref<5x1x32xf32, #tpu.memory_space<vmem>>, vector<1x1x32xf32>
    %257 = vector.shape_cast %256 : vector<1x1x32xf32> to vector<1x32xf32>
    %258 = vector.broadcast %257 : vector<1x32xf32> to vector<104x32xf32>
    %259 = arith.addf %255, %258 : vector<104x32xf32>
    %cst_248 = arith.constant 0.000000e+00 : f32
    %260 = vector.broadcast %cst_248 : f32 to vector<104x32xf32>
    %261 = arith.maximumf %259, %260 : vector<104x32xf32>
    %c8_249 = arith.constant 8 : index
    %c0_250 = arith.constant 0 : index
    %262 = vector.load %arg21[%c8_249, %c0_250] : memref<120x32xf32, #tpu.memory_space<vmem>>, vector<104x32xf32>
    tpu.vector_store %arg21[%c8_249, %c0_250], %261 {strides = array<i32>} : memref<120x32xf32, #tpu.memory_space<vmem>>, vector<104x32xf32>,
    %c0_251 = arith.constant 0 : index
    %c0_252 = arith.constant 0 : index
    %263 = vector.load %arg21[%c0_251, %c0_252] : memref<120x32xf32, #tpu.memory_space<vmem>>, vector<104x32xf32>
    %c8_253 = arith.constant 8 : index
    %c0_254 = arith.constant 0 : index
    %264 = vector.load %arg21[%c8_253, %c0_254] : memref<120x32xf32, #tpu.memory_space<vmem>>, vector<104x32xf32>
    %c16_255 = arith.constant 16 : index
    %c0_256 = arith.constant 0 : index
    %265 = vector.load %arg21[%c16_255, %c0_256] : memref<120x32xf32, #tpu.memory_space<vmem>>, vector<104x32xf32>
    %c0_257 = arith.constant 0 : index
    %c0_258 = arith.constant 0 : index
    %266 = vector.load %arg22[%c0_257, %c0_258] : memref<104x96xf32, #tpu.memory_space<vmem>>, vector<104x32xf32>
    tpu.vector_store %arg22[%c0_257, %c0_258], %263 {strides = array<i32>} : memref<104x96xf32, #tpu.memory_space<vmem>>, vector<104x32xf32>,
    %c0_259 = arith.constant 0 : index
    %c32_260 = arith.constant 32 : index
    %267 = vector.load %arg22[%c0_259, %c32_260] : memref<104x96xf32, #tpu.memory_space<vmem>>, vector<104x32xf32>
    tpu.vector_store %arg22[%c0_259, %c32_260], %264 {strides = array<i32>} : memref<104x96xf32, #tpu.memory_space<vmem>>, vector<104x32xf32>,
    %c0_261 = arith.constant 0 : index
    %c64_262 = arith.constant 64 : index
    %268 = vector.load %arg22[%c0_261, %c64_262] : memref<104x96xf32, #tpu.memory_space<vmem>>, vector<104x32xf32>
    tpu.vector_store %arg22[%c0_261, %c64_262], %265 {strides = array<i32>} : memref<104x96xf32, #tpu.memory_space<vmem>>, vector<104x32xf32>,
    %c0_263 = arith.constant 0 : index
    %c0_264 = arith.constant 0 : index
    %269 = vector.load %arg22[%c0_263, %c0_264] : memref<104x96xf32, #tpu.memory_space<vmem>>, vector<104x96xf32>
    %c4 = arith.constant 4 : index
    %c0_265 = arith.constant 0 : index
    %c0_266 = arith.constant 0 : index
    %270 = vector.load %arg13[%c4, %c0_265, %c0_266] : memref<5x96x32xbf16, #tpu.memory_space<vmem>>, vector<1x96x32xbf16>
    %271 = vector.shape_cast %270 : vector<1x96x32xbf16> to vector<96x32xbf16>
    %272 = arith.extf %271 : vector<96x32xbf16> to vector<96x32xf32>
    %cst_267 = arith.constant dense<0.000000e+00> : vector<104x32xf32>
    %273 = tpu.matmul %269, %272, %cst_267 {dimension_numbers = #tpu.dot_dimension_numbers<[1], [0], [0], [1], [0, 0, 1, 1], [], []>} : vector<104x96xf32>, vector<96x32xf32>, vector<104x32xf32> -> vector<104x32xf32>
    %c4_268 = arith.constant 4 : index
    %c0_269 = arith.constant 0 : index
    %c0_270 = arith.constant 0 : index
    %274 = vector.load %arg14[%c4_268, %c0_269, %c0_270] : memref<5x1x32xf32, #tpu.memory_space<vmem>>, vector<1x1x32xf32>
    %275 = vector.shape_cast %274 : vector<1x1x32xf32> to vector<1x32xf32>
    %276 = vector.broadcast %275 : vector<1x32xf32> to vector<104x32xf32>
    %277 = arith.addf %273, %276 : vector<104x32xf32>
    %278 = vector.extract_strided_slice %277 {offsets = [0, 0], sizes = [2, 32], strides = [1, 1]} : vector<104x32xf32> to vector<2x32xf32>
    %c0_271 = arith.constant 0 : index
    %c0_272 = arith.constant 0 : index
    %279 = vector.load %arg16[%c0_271, %c0_272] : memref<2x416xf32, #tpu.memory_space<vmem>>, vector<2x32xf32>
    tpu.vector_store %arg16[%c0_271, %c0_272], %278 {strides = array<i32>} : memref<2x416xf32, #tpu.memory_space<vmem>>, vector<2x32xf32>,
    %280 = vector.extract_strided_slice %277 {offsets = [8, 0], sizes = [2, 32], strides = [1, 1]} : vector<104x32xf32> to vector<2x32xf32>
    %c0_273 = arith.constant 0 : index
    %c32_274 = arith.constant 32 : index
    %281 = vector.load %arg16[%c0_273, %c32_274] : memref<2x416xf32, #tpu.memory_space<vmem>>, vector<2x32xf32>
    tpu.vector_store %arg16[%c0_273, %c32_274], %280 {strides = array<i32>} : memref<2x416xf32, #tpu.memory_space<vmem>>, vector<2x32xf32>,
    %282 = vector.extract_strided_slice %277 {offsets = [16, 0], sizes = [2, 32], strides = [1, 1]} : vector<104x32xf32> to vector<2x32xf32>
    %c0_275 = arith.constant 0 : index
    %c64_276 = arith.constant 64 : index
    %283 = vector.load %arg16[%c0_275, %c64_276] : memref<2x416xf32, #tpu.memory_space<vmem>>, vector<2x32xf32>
    tpu.vector_store %arg16[%c0_275, %c64_276], %282 {strides = array<i32>} : memref<2x416xf32, #tpu.memory_space<vmem>>, vector<2x32xf32>,
    %284 = vector.extract_strided_slice %277 {offsets = [24, 0], sizes = [2, 32], strides = [1, 1]} : vector<104x32xf32> to vector<2x32xf32>
    %c0_277 = arith.constant 0 : index
    %c96_278 = arith.constant 96 : index
    %285 = vector.load %arg16[%c0_277, %c96_278] : memref<2x416xf32, #tpu.memory_space<vmem>>, vector<2x32xf32>
    tpu.vector_store %arg16[%c0_277, %c96_278], %284 {strides = array<i32>} : memref<2x416xf32, #tpu.memory_space<vmem>>, vector<2x32xf32>,
    %286 = vector.extract_strided_slice %277 {offsets = [32, 0], sizes = [2, 32], strides = [1, 1]} : vector<104x32xf32> to vector<2x32xf32>
    %c0_279 = arith.constant 0 : index
    %c128_280 = arith.constant 128 : index
    %287 = vector.load %arg16[%c0_279, %c128_280] : memref<2x416xf32, #tpu.memory_space<vmem>>, vector<2x32xf32>
    tpu.vector_store %arg16[%c0_279, %c128_280], %286 {strides = array<i32>} : memref<2x416xf32, #tpu.memory_space<vmem>>, vector<2x32xf32>,
    %288 = vector.extract_strided_slice %277 {offsets = [40, 0], sizes = [2, 32], strides = [1, 1]} : vector<104x32xf32> to vector<2x32xf32>
    %c0_281 = arith.constant 0 : index
    %c160 = arith.constant 160 : index
    %289 = vector.load %arg16[%c0_281, %c160] : memref<2x416xf32, #tpu.memory_space<vmem>>, vector<2x32xf32>
    tpu.vector_store %arg16[%c0_281, %c160], %288 {strides = array<i32>} : memref<2x416xf32, #tpu.memory_space<vmem>>, vector<2x32xf32>,
    %290 = vector.extract_strided_slice %277 {offsets = [48, 0], sizes = [2, 32], strides = [1, 1]} : vector<104x32xf32> to vector<2x32xf32>
    %c0_282 = arith.constant 0 : index
    %c192_283 = arith.constant 192 : index
    %291 = vector.load %arg16[%c0_282, %c192_283] : memref<2x416xf32, #tpu.memory_space<vmem>>, vector<2x32xf32>
    tpu.vector_store %arg16[%c0_282, %c192_283], %290 {strides = array<i32>} : memref<2x416xf32, #tpu.memory_space<vmem>>, vector<2x32xf32>,
    %292 = vector.extract_strided_slice %277 {offsets = [56, 0], sizes = [2, 32], strides = [1, 1]} : vector<104x32xf32> to vector<2x32xf32>
    %c0_284 = arith.constant 0 : index
    %c224 = arith.constant 224 : index
    %293 = vector.load %arg16[%c0_284, %c224] : memref<2x416xf32, #tpu.memory_space<vmem>>, vector<2x32xf32>
    tpu.vector_store %arg16[%c0_284, %c224], %292 {strides = array<i32>} : memref<2x416xf32, #tpu.memory_space<vmem>>, vector<2x32xf32>,
    %294 = vector.extract_strided_slice %277 {offsets = [64, 0], sizes = [2, 32], strides = [1, 1]} : vector<104x32xf32> to vector<2x32xf32>
    %c0_285 = arith.constant 0 : index
    %c256_286 = arith.constant 256 : index
    %295 = vector.load %arg16[%c0_285, %c256_286] : memref<2x416xf32, #tpu.memory_space<vmem>>, vector<2x32xf32>
    tpu.vector_store %arg16[%c0_285, %c256_286], %294 {strides = array<i32>} : memref<2x416xf32, #tpu.memory_space<vmem>>, vector<2x32xf32>,
    %296 = vector.extract_strided_slice %277 {offsets = [72, 0], sizes = [2, 32], strides = [1, 1]} : vector<104x32xf32> to vector<2x32xf32>
    %c0_287 = arith.constant 0 : index
    %c288 = arith.constant 288 : index
    %297 = vector.load %arg16[%c0_287, %c288] : memref<2x416xf32, #tpu.memory_space<vmem>>, vector<2x32xf32>
    tpu.vector_store %arg16[%c0_287, %c288], %296 {strides = array<i32>} : memref<2x416xf32, #tpu.memory_space<vmem>>, vector<2x32xf32>,
    %298 = vector.extract_strided_slice %277 {offsets = [80, 0], sizes = [2, 32], strides = [1, 1]} : vector<104x32xf32> to vector<2x32xf32>
    %c0_288 = arith.constant 0 : index
    %c320_289 = arith.constant 320 : index
    %299 = vector.load %arg16[%c0_288, %c320_289] : memref<2x416xf32, #tpu.memory_space<vmem>>, vector<2x32xf32>
    tpu.vector_store %arg16[%c0_288, %c320_289], %298 {strides = array<i32>} : memref<2x416xf32, #tpu.memory_space<vmem>>, vector<2x32xf32>,
    %300 = vector.extract_strided_slice %277 {offsets = [88, 0], sizes = [2, 32], strides = [1, 1]} : vector<104x32xf32> to vector<2x32xf32>
    %c0_290 = arith.constant 0 : index
    %c352 = arith.constant 352 : index
    %301 = vector.load %arg16[%c0_290, %c352] : memref<2x416xf32, #tpu.memory_space<vmem>>, vector<2x32xf32>
    tpu.vector_store %arg16[%c0_290, %c352], %300 {strides = array<i32>} : memref<2x416xf32, #tpu.memory_space<vmem>>, vector<2x32xf32>,
    %302 = vector.extract_strided_slice %277 {offsets = [96, 0], sizes = [2, 32], strides = [1, 1]} : vector<104x32xf32> to vector<2x32xf32>
    %c0_291 = arith.constant 0 : index
    %c384_292 = arith.constant 384 : index
    %303 = vector.load %arg16[%c0_291, %c384_292] : memref<2x416xf32, #tpu.memory_space<vmem>>, vector<2x32xf32>
    tpu.vector_store %arg16[%c0_291, %c384_292], %302 {strides = array<i32>} : memref<2x416xf32, #tpu.memory_space<vmem>>, vector<2x32xf32>,
    return
  }
}

</mosaic_0001>

<bundles_post_ra>
// kernel: mini_cae_forward.1
= control target key start
LH: loop header
LB: loop body
LE: loop exit
PB: predicated region body
PF: predicated region fallthrough
CT: control target
= control target key end

     0   :  { %s10795_s0 = inlined_call_operand.vmem [shape: f32[8,416], index: 0, kind: input, shape index: {}]   ;;  %s10796_s1 = inlined_call_operand.hbm [shape: f32[1,416], index: 1, kind: input, shape index: {}]   ;;  %s10797_s2 = inlined_call_operand.hbm [shape: f32[1,416], index: 2, kind: input, shape index: {}]   ;;  %s10798_s3 = inlined_call_operand.hbm [shape: bf16[3,32,256], index: 3, kind: input, shape index: {}]   ;;  %s10799_s4 = inlined_call_operand.vmem [shape: bf16[3,256,256], index: 4, kind: input, shape index: {}]   ;;  %s10800_s5 = inlined_call_operand.hbm [shape: bf16[3,256,256], index: 5, kind: input, shape index: {}]   ;;  %s10801_s6 = inlined_call_operand.hbm [shape: f32[1,256], index: 6, kind: input, shape index: {}]   ;;  %s10802_s7 = inlined_call_operand.hbm [shape: f32[1,256], index: 7, kind: input, shape index: {}]   ;;  %s10803_s8 = inlined_call_operand.vmem [shape: f32[1,64], index: 8, kind: input, shape index: {}]   ;;  %s10804_s9 = inlined_call_operand.vmem [shape: bf16[832,64], index: 9, kind: input, shape index: {}]   ;;  %s10805_s10 = inlined_call_operand.vmem [shape: f32[1,64], index: 10, kind: input, shape index: {}]   ;;  %s10806_s11 = inlined_call_operand.vmem [shape: bf16[64,416], index: 11, kind: input, shape index: {}]   ;;  %s10807_s12 = inlined_call_operand.hbm [shape: f32[1,416], index: 12, kind: input, shape index: {}]   ;;  %s10808_s13 = inlined_call_operand.vmem [shape: bf16[5,96,32], index: 13, kind: input, shape index: {}]   ;;  %s10809_s14 = inlined_call_operand.vmem [shape: f32[5,1,32], index: 14, kind: input, shape index: {}]   ;;  %s10810_s15 = inlined_call_operand.hbm [shape: f32[2,64], index: 15, kind: output, shape index: {0}]   ;;  %s10811_s16 = inlined_call_operand.vmem [shape: f32[2,416], index: 16, kind: output, shape index: {1}]  }
   0x1   :  { %10813 = sst [smem:[#allocation26_spill]] %s10795_s0 }
   0x2   :  { %22 = vsyncpa [#allocation9], 0 }
   0x3   :  { %23 = vsyncpa [#allocation12], 0 }
   0x4   :  { %24 = vsyncpa [#allocation15], 0 }
   0x5   :  { %25 = vsyncpa [#allocation18], 0 }
   0x6   :  { %26 = vsyncpa [#allocation10], 0  ;;  %s8431_s21 = smov [#allocation11]   ;;  %s8245_s25 = scalar_lea.hbm %s10797_s2, 64 }
   0x7   :  { %s45_s22 = sshll.u32 %s8431_s21, 4  ;;  %p8246_p0 = scmp.ne.s32.totalorder %s10797_s2, %s8245_s25  ;;  %s46_s22 = int_to_ptr.vmem [resolvable:$true] %s45_s22 }
   0x8   :  { %p8249_p1 = scmp.lt.u32.totalorder %s8245_s25, %s10797_s2 }
   0xa   :  { %p8251_p2 = pnand %p8249_p1, %p8246_p0 }
   0xc   :  { %8254 = shalt.err (!%p8251_p2)
}
   0xd   :  { %s8255_s30 = scalar_lea.vmem %s46_s22, 64  ;;  %p8260_p4 = scmp.lt.s32.totalorder %s46_s22, %s46_s22 }
   0xe   :  { %p8256_p3 = scmp.ne.s32.totalorder %s46_s22, %s8255_s30  ;;  %p8261_p5 = scmp.lt.s32.totalorder %s8255_s30, %s8255_s30 }
  0x10   :  { %p8262_p6 = por %p8261_p5, %p8260_p4 }
  0x12   :  { %p8263_p7 = pnand %p8262_p6, %p8256_p3 }
  0x14   :  { %8266 = shalt.err (!%p8263_p7)
}
  0x15   :  { %48 = dma.hbm_to_vmem [thread:$0]  %s10797_s2, 64, %s46_s22, [#allocation12]  }
  0x16   :  { %s8432_s18 = smov [#allocation14]   ;;  %s8433_s20 = smov [#allocation17]  }
  0x17   :  { %s68_s19 = sshll.u32 %s8432_s18, 4  ;;  %s91_s21 = sshll.u32 %s8433_s20, 4  ;;  %s69_s19 = int_to_ptr.vmem [resolvable:$true] %s68_s19  ;;  %s92_s21 = int_to_ptr.vmem [resolvable:$true] %s91_s21 }
  0x18   :  { %s8267_s25 = scalar_lea.hbm %s10800_s5, 12288 }
  0x19   :  { %p8268_p8 = scmp.ne.s32.totalorder %s10800_s5, %s8267_s25  ;;  %p8271_p9 = scmp.lt.u32.totalorder %s8267_s25, %s10800_s5 }
  0x1b   :  { %p8273_p10 = pnand %p8271_p9, %p8268_p8 }
  0x1d   :  { %8276 = shalt.err (!%p8273_p10)
}
  0x1e   :  { %s8277_s2 = scalar_lea.vmem %s69_s19, 12288  ;;  %p8282_p12 = scmp.lt.s32.totalorder %s69_s19, %s69_s19 }
  0x1f   :  { %p8278_p11 = scmp.ne.s32.totalorder %s69_s19, %s8277_s2  ;;  %p8283_p13 = scmp.lt.s32.totalorder %s8277_s2, %s8277_s2 }
  0x21   :  { %p8284_p0 = por %p8283_p13, %p8282_p12 }
  0x23   :  { %p8285_p1 = pnand %p8284_p0, %p8278_p11 }
  0x25   :  { %8288 = shalt.err (!%p8285_p1)
}
  0x26   :  { %s8434_s22 = smov 128   ;;  %s8435_s30 = smov 8  }
  0x27   :  { %74 = dma.hbm_to_vmem [thread:$0]  %s10800_s5, 12288, %s69_s19, [#allocation15], %s8434_s22, %s8434_s22, %s8435_s30  }
  0x28   :  { %s8289_s23 = scalar_lea.hbm %s10802_s7, 32 }
  0x29   :  { %p8290_p2 = scmp.ne.s32.totalorder %s10802_s7, %s8289_s23  ;;  %p8293_p3 = scmp.lt.u32.totalorder %s8289_s23, %s10802_s7 }
  0x2b   :  { %p8295_p4 = pnand %p8293_p3, %p8290_p2 }
  0x2d   :  { %8298 = shalt.err (!%p8295_p4)
}
  0x2e   :  { %s8299_s28 = scalar_lea.vmem %s92_s21, 32  ;;  %p8304_p6 = scmp.lt.s32.totalorder %s92_s21, %s92_s21 }
  0x2f   :  { %p8300_p5 = scmp.ne.s32.totalorder %s92_s21, %s8299_s28  ;;  %p8305_p7 = scmp.lt.s32.totalorder %s8299_s28, %s8299_s28 }
  0x31   :  { %p8306_p8 = por %p8305_p7, %p8304_p6 }
  0x33   :  { %p8307_p9 = pnand %p8306_p8, %p8300_p5 }
  0x35   :  { %8310 = shalt.err (!%p8307_p9)
}
  0x36   :  { %94 = dma.hbm_to_vmem [thread:$0]  %s10802_s7, 32, %s92_s21, [#allocation18]  }
  0x37   :  { %s8436_s29 = smov [#allocation8]   ;;  %s8437_s0 = smov [#allocation13]  }
  0x38   :  { %s35_s2 = sshll.u32 %s8436_s29, 4  ;;  %s54_s17 = sshll.u32 %s8437_s0, 4  ;;  %s36_s2 = int_to_ptr.vmem [resolvable:$true] %s35_s2  ;;  %s55_s17 = int_to_ptr.vmem [resolvable:$true] %s54_s17 }
  0x39   :  { %s8311_s23 = scalar_lea.hbm %s10796_s1, 64 }
  0x3a   :  { %p8312_p10 = scmp.ne.s32.totalorder %s10796_s1, %s8311_s23  ;;  %p8315_p11 = scmp.lt.u32.totalorder %s8311_s23, %s10796_s1 }
  0x3c   :  { %p8317_p12 = pnand %p8315_p11, %p8312_p10 }
  0x3e   :  { %8320 = shalt.err (!%p8317_p12)
}
  0x3f   :  { %s8321_s7 = scalar_lea.vmem %s36_s2, 64  ;;  %p8326_p0 = scmp.lt.s32.totalorder %s36_s2, %s36_s2 }
  0x40   :  { %p8322_p13 = scmp.ne.s32.totalorder %s36_s2, %s8321_s7  ;;  %p8327_p1 = scmp.lt.s32.totalorder %s8321_s7, %s8321_s7 }
  0x42   :  { %p8328_p2 = por %p8327_p1, %p8326_p0 }
  0x44   :  { %p8329_p3 = pnand %p8328_p2, %p8322_p13 }
  0x46   :  { %8332 = shalt.err (!%p8329_p3)
}
  0x47   :  { %38 = dma.hbm_to_vmem [thread:$0]  %s10796_s1, 64, %s36_s2, [#allocation9]  }
  0x48   :  { %s8333_s29 = scalar_lea.hbm %s10798_s3, 1536 }
  0x49   :  { %p8334_p4 = scmp.ne.s32.totalorder %s10798_s3, %s8333_s29  ;;  %p8337_p5 = scmp.lt.u32.totalorder %s8333_s29, %s10798_s3 }
  0x4b   :  { %p8339_p6 = pnand %p8337_p5, %p8334_p4 }
  0x4d   :  { %8342 = shalt.err (!%p8339_p6)
}
  0x4e   :  { %s8343_s24 = scalar_lea.vmem %s55_s17, 1536  ;;  %p8348_p8 = scmp.lt.s32.totalorder %s55_s17, %s55_s17 }
  0x4f   :  { %p8344_p7 = scmp.ne.s32.totalorder %s55_s17, %s8343_s24  ;;  %p8349_p9 = scmp.lt.s32.totalorder %s8343_s24, %s8343_s24 }
  0x51   :  { %p8350_p10 = por %p8349_p9, %p8348_p8 }
  0x53   :  { %p8351_p11 = pnand %p8350_p10, %p8344_p7 }
  0x55   :  { %8354 = shalt.err (!%p8351_p11)
}
  0x56   :  { %60 = dma.hbm_to_vmem [thread:$0]  %s10798_s3, 1536, %s55_s17, [#allocation12], %s8434_s22, %s8434_s22, %s8435_s30  }
  0x57   :  { %s8438_s25 = smov [#allocation16]   ;;  %s8439_s27 = smov [#allocation19]  }
  0x58   :  { %s81_s26 = sshll.u32 %s8438_s25, 4  ;;  %s109_s7 = sshll.u32 %s8439_s27, 4  ;;  %s82_s26 = int_to_ptr.vmem [resolvable:$true] %s81_s26  ;;  %s110_s7 = int_to_ptr.vmem [resolvable:$true] %s109_s7 }
  0x59   :  { %s8355_s5 = scalar_lea.hbm %s10801_s6, 32 }
  0x5a   :  { %p8356_p12 = scmp.ne.s32.totalorder %s10801_s6, %s8355_s5  ;;  %p8359_p13 = scmp.lt.u32.totalorder %s8355_s5, %s10801_s6 }
  0x5c   :  { %p8361_p0 = pnand %p8359_p13, %p8356_p12 }
  0x5e   :  { %8364 = shalt.err (!%p8361_p0)
}
  0x5f   :  { %s8365_s3 = scalar_lea.vmem %s82_s26, 32  ;;  %p8370_p2 = scmp.lt.s32.totalorder %s82_s26, %s82_s26 }
  0x60   :  { %p8366_p1 = scmp.ne.s32.totalorder %s82_s26, %s8365_s3  ;;  %p8371_p3 = scmp.lt.s32.totalorder %s8365_s3, %s8365_s3 }
  0x62   :  { %p8372_p4 = por %p8371_p3, %p8370_p2 }
  0x64   :  { %p8373_p5 = pnand %p8372_p4, %p8366_p1 }
  0x66   :  { %8376 = shalt.err (!%p8373_p5)
}
  0x67   :  { %84 = dma.hbm_to_vmem [thread:$0]  %s10801_s6, 32, %s82_s26, [#allocation15]  }
  0x68   :  { %s8377_s23 = scalar_lea.hbm %s10807_s12, 64 }
  0x69   :  { %p8378_p6 = scmp.ne.s32.totalorder %s10807_s12, %s8377_s23  ;;  %p8381_p7 = scmp.lt.u32.totalorder %s8377_s23, %s10807_s12 }
  0x6b   :  { %p8383_p8 = pnand %p8381_p7, %p8378_p6 }
  0x6d   :  { %8386 = shalt.err (!%p8383_p8)
}
  0x6e   :  { %s8387_s27 = scalar_lea.vmem %s110_s7, 64  ;;  %p8392_p10 = scmp.lt.s32.totalorder %s110_s7, %s110_s7 }
  0x6f   :  { %p8388_p9 = scmp.ne.s32.totalorder %s110_s7, %s8387_s27  ;;  %p8393_p11 = scmp.lt.s32.totalorder %s8387_s27, %s8387_s27 }
  0x71   :  { %p8394_p12 = por %p8393_p11, %p8392_p10 }
  0x73   :  { %p8395_p13 = pnand %p8394_p12, %p8388_p9 }
  0x75   :  { %8398 = shalt.err (!%p8395_p13)
}
  0x76   :  { %112 = dma.hbm_to_vmem [thread:$0]  %s10807_s12, 64, %s110_s7, [#allocation18]  }
  0x77   :  { %8421 = dma.done.wait [#allocation9], 64  }
  0x78   :  { %8422 = vsyncadd [#allocation9], 4294967232 }
  0x79   :  { %8423 = dma.done.wait [#allocation12], 1600  }
  0x7a   :  { %8424 = vsyncadd [#allocation12], 4294965696 }
  0x7b   :  { %8425 = dma.done.wait [#allocation15], 12320  }
  0x7c   :  { %8426 = vsyncadd [#allocation15], 4294954976 }
  0x7d   :  { %8427 = dma.done.wait [#allocation18], 96  }
  0x7e   :  { %8428 = vsyncadd [#allocation18], 4294967200  ;;  %vm138_vm0 = vcmask 261120   ;;  %v157_v0 = vlaneseq  ;;  %v8440_v1 = vmov 0.0   ;;  %s10814_s21 = sld [smem:[#allocation26_spill]]  ;;  %s8441_s3 = smov 96  }
  0x7f   :  { %539 = vmatprep.mubr.f32.mxu0 %v8440_v1  ;;  %139 = vst.msk [vmem:[#allocation2] sm:$0xff] %vm138_vm0, %v8440_v1  ;;  %140 = vst.msk [vmem:[#allocation2 + $0x70] sm:$0xff] %vm138_vm0, %v8440_v1  ;;  %393 = vmatprep.mubr.f32.mxu1 %v8440_v1  ;;  %v155_v9 = vld [vmem:[#allocation8] sm:$0xf]  ;;  %v181_v12 = vld [vmem:[#allocation11] sm:$0xf] }
  0x80   :  { %149 = vst.msk [vmem:[#allocation6] sm:$0xff] %vm138_vm0, %v8440_v1  ;;  %150 = vst.msk [vmem:[#allocation6 + $0x70] sm:$0xff] %vm138_vm0, %v8440_v1  ;;  %v8633_v2 = vshrl.u32 %v157_v0, 7  ;;  %v7915_v23 = vld [vmem:[#allocation13 + $0x4] ss:$8 sps:$4 sm:$0xff]   ;;  %s8442_s22 = smov 32  }
  0x81   :  { %v7917_v24 = vld [vmem:[#allocation13] ss:$8 sps:$4 sm:$0xff]   ;;  %v7918_v27 = vld [vmem:[#allocation13 + $0x14] ss:$8 sps:$4 sm:$0xff]   ;;  %6881 = vmatprep.subr.bf16.mxu0 %v7915_v23  ;;  %v7920_v31 = vld [vmem:[#allocation13 + $0x24] ss:$8 sps:$4 sm:$0xff]  }
  0x82   :  { %v8636_v3 = vsub.s32 0, %v8633_v2  ;;  %v8639_v4 = vsub.s32 3, %v8633_v2  ;;  %v8642_v5 = vsub.s32 1, %v8633_v2  ;;  %v8645_v6 = vsub.s32 2, %v8633_v2  ;;  %6883 = vmatpush1.bf16.msra.mxu0 %v7917_v24  ;;  %v7922_v33 = vld [vmem:[#allocation13 + $0x10] ss:$8 sps:$4 sm:$0xff]   ;;  %6873 = vmatprep.subr.bf16.mxu1 %v7920_v31 }
  0x83   :  { %v7923_v34 = vld [vmem:[#allocation13 + $0x20] ss:$8 sps:$4 sm:$0xff]   ;;  %v7924_v35 = vld [vmem:[#allocation13 + $0x44] ss:$8 sps:$4 sm:$0xff]   ;;  %6885 = vmatprep.subr.bf16.mxu0 %v7918_v27  ;;  %v7927_v37 = vld [vmem:[#allocation13 + $0x34] ss:$8 sps:$4 sm:$0xff]  }
  0x84   :  { %v151_v7 = vld [vmem:[%s10814_s21] sm:$0xff]  ;;  %v154_v8 = vld [vmem:[%s10814_s21 + $0x18] sm:$0xff]  ;;  %v160_v10 = vrot.slane %v155_v9, %v8636_v3  ;;  %v172_v11 = vrot.slane %v155_v9, %v8639_v4  ;;  %v164_v13 = vrot.slane %v155_v9, %v8642_v5  ;;  %v168_v14 = vrot.slane %v155_v9, %v8645_v6  ;;  %v152_v17 = vld [vmem:[%s10814_s21 + $0x8] sm:$0xff]  ;;  %6875 = vmatpush1.bf16.msra.mxu1 %v7923_v34  ;;  %s8443_s30 = smov 64  }
  0x85   :  { %v186_v15 = vrot.slane %v181_v12, %v8636_v3  ;;  %v198_v16 = vrot.slane %v181_v12, %v8639_v4  ;;  %v153_v18 = vld [vmem:[%s10814_s21 + $0x10] sm:$0xff]  ;;  %v190_v22 = vrot.slane %v181_v12, %v8642_v5  ;;  %v194_v26 = vrot.slane %v181_v12, %v8645_v6  ;;  %v7926_v36 = vld [vmem:[#allocation13 + $0x40] ss:$8 sps:$4 sm:$0xff]   ;;  %6877 = vmatprep.subr.bf16.mxu1 %v7927_v37  ;;  %v7933_v43 = vld [vmem:[%s10799_s4 + $0x104] ss:$8 sps:$4 sm:$0xff]  }
  0x86   :  { %v177_v19 = vmul.f32 %v160_v10, %v151_v7  ;;  %v180_v20 = vmul.f32 %v172_v11, %v154_v8  ;;  %v178_v21 = vmul.f32 %v164_v13, %v152_v17  ;;  %v179_v25 = vmul.f32 %v168_v14, %v153_v18  ;;  %v250_v38 = vld [vmem:[#allocation2] sm:$0xff]  ;;  %v7929_v39 = vld [vmem:[#allocation13 + $0x30] ss:$8 sps:$4 sm:$0xff]   ;;  %6887 = vmatpush1.bf16.msra.mxu0 %v7922_v33  ;;  %v7930_v41 = vld [vmem:[#allocation13 + $0x54] ss:$8 sps:$4 sm:$0xff]  }
  0x87   :  { %6889 = vmatprep.subr.bf16.mxu0 %v7924_v35  ;;  %v7932_v42 = vld [vmem:[#allocation13 + $0x50] ss:$8 sps:$4 sm:$0xff]   ;;  %v7936_v45 = vld [vmem:[%s10799_s4 + $0x114] ss:$8 sps:$4 sm:$0xff]   ;;  %v7939_v47 = vld [vmem:[%s10799_s4 + $0x124] ss:$8 sps:$4 sm:$0xff]  }
  0x88   :  { %v203_v28 = vadd.f32 %v186_v15, %v177_v19  ;;  %v206_v29 = vadd.f32 %v198_v16, %v180_v20  ;;  %v204_v30 = vadd.f32 %v190_v22, %v178_v21  ;;  %v205_v32 = vadd.f32 %v194_v26, %v179_v25  ;;  %6879 = vmatpush1.bf16.msra.mxu1 %v7929_v39  ;;  %v7935_v44 = vld [vmem:[%s10799_s4 + $0x100] ss:$8 sps:$4 sm:$0xff]   ;;  %v7938_v46 = vld [vmem:[%s10799_s4 + $0x110] ss:$8 sps:$4 sm:$0xff]   ;;  %v7942_v12 = vld [vmem:[%s10799_s4 + $0x134] ss:$8 sps:$4 sm:$0xff]  }
  0x89   :  { %5674 = vmatmul.mubr.msk.f32.vlgmr.msra.gmra.mrb[0].mxu0 %vm138_vm0, %v250_v38  ;;  %6897 = vmatprep.subr.bf16.mxu1 %v7933_v43  ;;  %v7941_v48 = vld [vmem:[%s10799_s4 + $0x120] ss:$8 sps:$4 sm:$0xff]   ;;  %v7944_v13 = vld [vmem:[%s10799_s4 + $0x130] ss:$8 sps:$4 sm:$0xff]   ;;  %v7945_v14 = vld [vmem:[%s10799_s4 + $0x144] ss:$8 sps:$4 sm:$0xff]  }
  0x8a   :  { %249 = vst.msk [vmem:[#allocation2 + $0x68] sm:$0xff] %vm138_vm0, %v206_v29  ;;  %209 = vrot.lane.b32.xlu0 %v203_v28, %s8441_s3  ;;  %207 = vst.msk [vmem:[#allocation2 + $0x8] sm:$0xff] %vm138_vm0, %v203_v28  ;;  %217 = vrot.lane.b32.xlu1 %v203_v28, %s8442_s22  ;;  %v7947_v15 = vld [vmem:[%s10799_s4 + $0x140] ss:$8 sps:$4 sm:$0xff]   ;;  %v264_v16 = vld [vmem:[#allocation2 + $0x70] sm:$0xff]  ;;  %vm2809_vm1 = vcmask 523264  }
  0x8b   :  { %221 = vst.msk [vmem:[#allocation2 + $0x28] sm:$0xff] %vm138_vm0, %v204_v30  ;;  %235 = vst.msk [vmem:[#allocation2 + $0x48] sm:$0xff] %vm138_vm0, %v205_v32  ;;  %6891 = vmatpush1.bf16.msra.mxu0 %v7926_v36  ;;  %545 = vmatprep.mubr.f32.mxu0 %v8440_v1  ;;  %v7948_v17 = vld [vmem:[%s10799_s4 + $0x154] ss:$8 sps:$4 sm:$0xff]   ;;  %v7950_v18 = vld [vmem:[%s10799_s4 + $0x150] ss:$8 sps:$4 sm:$0xff]  }
  0x8c   :  { %6893 = vmatprep.subr.bf16.mxu0 %v7930_v41  ;;  %v7951_v19 = vld [vmem:[%s10799_s4 + $0x164] ss:$8 sps:$4 sm:$0xff]   ;;  %v7953_v20 = vld [vmem:[%s10799_s4 + $0x160] ss:$8 sps:$4 sm:$0xff]   ;;  %v7954_v22 = vld [vmem:[%s10799_s4 + $0x174] ss:$8 sps:$4 sm:$0xff]  }
  0x8d   :  { %v7956_v24 = vld [vmem:[%s10799_s4 + $0x170] ss:$8 sps:$4 sm:$0xff]   ;;  %v7957_v25 = vld [vmem:[%s10799_s4 + $0x184] ss:$8 sps:$4 sm:$0xff]   ;;  %v7959_v26 = vld [vmem:[%s10799_s4 + $0x180] ss:$8 sps:$4 sm:$0xff]  }
  0x8e   :  { %213 = vrot.lane.b32.xlu0 %v203_v28, %s8443_s30  ;;  %223 = vrot.lane.b32.xlu1 %v204_v30, %s8441_s3  ;;  %v7960_v27 = vld [vmem:[%s10799_s4 + $0x194] ss:$8 sps:$4 sm:$0xff]   ;;  %v7962_v28 = vld [vmem:[%s10799_s4 + $0x190] ss:$8 sps:$4 sm:$0xff]   ;;  %vm2815_vm2 = vcmask 1048064   ;;  %vm8445_vm3 = vmmov 0  }
  0x8f   :  { %6895 = vmatpush1.bf16.msra.mxu0 %v7932_v42  ;;  %v7963_v29 = vld [vmem:[%s10799_s4 + $0x1a4] ss:$8 sps:$4 sm:$0xff]   ;;  %v7966_v31 = vld [vmem:[%s10799_s4 + $0x1b4] ss:$8 sps:$4 sm:$0xff]   ;;  %v7971_v34 = vld [vmem:[%s10799_s4 + $0x1c0] ss:$8 sps:$4 sm:$0xff]  }
  0x90   :  { %v7969_v33 = vld [vmem:[%s10799_s4 + $0x1c4] ss:$8 sps:$4 sm:$0xff]   ;;  %v7972_v35 = vld [vmem:[%s10799_s4 + $0x1d4] ss:$8 sps:$4 sm:$0xff]   ;;  %v7974_v36 = vld [vmem:[%s10799_s4 + $0x1d0] ss:$8 sps:$4 sm:$0xff]  }
  0x91   :  { %v251_v40 = vld [vmem:[#allocation2 + $0x8] sm:$0xff]  ;;  %v7978_v39 = vld [vmem:[%s10799_s4 + $0x1f4] ss:$8 sps:$4 sm:$0xff]   ;;  %vm3353_vm4 = vcmask 517120   ;;  %vm3693_vm5 = vcmask 523520   ;;  %vm3747_vm6 = vcmask 785920  }
  0x92   :  { %227 = vrot.lane.b32.xlu0 %v204_v30, %s8443_s30  ;;  %231 = vrot.lane.b32.xlu1 %v204_v30, %s8442_s22  ;;  %v255_v61 = vld [vmem:[#allocation2 + $0x28] sm:$0xff]  ;;  %vm3805_vm7 = vcmask 785408   ;;  %vm5523_vm8 = vcmask 254976  }
  0x93   :  { %5661 = vmatmul.mubr.msk.f32.vlgmr.msra.gmra.mrb[0].mxu1 %vm138_vm0, %v251_v40  ;;  %5675 = vmatmul.mubr.msk.f32.gmra.mrb[2].mxu0 %vm138_vm0, %v251_v40  ;;  %v259_v7 = vld [vmem:[#allocation2 + $0x48] sm:$0xff]  ;;  %v7980_v40 = vld [vmem:[%s10799_s4 + $0x1f0] ss:$8 sps:$4 sm:$0xff]  }
  0x94   :  { %399 = vmatprep.mubr.f32.mxu1 %v8440_v1  ;;  %551 = vmatprep.mubr.f32.mxu0 %v8440_v1  ;;  %v263_v11 = vld [vmem:[#allocation2 + $0x68] sm:$0xff] }
  0x95   :  { %6899 = vmatpush1.bf16.msra.mxu1 %v7935_v44  ;;  %v7965_v30 = vld [vmem:[%s10799_s4 + $0x1a0] ss:$8 sps:$4 sm:$0xff]   ;;  %v7975_v37 = vld [vmem:[%s10799_s4 + $0x1e4] ss:$8 sps:$4 sm:$0xff]  }
  0x96   :  { %237 = vrot.lane.b32.xlu0 %v205_v32, %s8441_s3  ;;  %241 = vrot.lane.b32.xlu1 %v205_v32, %s8443_s30  ;;  %v7977_v38 = vld [vmem:[%s10799_s4 + $0x1e0] ss:$8 sps:$4 sm:$0xff]   ;;  %v7981_v41 = vld [vmem:[%s10799_s4 + $0x4] ss:$8 sps:$4 sm:$0xff]  }
  0x97   :  { %6901 = vmatprep.subr.bf16.mxu1 %v7936_v45 }
  0x99   :  { %6903 = vmatpush1.bf16.msra.mxu1 %v7938_v46 }
  0x9a   :  { %245 = vrot.lane.b32.xlu0 %v205_v32, %s8442_s22  ;;  %6905 = vmatprep.subr.bf16.mxu1 %v7939_v47  ;;  %v7968_v32 = vld [vmem:[%s10799_s4 + $0x1b0] ss:$8 sps:$4 sm:$0xff]  }
  0x9d   :  { %6907 = vmatpush1.bf16.msra.mxu1 %v7941_v48 }
  0x9e   :  { %6909 = vmatprep.subr.bf16.mxu1 %v7942_v12 }
  0xa1   :  { %6911 = vmatpush1.bf16.msra.mxu1 %v7944_v13 }
  0xa2   :  { %6913 = vmatprep.subr.bf16.mxu1 %v7945_v14 }
  0xa5   :  { %6915 = vmatpush1.bf16.msra.mxu1 %v7947_v15 }
  0xa6   :  { %6917 = vmatprep.subr.bf16.mxu1 %v7948_v17 }
  0xa9   :  { %6919 = vmatpush1.bf16.msra.mxu1 %v7950_v18 }
  0xaa   :  { %6921 = vmatprep.subr.bf16.mxu1 %v7951_v19 }
  0xad   :  { %6923 = vmatpush1.bf16.msra.mxu1 %v7953_v20 }
  0xae   :  { %6925 = vmatprep.subr.bf16.mxu1 %v7954_v22 }
  0xb1   :  { %6927 = vmatpush1.bf16.msra.mxu1 %v7956_v24 }
  0xb2   :  { %6929 = vmatprep.subr.bf16.mxu1 %v7957_v25  ;;  %v7984_v25 = vld [vmem:[%s10799_s4 + $0x14] ss:$8 sps:$4 sm:$0xff]  }
  0xb5   :  { %6931 = vmatpush1.bf16.msra.mxu1 %v7959_v26 }
  0xb6   :  { %6933 = vmatprep.subr.bf16.mxu1 %v7960_v27 }
  0xb9   :  { %6935 = vmatpush1.bf16.msra.mxu1 %v7962_v28 }
  0xba   :  { %6937 = vmatprep.subr.bf16.mxu1 %v7963_v29 }
  0xbd   :  { %6939 = vmatpush1.bf16.msra.mxu1 %v7965_v30 }
  0xbe   :  { %6941 = vmatprep.subr.bf16.mxu1 %v7966_v31 }
  0xc1   :  { %6943 = vmatpush1.bf16.msra.mxu1 %v7968_v32  ;;  %v7986_v32 = vld [vmem:[%s10799_s4 + $0x10] ss:$8 sps:$4 sm:$0xff]  }
  0xc2   :  { %6945 = vmatprep.subr.bf16.mxu1 %v7969_v33 }
  0xc5   :  { %6947 = vmatpush1.bf16.msra.mxu1 %v7971_v34 }
  0xc6   :  { %6949 = vmatprep.subr.bf16.mxu1 %v7972_v35  ;;  %v7987_v35 = vld [vmem:[%s10799_s4 + $0x24] ss:$8 sps:$4 sm:$0xff]  }
  0xc9   :  { %6951 = vmatpush1.bf16.msra.mxu1 %v7974_v36 }
  0xca   :  { %6953 = vmatprep.subr.bf16.mxu1 %v7975_v37 }
  0xcd   :  { %6955 = vmatpush1.bf16.msra.mxu1 %v7977_v38 }
  0xce   :  { %6957 = vmatprep.subr.bf16.mxu1 %v7978_v39 }
  0xd1   :  { %6959 = vmatpush1.bf16.msra.mxu1 %v7980_v40 }
  0xd2   :  { %6961 = vmatprep.subr.bf16.mxu1 %v7981_v41 }
  0xfc   :  { %v210_v49 = vpop.permute.xlu0 %209  ;;  %v218_v50 = vpop.permute.xlu1 %217 }
  0xfd   :  { %212 = vst.msk [vmem:[#allocation2 + $0x10] sm:$0xff] %vm138_vm0, %v210_v49  ;;  %220 = vst.msk [vmem:[#allocation2 + $0x20] sm:$0xff] %vm138_vm0, %v218_v50 }
 0x100   :  { %v214_v51 = vpop.permute.xlu0 %213  ;;  %v224_v52 = vpop.permute.xlu1 %223 }
 0x101   :  { %216 = vst.msk [vmem:[#allocation2 + $0x18] sm:$0xff] %vm138_vm0, %v214_v51  ;;  %226 = vst.msk [vmem:[#allocation2 + $0x30] sm:$0xff] %vm138_vm0, %v224_v52 }
 0x104   :  { %v8708_v53 = vld [vmem:[#allocation2 + $0x10] sm:$0xff]  ;;  %v228_v54 = vpop.permute.xlu0 %227  ;;  %v232_v55 = vpop.permute.xlu1 %231  ;;  %v254_v59 = vld [vmem:[#allocation2 + $0x20] sm:$0xff] }
 0x105   :  { %5662 = vmatmul.mubr.msk.f32.gmra.mrb[2].mxu1 %vm138_vm0, %v8708_v53  ;;  %5676 = vmatmul.mubr.msk.f32.gmra.mrb[4].mxu0 %vm138_vm0, %v8708_v53  ;;  %230 = vst.msk [vmem:[#allocation2 + $0x38] sm:$0xff] %vm138_vm0, %v228_v54  ;;  %234 = vst.msk [vmem:[#allocation2 + $0x40] sm:$0xff] %vm138_vm0, %v232_v55 }
 0x106   :  { %405 = vmatprep.mubr.f32.mxu1 %v8440_v1  ;;  %557 = vmatprep.mubr.f32.mxu0 %v8440_v1 }
 0x108   :  { %v253_v56 = vld [vmem:[#allocation2 + $0x18] sm:$0xff]  ;;  %v238_v57 = vpop.permute.xlu0 %237  ;;  %v242_v58 = vpop.permute.xlu1 %241  ;;  %v256_v62 = vld [vmem:[#allocation2 + $0x30] sm:$0xff] }
 0x109   :  { %5663 = vmatmul.mubr.msk.f32.gmra.mrb[4].mxu1 %vm138_vm0, %v253_v56  ;;  %5677 = vmatmul.mubr.msk.f32.gmra.mrb[6].mxu0 %vm138_vm0, %v253_v56  ;;  %240 = vst.msk [vmem:[#allocation2 + $0x50] sm:$0xff] %vm138_vm0, %v238_v57  ;;  %244 = vst.msk [vmem:[#allocation2 + $0x58] sm:$0xff] %vm138_vm0, %v242_v58 }
 0x10a   :  { %411 = vmatprep.mubr.f32.mxu1 %v8440_v1  ;;  %563 = vmatprep.mubr.f32.mxu0 %v8440_v1 }
 0x10c   :  { %v246_v60 = vpop.permute.xlu0 %245  ;;  %v257_v63 = vld [vmem:[#allocation2 + $0x38] sm:$0xff]  ;;  %v258_v0 = vld [vmem:[#allocation2 + $0x40] sm:$0xff] }
 0x10d   :  { %5664 = vmatmul.mubr.msk.f32.gmra.mrb[6].mxu1 %vm138_vm0, %v254_v59  ;;  %5678 = vmatmul.mubr.msk.f32.gmra.mrb[8].mxu0 %vm138_vm0, %v254_v59  ;;  %248 = vst.msk [vmem:[#allocation2 + $0x60] sm:$0xff] %vm138_vm0, %v246_v60 }
 0x10e   :  { %417 = vmatprep.mubr.f32.mxu1 %v8440_v1  ;;  %569 = vmatprep.mubr.f32.mxu0 %v8440_v1 }
 0x110   :  { %v260_v8 = vld [vmem:[#allocation2 + $0x50] sm:$0xff]  ;;  %v261_v9 = vld [vmem:[#allocation2 + $0x58] sm:$0xff] }
 0x111   :  { %5665 = vmatmul.mubr.msk.f32.gmra.mrb[8].mxu1 %vm138_vm0, %v255_v61  ;;  %5679 = vmatmul.mubr.msk.f32.gmra.mrb[10].mxu0 %vm138_vm0, %v255_v61 }
 0x112   :  { %423 = vmatprep.mubr.f32.mxu1 %v8440_v1  ;;  %575 = vmatprep.mubr.f32.mxu0 %v8440_v1 }
 0x114   :  { %v262_v10 = vld [vmem:[#allocation2 + $0x60] sm:$0xff] }
 0x115   :  { %5666 = vmatmul.mubr.msk.f32.gmra.mrb[10].mxu1 %vm138_vm0, %v256_v62  ;;  %5680 = vmatmul.mubr.msk.f32.gmra.mrb[12].mxu0 %vm138_vm0, %v256_v62 }
 0x116   :  { %429 = vmatprep.mubr.f32.mxu1 %v8440_v1  ;;  %581 = vmatprep.mubr.f32.mxu0 %v8440_v1 }
 0x119   :  { %5667 = vmatmul.mubr.msk.f32.gmra.mrb[12].mxu1 %vm138_vm0, %v257_v63  ;;  %5681 = vmatmul.mubr.msk.f32.gmra.mrb[14].mxu0 %vm138_vm0, %v257_v63 }
 0x11a   :  { %435 = vmatprep.mubr.f32.mxu1 %v8440_v1  ;;  %587 = vmatprep.mubr.f32.mxu0 %v8440_v1 }
 0x11d   :  { %5668 = vmatmul.mubr.msk.f32.gmra.mrb[14].mxu1 %vm138_vm0, %v258_v0  ;;  %5682 = vmatmul.mubr.msk.f32.gmra.mrb[16].mxu0 %vm138_vm0, %v258_v0 }
 0x11e   :  { %441 = vmatprep.mubr.f32.mxu1 %v8440_v1  ;;  %593 = vmatprep.mubr.f32.mxu0 %v8440_v1 }
 0x121   :  { %5669 = vmatmul.mubr.msk.f32.gmra.mrb[16].mxu1 %vm138_vm0, %v259_v7  ;;  %5683 = vmatmul.mubr.msk.f32.gmra.mrb[18].mxu0 %vm138_vm0, %v259_v7 }
 0x122   :  { %447 = vmatprep.mubr.f32.mxu1 %v8440_v1  ;;  %599 = vmatprep.mubr.f32.mxu0 %v8440_v1 }
 0x125   :  { %5670 = vmatmul.mubr.msk.f32.gmra.mrb[18].mxu1 %vm138_vm0, %v260_v8  ;;  %5684 = vmatmul.mubr.msk.f32.gmra.mrb[20].mxu0 %vm138_vm0, %v260_v8 }
 0x126   :  { %453 = vmatprep.mubr.f32.mxu1 %v8440_v1  ;;  %605 = vmatprep.mubr.f32.mxu0 %v8440_v1 }
 0x129   :  { %5671 = vmatmul.mubr.msk.f32.gmra.mrb[20].mxu1 %vm138_vm0, %v261_v9  ;;  %5685 = vmatmul.mubr.msk.f32.gmra.mrb[22].mxu0 %vm138_vm0, %v261_v9 }
 0x12a   :  { %459 = vmatprep.mubr.f32.mxu1 %v8440_v1  ;;  %611 = vmatprep.mubr.f32.mxu0 %v8440_v1 }
 0x12d   :  { %5672 = vmatmul.mubr.msk.f32.gmra.mrb[22].mxu1 %vm138_vm0, %v262_v10  ;;  %5686 = vmatmul.mubr.msk.f32.gmra.mrb[24].mxu0 %vm138_vm0, %v262_v10 }
 0x12e   :  { %698 = vmatprep.mubr.f32.mxu0 %v8440_v1  ;;  %465 = vmatprep.mubr.f32.mxu1 %v8440_v1 }
 0x131   :  { %5687 = vmatmul.mubr.msk.f32.vlgmr.msra.gmra.mrb[0].mxu0 %vm138_vm0, %v8708_v53  ;;  %5673 = vmatmul.mubr.msk.f32.gmra.mrb[24].mxu1 %vm138_vm0, %v263_v11 }
 0x132   :  { %704 = vmatprep.mubr.f32.mxu0 %v8440_v1 }
 0x135   :  { %5688 = vmatmul.mubr.msk.f32.gmra.mrb[2].mxu0 %vm138_vm0, %v253_v56 }
 0x136   :  { %710 = vmatprep.mubr.f32.mxu0 %v8440_v1 }
 0x139   :  { %5689 = vmatmul.mubr.msk.f32.gmra.mrb[4].mxu0 %vm138_vm0, %v254_v59 }
 0x13a   :  { %716 = vmatprep.mubr.f32.mxu0 %v8440_v1 }
 0x13d   :  { %5690 = vmatmul.mubr.msk.f32.gmra.mrb[6].mxu0 %vm138_vm0, %v255_v61 }
 0x13e   :  { %722 = vmatprep.mubr.f32.mxu0 %v8440_v1 }
 0x141   :  { %5691 = vmatmul.mubr.msk.f32.gmra.mrb[8].mxu0 %vm138_vm0, %v256_v62  ;;  %v803_v62 = vld [vmem:[#allocation16] sm:$0x3] }
 0x142   :  { %728 = vmatprep.mubr.f32.mxu0 %v8440_v1 }
 0x145   :  { %5692 = vmatmul.mubr.msk.f32.gmra.mrb[10].mxu0 %vm138_vm0, %v257_v63 }
 0x146   :  { %734 = vmatprep.mubr.f32.mxu0 %v8440_v1 }
 0x149   :  { %5693 = vmatmul.mubr.msk.f32.gmra.mrb[12].mxu0 %vm138_vm0, %v258_v0 }
 0x14a   :  { %740 = vmatprep.mubr.f32.mxu0 %v8440_v1 }
 0x14d   :  { %5694 = vmatmul.mubr.msk.f32.gmra.mrb[14].mxu0 %vm138_vm0, %v259_v7  ;;  %v8906_v7 = vrot.slane %v803_v62, %v8636_v3 }
 0x14e   :  { %746 = vmatprep.mubr.f32.mxu0 %v8440_v1 }
 0x151   :  { %5695 = vmatmul.mubr.msk.f32.gmra.mrb[16].mxu0 %vm138_vm0, %v260_v8  ;;  %v8909_v8 = vrot.slane %v803_v62, %v8642_v5 }
 0x152   :  { %752 = vmatprep.mubr.f32.mxu0 %v8440_v1 }
 0x155   :  { %5696 = vmatmul.mubr.msk.f32.gmra.mrb[18].mxu0 %vm138_vm0, %v261_v9 }
 0x156   :  { %758 = vmatprep.mubr.f32.mxu0 %v8440_v1 }
 0x159   :  { %5697 = vmatmul.mubr.msk.f32.gmra.mrb[20].mxu0 %vm138_vm0, %v262_v10 }
 0x15a   :  { %764 = vmatprep.mubr.f32.mxu0 %v8440_v1 }
 0x15d   :  { %5698 = vmatmul.mubr.msk.f32.gmra.mrb[22].mxu0 %vm138_vm0, %v263_v11 }
 0x15e   :  { %770 = vmatprep.mubr.f32.mxu0 %v8440_v1 }
 0x161   :  { %5699 = vmatmul.mubr.msk.f32.gmra.mrb[24].mxu0 %vm138_vm0, %v264_v16 }
 0x166   :  { %v8812_v21 = vpop.f32.mrb[0].mxu1 }
 0x167   :  { %v8817_v23 = vpop.f32.mrb[1].mxu1 }
 0x1d8   :  { %v401_v42 = vpop.f32.mrb[2].mxu1 }
 0x1d9   :  { %v403_v43 = vpop.f32.mrb[3].mxu1 }
 0x1dc   :  { %v407_v44 = vpop.f32.mrb[4].mxu1 }
 0x1dd   :  { %v409_v45 = vpop.f32.mrb[5].mxu1 }
 0x1e0   :  { %v413_v46 = vpop.f32.mrb[6].mxu1 }
 0x1e1   :  { %v415_v47 = vpop.f32.mrb[7].mxu1 }
 0x1e4   :  { %v8873_v48 = vpop.f32.mrb[8].mxu1 }
 0x1e5   :  { %v8875_v49 = vpop.f32.mrb[9].mxu1 }
 0x1e8   :  { %v8877_v50 = vpop.f32.mrb[10].mxu1 }
 0x1e9   :  { %v8879_v51 = vpop.f32.mrb[11].mxu1 }
 0x1ec   :  { %v8881_v52 = vpop.f32.mrb[12].mxu1 }
 0x1ed   :  { %v8883_v53 = vpop.f32.mrb[13].mxu1 }
 0x1f0   :  { %v8885_v54 = vpop.f32.mrb[14].mxu1 }
 0x1f1   :  { %v8887_v55 = vpop.f32.mrb[15].mxu1 }
 0x1f4   :  { %v8889_v56 = vpop.f32.mrb[16].mxu1 }
 0x1f5   :  { %v8891_v57 = vpop.f32.mrb[17].mxu1 }
 0x1f8   :  { %v8893_v58 = vpop.f32.mrb[18].mxu1 }
 0x1f9   :  { %v8895_v59 = vpop.f32.mrb[19].mxu1 }
 0x1fc   :  { %v8897_v60 = vpop.f32.mrb[20].mxu1 }
 0x1fd   :  { %v8899_v61 = vpop.f32.mrb[21].mxu1 }
 0x200   :  { %v8901_v63 = vpop.f32.mrb[22].mxu1 }
 0x201   :  { %v8903_v0 = vpop.f32.mrb[23].mxu1 }
 0x204   :  { %v700_v9 = vpop.f32.mrb[0].mxu0  ;;  %v8911_v10 = vpop.f32.mrb[24].mxu1 }
 0x205   :  { %v7522_v11 = vadd.f32 %v700_v9, %v8812_v21  ;;  %v702_v12 = vpop.f32.mrb[1].mxu0  ;;  %v8914_v13 = vpop.f32.mrb[25].mxu1  ;;  %v7983_v21 = vld [vmem:[%s10799_s4] ss:$8 sps:$4 sm:$0xff]  }
 0x206   :  { %v7523_v14 = vadd.f32 %v702_v12, %v8817_v23 }
 0x207   :  { %v8918_v15 = vadd.f32 %v7522_v11, %v8906_v7 }
 0x208   :  { %v8921_v16 = vadd.f32 %v7523_v14, %v8909_v8  ;;  %v706_v17 = vpop.f32.mrb[2].mxu0  ;;  %v7992_v14 = vld [vmem:[%s10799_s4 + $0x30] ss:$8 sps:$4 sm:$0xff]  }
 0x209   :  { %v7524_v18 = vadd.f32 %v706_v17, %v401_v42  ;;  %v708_v19 = vpop.f32.mrb[3].mxu0  ;;  %v841_v24 = vmax.f32 %v8918_v15, 0.0  ;;  %v7989_v42 = vld [vmem:[%s10799_s4 + $0x20] ss:$8 sps:$4 sm:$0xff]   ;;  %v8098_v15 = vld [vmem:[#allocation14 + $0x174] ss:$8 sps:$4 sm:$0xff]  }
 0x20a   :  { %v842_v20 = vmax.f32 %v8921_v16, 0.0  ;;  %v7525_v22 = vadd.f32 %v708_v19, %v403_v43  ;;  %v8037_v16 = vld [vmem:[%s10799_s4 + $0x220] ss:$8 sps:$4 sm:$0xff]  }
 0x20b   :  { %v817_v23 = vadd.f32 %v7524_v18, %v8906_v7 }
 0x20c   :  { %v818_v26 = vadd.f32 %v7525_v22, %v8909_v8  ;;  %v712_v27 = vpop.f32.mrb[4].mxu0  ;;  %1204 = vmatprep.mubr.f32.mxu1 %v842_v20 }
 0x20d   :  { %v7526_v28 = vadd.f32 %v712_v27, %v407_v44  ;;  %v714_v29 = vpop.f32.mrb[5].mxu0  ;;  %1205 = vmatmul.mubr.f32.vlgmr.msra.gmra.mrb[26].mxu1 %v841_v24  ;;  %v8942_v33 = vmax.f32 %v817_v23, 0.0 }
 0x20e   :  { %v8937_v30 = vmax.f32 %v818_v26, 0.0  ;;  %v7527_v31 = vadd.f32 %v714_v29, %v409_v45  ;;  %6963 = vmatpush1.bf16.msra.mxu1 %v7983_v21  ;;  %v7990_v45 = vld [vmem:[%s10799_s4 + $0x34] ss:$8 sps:$4 sm:$0xff]   ;;  %v7995_v26 = vld [vmem:[%s10799_s4 + $0x40] ss:$8 sps:$4 sm:$0xff]  }
 0x20f   :  { %v819_v34 = vadd.f32 %v7526_v28, %v8906_v7  ;;  %6965 = vmatprep.subr.bf16.mxu1 %v7984_v25 }
 0x210   :  { %v820_v36 = vadd.f32 %v7527_v31, %v8909_v8  ;;  %v718_v37 = vpop.f32.mrb[6].mxu0  ;;  %1210 = vmatprep.mubr.f32.mxu1 %v8937_v30 }
 0x211   :  { %v7528_v38 = vadd.f32 %v718_v37, %v413_v46  ;;  %v720_v39 = vpop.f32.mrb[7].mxu0  ;;  %1211 = vmatmul.mubr.f32.gmra.mrb[28].mxu1 %v8942_v33  ;;  %v8956_v43 = vmax.f32 %v819_v34, 0.0 }
 0x212   :  { %v8951_v40 = vmax.f32 %v820_v36, 0.0  ;;  %v7529_v41 = vadd.f32 %v720_v39, %v415_v47  ;;  %6967 = vmatpush1.bf16.msra.mxu1 %v7986_v32  ;;  %v7998_v36 = vld [vmem:[%s10799_s4 + $0x50] ss:$8 sps:$4 sm:$0xff]  }
 0x213   :  { %v821_v44 = vadd.f32 %v7528_v38, %v8906_v7  ;;  %6969 = vmatprep.subr.bf16.mxu1 %v7987_v35 }
 0x214   :  { %v822_v46 = vadd.f32 %v7529_v41, %v8909_v8  ;;  %v724_v62 = vpop.f32.mrb[8].mxu0  ;;  %1216 = vmatprep.mubr.f32.mxu1 %v8951_v40 }
 0x215   :  { %v7530_v47 = vadd.f32 %v724_v62, %v8873_v48  ;;  %v726_v9 = vpop.f32.mrb[9].mxu0  ;;  %1217 = vmatmul.mubr.f32.gmra.mrb[30].mxu1 %v8956_v43  ;;  %v8972_v17 = vmax.f32 %v821_v44, 0.0  ;;  %v7993_v48 = vld [vmem:[%s10799_s4 + $0x44] ss:$8 sps:$4 sm:$0xff]  }
 0x216   :  { %v8966_v11 = vmax.f32 %v822_v46, 0.0  ;;  %v7531_v12 = vadd.f32 %v726_v9, %v8875_v49  ;;  %6971 = vmatpush1.bf16.msra.mxu1 %v7989_v42  ;;  %v8001_v46 = vld [vmem:[%s10799_s4 + $0x60] ss:$8 sps:$4 sm:$0xff]  }
 0x217   :  { %v823_v18 = vadd.f32 %v7530_v47, %v8906_v7  ;;  %6973 = vmatprep.subr.bf16.mxu1 %v7990_v45 }
 0x218   :  { %v824_v19 = vadd.f32 %v7531_v12, %v8909_v8  ;;  %v730_v22 = vpop.f32.mrb[10].mxu0  ;;  %1222 = vmatprep.mubr.f32.mxu1 %v8966_v11 }
 0x219   :  { %v7532_v49 = vadd.f32 %v730_v22, %v8877_v50  ;;  %v732_v21 = vpop.f32.mrb[11].mxu0  ;;  %1223 = vmatmul.mubr.f32.gmra.mrb[32].mxu1 %v8972_v17  ;;  %v8988_v27 = vmax.f32 %v823_v18, 0.0  ;;  %v7996_v50 = vld [vmem:[%s10799_s4 + $0x54] ss:$8 sps:$4 sm:$0xff]  }
 0x21a   :  { %v8982_v23 = vmax.f32 %v824_v19, 0.0  ;;  %v7533_v25 = vadd.f32 %v732_v21, %v8879_v51  ;;  %6975 = vmatpush1.bf16.msra.mxu1 %v7992_v14  ;;  %v8004_v19 = vld [vmem:[%s10799_s4 + $0x70] ss:$8 sps:$4 sm:$0xff]  }
 0x21b   :  { %v825_v28 = vadd.f32 %v7532_v49, %v8906_v7  ;;  %6977 = vmatprep.subr.bf16.mxu1 %v7993_v48 }
 0x21c   :  { %v826_v29 = vadd.f32 %v7533_v25, %v8909_v8  ;;  %v736_v31 = vpop.f32.mrb[12].mxu0  ;;  %1228 = vmatprep.mubr.f32.mxu1 %v8982_v23 }
 0x21d   :  { %v7534_v51 = vadd.f32 %v736_v31, %v8881_v52  ;;  %v738_v32 = vpop.f32.mrb[13].mxu0  ;;  %1229 = vmatmul.mubr.f32.gmra.mrb[34].mxu1 %v8988_v27  ;;  %v9004_v37 = vmax.f32 %v825_v28, 0.0  ;;  %v7999_v52 = vld [vmem:[%s10799_s4 + $0x64] ss:$8 sps:$4 sm:$0xff]  }
 0x21e   :  { %v8998_v34 = vmax.f32 %v826_v29, 0.0  ;;  %v7535_v35 = vadd.f32 %v738_v32, %v8883_v53  ;;  %6979 = vmatpush1.bf16.msra.mxu1 %v7995_v26  ;;  %v8007_v29 = vld [vmem:[%s10799_s4 + $0x80] ss:$8 sps:$4 sm:$0xff]  }
 0x21f   :  { %v827_v38 = vadd.f32 %v7534_v51, %v8906_v7  ;;  %6981 = vmatprep.subr.bf16.mxu1 %v7996_v50 }
 0x220   :  { %v828_v39 = vadd.f32 %v7535_v35, %v8909_v8  ;;  %v742_v41 = vpop.f32.mrb[14].mxu0  ;;  %1234 = vmatprep.mubr.f32.mxu1 %v8998_v34 }
 0x221   :  { %v7536_v53 = vadd.f32 %v742_v41, %v8885_v54  ;;  %v744_v42 = vpop.f32.mrb[15].mxu0  ;;  %1235 = vmatmul.mubr.f32.gmra.mrb[36].mxu1 %v9004_v37  ;;  %v9020_v62 = vmax.f32 %v827_v38, 0.0  ;;  %v8002_v54 = vld [vmem:[%s10799_s4 + $0x74] ss:$8 sps:$4 sm:$0xff]  }
 0x222   :  { %v9014_v44 = vmax.f32 %v828_v39, 0.0  ;;  %v7537_v45 = vadd.f32 %v744_v42, %v8887_v55  ;;  %6983 = vmatpush1.bf16.msra.mxu1 %v7998_v36  ;;  %v8010_v39 = vld [vmem:[%s10799_s4 + $0x90] ss:$8 sps:$4 sm:$0xff]  }
 0x223   :  { %v829_v47 = vadd.f32 %v7536_v53, %v8906_v7  ;;  %6985 = vmatprep.subr.bf16.mxu1 %v7999_v52 }
 0x224   :  { %v830_v9 = vadd.f32 %v7537_v45, %v8909_v8  ;;  %v748_v12 = vpop.f32.mrb[16].mxu0  ;;  %1240 = vmatprep.mubr.f32.mxu1 %v9014_v44 }
 0x225   :  { %v7538_v55 = vadd.f32 %v748_v12, %v8889_v56  ;;  %v750_v14 = vpop.f32.mrb[17].mxu0  ;;  %1241 = vmatmul.mubr.f32.gmra.mrb[38].mxu1 %v9020_v62  ;;  %v9036_v22 = vmax.f32 %v829_v47, 0.0  ;;  %v8005_v56 = vld [vmem:[%s10799_s4 + $0x84] ss:$8 sps:$4 sm:$0xff]  }
 0x226   :  { %v9030_v18 = vmax.f32 %v830_v9, 0.0  ;;  %v7539_v48 = vadd.f32 %v750_v14, %v8891_v57  ;;  %6987 = vmatpush1.bf16.msra.mxu1 %v8001_v46  ;;  %v8013_v9 = vld [vmem:[%s10799_s4 + $0xa0] ss:$8 sps:$4 sm:$0xff]  }
 0x227   :  { %v831_v49 = vadd.f32 %v7538_v55, %v8906_v7  ;;  %6989 = vmatprep.subr.bf16.mxu1 %v8002_v54 }
 0x228   :  { %v832_v21 = vadd.f32 %v7539_v48, %v8909_v8  ;;  %v754_v25 = vpop.f32.mrb[18].mxu0  ;;  %1246 = vmatprep.mubr.f32.mxu1 %v9030_v18 }
 0x229   :  { %v7540_v57 = vadd.f32 %v754_v25, %v8893_v58  ;;  %v756_v26 = vpop.f32.mrb[19].mxu0  ;;  %1247 = vmatmul.mubr.f32.gmra.mrb[40].mxu1 %v9036_v22  ;;  %v9052_v31 = vmax.f32 %v831_v49, 0.0  ;;  %v8008_v58 = vld [vmem:[%s10799_s4 + $0x94] ss:$8 sps:$4 sm:$0xff]  }
 0x22a   :  { %v9046_v28 = vmax.f32 %v832_v21, 0.0  ;;  %v7541_v50 = vadd.f32 %v756_v26, %v8895_v59  ;;  %6991 = vmatpush1.bf16.msra.mxu1 %v8004_v19  ;;  %v8016_v21 = vld [vmem:[%s10799_s4 + $0xb0] ss:$8 sps:$4 sm:$0xff]  }
 0x22b   :  { %v833_v51 = vadd.f32 %v7540_v57, %v8906_v7  ;;  %6993 = vmatprep.subr.bf16.mxu1 %v8005_v56 }
 0x22c   :  { %v834_v32 = vadd.f32 %v7541_v50, %v8909_v8  ;;  %v760_v35 = vpop.f32.mrb[20].mxu0  ;;  %1252 = vmatprep.mubr.f32.mxu1 %v9046_v28 }
 0x22d   :  { %v7542_v59 = vadd.f32 %v760_v35, %v8897_v60  ;;  %v762_v36 = vpop.f32.mrb[21].mxu0  ;;  %1253 = vmatmul.mubr.f32.gmra.mrb[42].mxu1 %v9052_v31  ;;  %v9068_v41 = vmax.f32 %v833_v51, 0.0  ;;  %v8011_v60 = vld [vmem:[%s10799_s4 + $0xa4] ss:$8 sps:$4 sm:$0xff]   ;;  %v8079_v51 = vld [vmem:[#allocation14 + $0x100] ss:$8 sps:$4 sm:$0xff]  }
 0x22e   :  { %v9062_v38 = vmax.f32 %v834_v32, 0.0  ;;  %v7543_v52 = vadd.f32 %v762_v36, %v8899_v61  ;;  %6995 = vmatpush1.bf16.msra.mxu1 %v8007_v29  ;;  %v8020_v29 = vld [vmem:[%s10799_s4 + $0xd4] ss:$8 sps:$4 sm:$0xff]   ;;  %v8022_v32 = vld [vmem:[%s10799_s4 + $0xd0] ss:$8 sps:$4 sm:$0xff]  }
 0x22f   :  { %v835_v53 = vadd.f32 %v7542_v59, %v8906_v7  ;;  %6997 = vmatprep.subr.bf16.mxu1 %v8008_v58  ;;  %v8080_v58 = vld [vmem:[#allocation14 + $0x114] ss:$8 sps:$4 sm:$0xff]   ;;  %v8082_v59 = vld [vmem:[#allocation14 + $0x110] ss:$8 sps:$4 sm:$0xff]   ;;  %v8083_v36 = vld [vmem:[#allocation14 + $0x124] ss:$8 sps:$4 sm:$0xff]  }
 0x230   :  { %v836_v42 = vadd.f32 %v7543_v52, %v8909_v8  ;;  %v766_v45 = vpop.f32.mrb[22].mxu0  ;;  %1258 = vmatprep.mubr.f32.mxu1 %v9062_v38  ;;  %v8023_v35 = vld [vmem:[%s10799_s4 + $0xe4] ss:$8 sps:$4 sm:$0xff]   ;;  %v8025_v52 = vld [vmem:[%s10799_s4 + $0xe0] ss:$8 sps:$4 sm:$0xff]  }
 0x231   :  { %v7544_v61 = vadd.f32 %v766_v45, %v8901_v63  ;;  %v768_v46 = vpop.f32.mrb[23].mxu0  ;;  %1259 = vmatmul.mubr.f32.gmra.mrb[44].mxu1 %v9068_v41  ;;  %v9084_v12 = vmax.f32 %v835_v53, 0.0  ;;  %v8014_v63 = vld [vmem:[%s10799_s4 + $0xb4] ss:$8 sps:$4 sm:$0xff]   ;;  %v8085_v53 = vld [vmem:[#allocation14 + $0x120] ss:$8 sps:$4 sm:$0xff]  }
 0x232   :  { %v9078_v47 = vmax.f32 %v836_v42, 0.0  ;;  %v7545_v54 = vadd.f32 %v768_v46, %v8903_v0  ;;  %6999 = vmatpush1.bf16.msra.mxu1 %v8010_v39  ;;  %v8026_v39 = vld [vmem:[%s10799_s4 + $0xf4] ss:$8 sps:$4 sm:$0xff]   ;;  %v8028_v42 = vld [vmem:[%s10799_s4 + $0xf0] ss:$8 sps:$4 sm:$0xff]  }
 0x233   :  { %v837_v55 = vadd.f32 %v7544_v61, %v8906_v7  ;;  %7001 = vmatprep.subr.bf16.mxu1 %v8011_v60  ;;  %v8086_v60 = vld [vmem:[#allocation14 + $0x134] ss:$8 sps:$4 sm:$0xff]   ;;  %v8088_v61 = vld [vmem:[#allocation14 + $0x130] ss:$8 sps:$4 sm:$0xff]   ;;  %v8089_v46 = vld [vmem:[#allocation14 + $0x144] ss:$8 sps:$4 sm:$0xff]  }
 0x234   :  { %v838_v14 = vadd.f32 %v7545_v54, %v8909_v8  ;;  %v772_v48 = vpop.f32.mrb[24].mxu0  ;;  %1264 = vmatprep.mubr.f32.mxu1 %v9078_v47  ;;  %v8029_v45 = vld [vmem:[%s10799_s4 + $0x204] ss:$8 sps:$4 sm:$0xff]   ;;  %v8031_v54 = vld [vmem:[%s10799_s4 + $0x200] ss:$8 sps:$4 sm:$0xff]  }
 0x235   :  { %v7546_v0 = vadd.f32 %v772_v48, %v8911_v10  ;;  %v774_v19 = vpop.f32.mrb[25].mxu0  ;;  %1265 = vmatmul.mubr.f32.gmra.mrb[46].mxu1 %v9084_v12  ;;  %v9100_v25 = vmax.f32 %v837_v55, 0.0  ;;  %v8017_v10 = vld [vmem:[%s10799_s4 + $0xc4] ss:$8 sps:$4 sm:$0xff]   ;;  %v8091_v55 = vld [vmem:[#allocation14 + $0x140] ss:$8 sps:$4 sm:$0xff]  }
 0x236   :  { %v9094_v49 = vmax.f32 %v838_v14, 0.0  ;;  %v7547_v56 = vadd.f32 %v774_v19, %v8914_v13  ;;  %7003 = vmatpush1.bf16.msra.mxu1 %v8013_v9  ;;  %v8032_v9 = vld [vmem:[%s10799_s4 + $0x214] ss:$8 sps:$4 sm:$0xff]   ;;  %v8034_v14 = vld [vmem:[%s10799_s4 + $0x210] ss:$8 sps:$4 sm:$0xff]  }
 0x237   :  { %v9103_v57 = vadd.f32 %v7546_v0, %v8906_v7  ;;  %7005 = vmatprep.subr.bf16.mxu1 %v8014_v63  ;;  %v8019_v7 = vld [vmem:[%s10799_s4 + $0xc0] ss:$8 sps:$4 sm:$0xff]   ;;  %v8092_v63 = vld [vmem:[#allocation14 + $0x154] ss:$8 sps:$4 sm:$0xff]   ;;  %v8095_v19 = vld [vmem:[#allocation14 + $0x164] ss:$8 sps:$4 sm:$0xff]  }
 0x238   :  { %v9109_v26 = vadd.f32 %v7547_v56, %v8909_v8  ;;  %1270 = vmatprep.mubr.f32.mxu1 %v9094_v49  ;;  %v8077_v8 = vld [vmem:[#allocation14 + $0x104] ss:$8 sps:$4 sm:$0xff]   ;;  %v8094_v0 = vld [vmem:[#allocation14 + $0x150] ss:$8 sps:$4 sm:$0xff]   ;;  %v8097_v56 = vld [vmem:[#allocation14 + $0x160] ss:$8 sps:$4 sm:$0xff]  }
 0x239   :  { %1271 = vmatmul.mubr.f32.gmra.mrb[48].mxu1 %v9100_v25  ;;  %v865_v50 = vmax.f32 %v9103_v57, 0.0  ;;  %7089 = vmatprep.subr.bf16.mxu0 %v8077_v8  ;;  %v8035_v48 = vld [vmem:[%s10799_s4 + $0x224] ss:$8 sps:$4 sm:$0xff]   ;;  %v8044_v8 = vld [vmem:[%s10799_s4 + $0x254] ss:$8 sps:$4 sm:$0xff]  }
 0x23a   :  { %v866_v13 = vmax.f32 %v9109_v26, 0.0  ;;  %7007 = vmatpush1.bf16.msra.mxu1 %v8016_v21  ;;  %7091 = vmatpush1.bf16.msra.mxu0 %v8079_v51  ;;  %v8041_v21 = vld [vmem:[%s10799_s4 + $0x244] ss:$8 sps:$4 sm:$0xff]   ;;  %v8103_v51 = vld [vmem:[#allocation14 + $0x180] ss:$8 sps:$4 sm:$0xff]  }
 0x23b   :  { %7009 = vmatprep.subr.bf16.mxu1 %v8017_v10  ;;  %7093 = vmatprep.subr.bf16.mxu0 %v8080_v58  ;;  %v8100_v10 = vld [vmem:[#allocation14 + $0x170] ss:$8 sps:$4 sm:$0xff]   ;;  %v8104_v58 = vld [vmem:[#allocation14 + $0x194] ss:$8 sps:$4 sm:$0xff]  }
 0x23c   :  { %1276 = vmatprep.mubr.f32.mxu1 %v866_v13 }
 0x23d   :  { %1277 = vmatmul.mubr.f32.gmra.mrb[50].mxu1 %v865_v50 }
 0x23e   :  { %7011 = vmatpush1.bf16.msra.mxu1 %v8019_v7  ;;  %1347 = vmatprep.mubr.f32.mxu1 %v8440_v1  ;;  %v8101_v7 = vld [vmem:[#allocation14 + $0x184] ss:$8 sps:$4 sm:$0xff]  }
 0x23f   :  { %7013 = vmatprep.subr.bf16.mxu1 %v8020_v29  ;;  %7095 = vmatpush1.bf16.msra.mxu0 %v8082_v59  ;;  %v8043_v29 = vld [vmem:[%s10799_s4 + $0x240] ss:$8 sps:$4 sm:$0xff]  }
 0x240   :  { %7097 = vmatprep.subr.bf16.mxu0 %v8083_v36  ;;  %v8106_v59 = vld [vmem:[#allocation14 + $0x190] ss:$8 sps:$4 sm:$0xff]   ;;  %v8107_v36 = vld [vmem:[#allocation14 + $0x1a4] ss:$8 sps:$4 sm:$0xff]  }
 0x242   :  { %7015 = vmatpush1.bf16.msra.mxu1 %v8022_v32  ;;  %v8046_v32 = vld [vmem:[%s10799_s4 + $0x250] ss:$8 sps:$4 sm:$0xff]  }
 0x243   :  { %7017 = vmatprep.subr.bf16.mxu1 %v8023_v35  ;;  %7099 = vmatpush1.bf16.msra.mxu0 %v8085_v53  ;;  %v8047_v35 = vld [vmem:[%s10799_s4 + $0x264] ss:$8 sps:$4 sm:$0xff]   ;;  %v8109_v53 = vld [vmem:[#allocation14 + $0x1a0] ss:$8 sps:$4 sm:$0xff]  }
 0x244   :  { %7101 = vmatprep.subr.bf16.mxu0 %v8086_v60  ;;  %v8110_v60 = vld [vmem:[#allocation14 + $0x1b4] ss:$8 sps:$4 sm:$0xff]  }
 0x246   :  { %7019 = vmatpush1.bf16.msra.mxu1 %v8025_v52  ;;  %v8049_v52 = vld [vmem:[%s10799_s4 + $0x260] ss:$8 sps:$4 sm:$0xff]  }
 0x247   :  { %7021 = vmatprep.subr.bf16.mxu1 %v8026_v39  ;;  %7103 = vmatpush1.bf16.msra.mxu0 %v8088_v61  ;;  %v8050_v39 = vld [vmem:[%s10799_s4 + $0x274] ss:$8 sps:$4 sm:$0xff]   ;;  %v8112_v61 = vld [vmem:[#allocation14 + $0x1b0] ss:$8 sps:$4 sm:$0xff]  }
 0x248   :  { %7105 = vmatprep.subr.bf16.mxu0 %v8089_v46  ;;  %v8113_v46 = vld [vmem:[#allocation14 + $0x1c4] ss:$8 sps:$4 sm:$0xff]  }
 0x24a   :  { %7023 = vmatpush1.bf16.msra.mxu1 %v8028_v42  ;;  %v8052_v42 = vld [vmem:[%s10799_s4 + $0x270] ss:$8 sps:$4 sm:$0xff]  }
 0x24b   :  { %7025 = vmatprep.subr.bf16.mxu1 %v8029_v45  ;;  %7107 = vmatpush1.bf16.msra.mxu0 %v8091_v55  ;;  %v8053_v45 = vld [vmem:[%s10799_s4 + $0x284] ss:$8 sps:$4 sm:$0xff]   ;;  %v8115_v55 = vld [vmem:[#allocation14 + $0x1c0] ss:$8 sps:$4 sm:$0xff]  }
 0x24c   :  { %7109 = vmatprep.subr.bf16.mxu0 %v8092_v63  ;;  %v8116_v63 = vld [vmem:[#allocation14 + $0x1d4] ss:$8 sps:$4 sm:$0xff]  }
 0x24d   :  { %1348 = vmatmul.mubr.f32.vlgmr.msra.gmra.mrb[26].mxu1 %v8440_v1 }
 0x24e   :  { %1353 = vmatprep.mubr.f32.mxu1 %v842_v20  ;;  %7027 = vmatpush1.bf16.msra.mxu1 %v8031_v54  ;;  %v8038_v20 = vld [vmem:[%s10799_s4 + $0x234] ss:$8 sps:$4 sm:$0xff]   ;;  %v8055_v54 = vld [vmem:[%s10799_s4 + $0x280] ss:$8 sps:$4 sm:$0xff]  }
 0x24f   :  { %7029 = vmatprep.subr.bf16.mxu1 %v8032_v9  ;;  %7111 = vmatpush1.bf16.msra.mxu0 %v8094_v0  ;;  %v8056_v9 = vld [vmem:[%s10799_s4 + $0x294] ss:$8 sps:$4 sm:$0xff]   ;;  %v8118_v0 = vld [vmem:[#allocation14 + $0x1d0] ss:$8 sps:$4 sm:$0xff]  }
 0x250   :  { %7113 = vmatprep.subr.bf16.mxu0 %v8095_v19  ;;  %v8119_v19 = vld [vmem:[#allocation14 + $0x1e4] ss:$8 sps:$4 sm:$0xff]  }
 0x251   :  { %1354 = vmatmul.mubr.f32.gmra.mrb[28].mxu1 %v841_v24  ;;  %v8040_v24 = vld [vmem:[%s10799_s4 + $0x230] ss:$8 sps:$4 sm:$0xff]  }
 0x252   :  { %1359 = vmatprep.mubr.f32.mxu1 %v8937_v30  ;;  %7031 = vmatpush1.bf16.msra.mxu1 %v8034_v14  ;;  %v8058_v14 = vld [vmem:[%s10799_s4 + $0x290] ss:$8 sps:$4 sm:$0xff]  }
 0x253   :  { %7033 = vmatprep.subr.bf16.mxu1 %v8035_v48  ;;  %7115 = vmatpush1.bf16.msra.mxu0 %v8097_v56  ;;  %v8059_v48 = vld [vmem:[%s10799_s4 + $0x2a4] ss:$8 sps:$4 sm:$0xff]   ;;  %v8121_v56 = vld [vmem:[#allocation14 + $0x1e0] ss:$8 sps:$4 sm:$0xff]  }
 0x254   :  { %7117 = vmatprep.subr.bf16.mxu0 %v8098_v15  ;;  %v8064_v15 = vld [vmem:[%s10799_s4 + $0x2b0] ss:$8 sps:$4 sm:$0xff]  }
 0x255   :  { %1360 = vmatmul.mubr.f32.gmra.mrb[30].mxu1 %v8942_v33 }
 0x256   :  { %1365 = vmatprep.mubr.f32.mxu1 %v8951_v40  ;;  %7035 = vmatpush1.bf16.msra.mxu1 %v8037_v16  ;;  %v8061_v16 = vld [vmem:[%s10799_s4 + $0x2a0] ss:$8 sps:$4 sm:$0xff]  }
 0x257   :  { %7037 = vmatprep.subr.bf16.mxu1 %v8038_v20  ;;  %7119 = vmatpush1.bf16.msra.mxu0 %v8100_v10  ;;  %v8062_v20 = vld [vmem:[%s10799_s4 + $0x2b4] ss:$8 sps:$4 sm:$0xff]  }
 0x258   :  { %7121 = vmatprep.subr.bf16.mxu0 %v8101_v7  ;;  %v8068_v10 = vld [vmem:[%s10799_s4 + $0x2d4] ss:$8 sps:$4 sm:$0xff]   ;;  %v8070_v7 = vld [vmem:[%s10799_s4 + $0x2d0] ss:$8 sps:$4 sm:$0xff]  }
 0x259   :  { %1366 = vmatmul.mubr.f32.gmra.mrb[32].mxu1 %v8956_v43 }
 0x25a   :  { %1371 = vmatprep.mubr.f32.mxu1 %v8966_v11  ;;  %7039 = vmatpush1.bf16.msra.mxu1 %v8040_v24  ;;  %v8065_v24 = vld [vmem:[%s10799_s4 + $0x2c4] ss:$8 sps:$4 sm:$0xff]  }
 0x25b   :  { %7041 = vmatprep.subr.bf16.mxu1 %v8041_v21  ;;  %7123 = vmatpush1.bf16.msra.mxu0 %v8103_v51  ;;  %v8067_v21 = vld [vmem:[%s10799_s4 + $0x2c0] ss:$8 sps:$4 sm:$0xff]   ;;  %v8074_v51 = vld [vmem:[%s10799_s4 + $0x2f4] ss:$8 sps:$4 sm:$0xff]  }
 0x25c   :  { %7125 = vmatprep.subr.bf16.mxu0 %v8104_v58 }
 0x25d   :  { %1372 = vmatmul.mubr.f32.gmra.mrb[34].mxu1 %v8972_v17 }
 0x25e   :  { %1377 = vmatprep.mubr.f32.mxu1 %v8982_v23  ;;  %7043 = vmatpush1.bf16.msra.mxu1 %v8043_v29  ;;  %v8071_v29 = vld [vmem:[%s10799_s4 + $0x2e4] ss:$8 sps:$4 sm:$0xff]  }
 0x25f   :  { %7045 = vmatprep.subr.bf16.mxu1 %v8044_v8  ;;  %7127 = vmatpush1.bf16.msra.mxu0 %v8106_v59  ;;  %v8073_v8 = vld [vmem:[%s10799_s4 + $0x2e0] ss:$8 sps:$4 sm:$0xff]  }
 0x260   :  { %7129 = vmatprep.subr.bf16.mxu0 %v8107_v36  ;;  %v8133_v59 = vld [vmem:[#allocation14 + $0x20] ss:$8 sps:$4 sm:$0xff]  }
 0x261   :  { %1378 = vmatmul.mubr.f32.gmra.mrb[36].mxu1 %v8988_v27 }
 0x262   :  { %1383 = vmatprep.mubr.f32.mxu1 %v8998_v34  ;;  %7047 = vmatpush1.bf16.msra.mxu1 %v8046_v32 }
 0x263   :  { %7049 = vmatprep.subr.bf16.mxu1 %v8047_v35  ;;  %7131 = vmatpush1.bf16.msra.mxu0 %v8109_v53  ;;  %v8134_v53 = vld [vmem:[#allocation14 + $0x34] ss:$8 sps:$4 sm:$0xff]  }
 0x264   :  { %7133 = vmatprep.subr.bf16.mxu0 %v8110_v60 }
 0x265   :  { %1384 = vmatmul.mubr.f32.gmra.mrb[38].mxu1 %v9004_v37 }
 0x266   :  { %1389 = vmatprep.mubr.f32.mxu1 %v9014_v44  ;;  %7051 = vmatpush1.bf16.msra.mxu1 %v8049_v52 }
 0x267   :  { %7053 = vmatprep.subr.bf16.mxu1 %v8050_v39  ;;  %7135 = vmatpush1.bf16.msra.mxu0 %v8112_v61  ;;  %v8136_v61 = vld [vmem:[#allocation14 + $0x30] ss:$8 sps:$4 sm:$0xff]  }
 0x268   :  { %7137 = vmatprep.subr.bf16.mxu0 %v8113_v46 }
 0x269   :  { %1390 = vmatmul.mubr.f32.gmra.mrb[40].mxu1 %v9020_v62 }
 0x26a   :  { %1395 = vmatprep.mubr.f32.mxu1 %v9030_v18  ;;  %7055 = vmatpush1.bf16.msra.mxu1 %v8052_v42 }
 0x26b   :  { %7057 = vmatprep.subr.bf16.mxu1 %v8053_v45  ;;  %7139 = vmatpush1.bf16.msra.mxu0 %v8115_v55  ;;  %v8137_v55 = vld [vmem:[#allocation14 + $0x44] ss:$8 sps:$4 sm:$0xff]  }
 0x26c   :  { %7141 = vmatprep.subr.bf16.mxu0 %v8116_v63 }
 0x26d   :  { %1396 = vmatmul.mubr.f32.gmra.mrb[42].mxu1 %v9036_v22 }
 0x26e   :  { %1401 = vmatprep.mubr.f32.mxu1 %v9046_v28  ;;  %7059 = vmatpush1.bf16.msra.mxu1 %v8055_v54 }
 0x26f   :  { %7061 = vmatprep.subr.bf16.mxu1 %v8056_v9  ;;  %7143 = vmatpush1.bf16.msra.mxu0 %v8118_v0  ;;  %v8139_v0 = vld [vmem:[#allocation14 + $0x40] ss:$8 sps:$4 sm:$0xff]  }
 0x270   :  { %7145 = vmatprep.subr.bf16.mxu0 %v8119_v19 }
 0x271   :  { %1402 = vmatmul.mubr.f32.gmra.mrb[44].mxu1 %v9052_v31 }
 0x272   :  { %1407 = vmatprep.mubr.f32.mxu1 %v9062_v38  ;;  %7063 = vmatpush1.bf16.msra.mxu1 %v8058_v14 }
 0x273   :  { %7065 = vmatprep.subr.bf16.mxu1 %v8059_v48  ;;  %7147 = vmatpush1.bf16.msra.mxu0 %v8121_v56  ;;  %v8140_v56 = vld [vmem:[#allocation14 + $0x54] ss:$8 sps:$4 sm:$0xff]  }
 0x275   :  { %1408 = vmatmul.mubr.f32.gmra.mrb[46].mxu1 %v9068_v41 }
 0x276   :  { %1413 = vmatprep.mubr.f32.mxu1 %v9078_v47  ;;  %7067 = vmatpush1.bf16.msra.mxu1 %v8061_v16 }
 0x277   :  { %7069 = vmatprep.subr.bf16.mxu1 %v8062_v20 }
 0x279   :  { %1414 = vmatmul.mubr.f32.gmra.mrb[48].mxu1 %v9084_v12 }
 0x27a   :  { %1419 = vmatprep.mubr.f32.mxu1 %v9094_v49  ;;  %7071 = vmatpush1.bf16.msra.mxu1 %v8064_v15 }
 0x27b   :  { %7073 = vmatprep.subr.bf16.mxu1 %v8065_v24 }
 0x27d   :  { %1420 = vmatmul.mubr.f32.gmra.mrb[50].mxu1 %v9100_v25 }
 0x27e   :  { %7075 = vmatpush1.bf16.msra.mxu1 %v8067_v21  ;;  %1587 = vmatprep.mubr.f32.mxu1 %v8937_v30  ;;  %v8076_v30 = vld [vmem:[%s10799_s4 + $0x2f0] ss:$8 sps:$4 sm:$0xff]  }
 0x27f   :  { %7077 = vmatprep.subr.bf16.mxu1 %v8068_v10  ;;  %v8142_v10 = vld [vmem:[#allocation14 + $0x50] ss:$8 sps:$4 sm:$0xff]  }
 0x282   :  { %7079 = vmatpush1.bf16.msra.mxu1 %v8070_v7 }
 0x283   :  { %7081 = vmatprep.subr.bf16.mxu1 %v8071_v29 }
 0x286   :  { %7083 = vmatpush1.bf16.msra.mxu1 %v8073_v8 }
 0x287   :  { %7085 = vmatprep.subr.bf16.mxu1 %v8074_v51  ;;  %v8143_v51 = vld [vmem:[#allocation14 + $0x64] ss:$8 sps:$4 sm:$0xff]  }
 0x28a   :  { %7087 = vmatpush1.bf16.msra.mxu1 %v8076_v30 }
 0x28d   :  { %1588 = vmatmul.mubr.f32.vlgmr.msra.gmra.mrb[26].mxu1 %v8942_v33  ;;  %v8122_v33 = vld [vmem:[#allocation14 + $0x1f4] ss:$8 sps:$4 sm:$0xff]  }
 0x28e   :  { %1593 = vmatprep.mubr.f32.mxu1 %v8951_v40  ;;  %v8124_v40 = vld [vmem:[#allocation14 + $0x1f0] ss:$8 sps:$4 sm:$0xff]   ;;  %7149 = vmatprep.subr.bf16.mxu0 %v8122_v33 }
 0x28f   :  { %7151 = vmatpush1.bf16.msra.mxu0 %v8124_v40 }
 0x291   :  { %1594 = vmatmul.mubr.f32.gmra.mrb[28].mxu1 %v8956_v43  ;;  %v8125_v43 = vld [vmem:[#allocation14 + $0x4] ss:$8 sps:$4 sm:$0xff]  }
 0x292   :  { %1599 = vmatprep.mubr.f32.mxu1 %v8966_v11  ;;  %7153 = vmatprep.subr.bf16.mxu0 %v8125_v43  ;;  %v1692_v11 = vld [vmem:[#allocation17] sm:$0x3] }
 0x293   :  { %v8145_v43 = vld [vmem:[#allocation14 + $0x60] ss:$8 sps:$4 sm:$0xff]  }
 0x295   :  { %1600 = vmatmul.mubr.f32.gmra.mrb[30].mxu1 %v8972_v17  ;;  %v9293_v17 = vrot.slane %v1692_v11, %v8636_v3 }
 0x296   :  { %1605 = vmatprep.mubr.f32.mxu1 %v8982_v23  ;;  %v9296_v23 = vrot.slane %v1692_v11, %v8642_v5 }
 0x299   :  { %1606 = vmatmul.mubr.f32.gmra.mrb[32].mxu1 %v8988_v27 }
 0x29a   :  { %1611 = vmatprep.mubr.f32.mxu1 %v8998_v34 }
 0x29d   :  { %1612 = vmatmul.mubr.f32.gmra.mrb[34].mxu1 %v9004_v37 }
 0x29e   :  { %1617 = vmatprep.mubr.f32.mxu1 %v9014_v44 }
 0x2a1   :  { %1618 = vmatmul.mubr.f32.gmra.mrb[36].mxu1 %v9020_v62 }
 0x2a2   :  { %1623 = vmatprep.mubr.f32.mxu1 %v9030_v18 }
 0x2a5   :  { %1624 = vmatmul.mubr.f32.gmra.mrb[38].mxu1 %v9036_v22  ;;  %v8127_v22 = vld [vmem:[#allocation14] ss:$8 sps:$4 sm:$0xff]  }
 0x2a6   :  { %1629 = vmatprep.mubr.f32.mxu1 %v9046_v28 }
 0x2a9   :  { %1630 = vmatmul.mubr.f32.gmra.mrb[40].mxu1 %v9052_v31 }
 0x2aa   :  { %1635 = vmatprep.mubr.f32.mxu1 %v9062_v38 }
 0x2ad   :  { %1636 = vmatmul.mubr.f32.gmra.mrb[42].mxu1 %v9068_v41  ;;  %v8128_v41 = vld [vmem:[#allocation14 + $0x14] ss:$8 sps:$4 sm:$0xff]  }
 0x2ae   :  { %1641 = vmatprep.mubr.f32.mxu1 %v9078_v47 }
 0x2b1   :  { %1642 = vmatmul.mubr.f32.gmra.mrb[44].mxu1 %v9084_v12 }
 0x2b2   :  { %1647 = vmatprep.mubr.f32.mxu1 %v9094_v49 }
 0x2b5   :  { %1648 = vmatmul.mubr.f32.gmra.mrb[46].mxu1 %v9100_v25  ;;  %v8130_v25 = vld [vmem:[#allocation14 + $0x10] ss:$8 sps:$4 sm:$0xff]  }
 0x2b6   :  { %1653 = vmatprep.mubr.f32.mxu1 %v866_v13 }
 0x2b9   :  { %1654 = vmatmul.mubr.f32.gmra.mrb[48].mxu1 %v865_v50  ;;  %v8131_v50 = vld [vmem:[#allocation14 + $0x24] ss:$8 sps:$4 sm:$0xff]  }
 0x2ba   :  { %1659 = vmatprep.mubr.f32.mxu1 %v8440_v1 }
 0x2bd   :  { %1660 = vmatmul.mubr.f32.gmra.mrb[50].mxu1 %v8440_v1 }
 0x360   :  { %v1589_v27 = vpop.f32.mrb[26].mxu1 }
 0x361   :  { %v9299_v34 = vadd.f32 %v9293_v17, %v1589_v27  ;;  %v1591_v37 = vpop.f32.mrb[27].mxu1 }
 0x362   :  { %v9302_v44 = vadd.f32 %v9296_v23, %v1591_v37 }
 0x363   :  { %v1730_v28 = vmax.f32 %v9299_v34, 0.0  ;;  %v8187_v34 = vld [vmem:[#allocation14 + $0x240] ss:$8 sps:$4 sm:$0xff]  }
 0x364   :  { %v1731_v62 = vmax.f32 %v9302_v44, 0.0  ;;  %v1595_v18 = vpop.f32.mrb[28].mxu1  ;;  %v8184_v44 = vld [vmem:[#allocation14 + $0x230] ss:$8 sps:$4 sm:$0xff]  }
 0x365   :  { %v1706_v31 = vadd.f32 %v9293_v17, %v1595_v18  ;;  %v1597_v38 = vpop.f32.mrb[29].mxu1  ;;  %v8146_v18 = vld [vmem:[#allocation14 + $0x74] ss:$8 sps:$4 sm:$0xff]  }
 0x366   :  { %v1707_v47 = vadd.f32 %v9296_v23, %v1597_v38  ;;  %2093 = vmatprep.mubr.f32.mxu0 %v1731_v62 }
 0x367   :  { %2094 = vmatmul.mubr.f32.vlgmr.msra.gmra.mrb[26].mxu0 %v1730_v28  ;;  %v9314_v57 = vmax.f32 %v1706_v31, 0.0 }
 0x368   :  { %v9312_v12 = vmax.f32 %v1707_v47, 0.0  ;;  %7155 = vmatpush1.bf16.msra.mxu0 %v8127_v22  ;;  %v1601_v49 = vpop.f32.mrb[30].mxu1 }
 0x369   :  { %v1708_v26 = vadd.f32 %v9293_v17, %v1601_v49  ;;  %v1603_v13 = vpop.f32.mrb[31].mxu1  ;;  %7157 = vmatprep.subr.bf16.mxu0 %v8128_v41  ;;  %v8148_v41 = vld [vmem:[#allocation14 + $0x70] ss:$8 sps:$4 sm:$0xff]  }
 0x36a   :  { %v1709_v58 = vadd.f32 %v9296_v23, %v1603_v13  ;;  %2099 = vmatprep.mubr.f32.mxu0 %v9312_v12 }
 0x36b   :  { %2100 = vmatmul.mubr.f32.gmra.mrb[28].mxu0 %v9314_v57  ;;  %v9322_v36 = vmax.f32 %v1708_v26, 0.0  ;;  %v8149_v26 = vld [vmem:[#allocation14 + $0x84] ss:$8 sps:$4 sm:$0xff]  }
 0x36c   :  { %v9320_v32 = vmax.f32 %v1709_v58, 0.0  ;;  %7159 = vmatpush1.bf16.msra.mxu0 %v8130_v25  ;;  %v1607_v35 = vpop.f32.mrb[32].mxu1 }
 0x36d   :  { %v1710_v52 = vadd.f32 %v9293_v17, %v1607_v35  ;;  %v1609_v39 = vpop.f32.mrb[33].mxu1  ;;  %7161 = vmatprep.subr.bf16.mxu0 %v8131_v50  ;;  %v8151_v35 = vld [vmem:[#allocation14 + $0x80] ss:$8 sps:$4 sm:$0xff]  }
 0x36e   :  { %v1711_v60 = vadd.f32 %v9296_v23, %v1609_v39  ;;  %2105 = vmatprep.mubr.f32.mxu0 %v9320_v32 }
 0x36f   :  { %2106 = vmatmul.mubr.f32.gmra.mrb[30].mxu0 %v9322_v36  ;;  %v9330_v46 = vmax.f32 %v1710_v52, 0.0 }
 0x370   :  { %v9328_v42 = vmax.f32 %v1711_v60, 0.0  ;;  %7163 = vmatpush1.bf16.msra.mxu0 %v8133_v59  ;;  %v1613_v45 = vpop.f32.mrb[34].mxu1 }
 0x371   :  { %v1712_v54 = vadd.f32 %v9293_v17, %v1613_v45  ;;  %v1615_v9 = vpop.f32.mrb[35].mxu1  ;;  %7165 = vmatprep.subr.bf16.mxu0 %v8134_v53  ;;  %v8152_v53 = vld [vmem:[#allocation14 + $0x94] ss:$8 sps:$4 sm:$0xff]  }
 0x372   :  { %v1713_v63 = vadd.f32 %v9296_v23, %v1615_v9  ;;  %2111 = vmatprep.mubr.f32.mxu0 %v9328_v42 }
 0x373   :  { %2112 = vmatmul.mubr.f32.gmra.mrb[32].mxu0 %v9330_v46  ;;  %v9338_v19 = vmax.f32 %v1712_v54, 0.0  ;;  %v8154_v54 = vld [vmem:[#allocation14 + $0x90] ss:$8 sps:$4 sm:$0xff]  }
 0x374   :  { %v9336_v14 = vmax.f32 %v1713_v63, 0.0  ;;  %7167 = vmatpush1.bf16.msra.mxu0 %v8136_v61  ;;  %v1619_v48 = vpop.f32.mrb[36].mxu1 }
 0x375   :  { %v1714_v16 = vadd.f32 %v9293_v17, %v1619_v48  ;;  %v1621_v20 = vpop.f32.mrb[37].mxu1  ;;  %7169 = vmatprep.subr.bf16.mxu0 %v8137_v55  ;;  %v8155_v48 = vld [vmem:[#allocation14 + $0xa4] ss:$8 sps:$4 sm:$0xff]  }
 0x376   :  { %v1715_v15 = vadd.f32 %v9296_v23, %v1621_v20  ;;  %2117 = vmatprep.mubr.f32.mxu0 %v9336_v14 }
 0x377   :  { %2118 = vmatmul.mubr.f32.gmra.mrb[34].mxu0 %v9338_v19  ;;  %v9346_v7 = vmax.f32 %v1714_v16, 0.0 }
 0x378   :  { %v9344_v24 = vmax.f32 %v1715_v15, 0.0  ;;  %7171 = vmatpush1.bf16.msra.mxu0 %v8139_v0  ;;  %v1625_v21 = vpop.f32.mrb[38].mxu1 }
 0x379   :  { %v1716_v29 = vadd.f32 %v9293_v17, %v1625_v21  ;;  %v1627_v8 = vpop.f32.mrb[39].mxu1  ;;  %7173 = vmatprep.subr.bf16.mxu0 %v8140_v56  ;;  %v8157_v56 = vld [vmem:[#allocation14 + $0xa0] ss:$8 sps:$4 sm:$0xff]  }
 0x37a   :  { %v1717_v30 = vadd.f32 %v9296_v23, %v1627_v8  ;;  %2123 = vmatprep.mubr.f32.mxu0 %v9344_v24 }
 0x37b   :  { %2124 = vmatmul.mubr.f32.gmra.mrb[36].mxu0 %v9346_v7  ;;  %v9354_v11 = vmax.f32 %v1716_v29, 0.0  ;;  %v8158_v29 = vld [vmem:[#allocation14 + $0xb4] ss:$8 sps:$4 sm:$0xff]  }
 0x37c   :  { %v9352_v33 = vmax.f32 %v1717_v30, 0.0  ;;  %7175 = vmatpush1.bf16.msra.mxu0 %v8142_v10  ;;  %v1631_v40 = vpop.f32.mrb[40].mxu1 }
 0x37d   :  { %v1718_v27 = vadd.f32 %v9293_v17, %v1631_v40  ;;  %v1633_v37 = vpop.f32.mrb[41].mxu1  ;;  %7177 = vmatprep.subr.bf16.mxu0 %v8143_v51  ;;  %v8160_v40 = vld [vmem:[#allocation14 + $0xb0] ss:$8 sps:$4 sm:$0xff]  }
 0x37e   :  { %v1719_v22 = vadd.f32 %v9296_v23, %v1633_v37  ;;  %2129 = vmatprep.mubr.f32.mxu0 %v9352_v33 }
 0x37f   :  { %2130 = vmatmul.mubr.f32.gmra.mrb[38].mxu0 %v9354_v11  ;;  %v9362_v47 = vmax.f32 %v1718_v27, 0.0 }
 0x380   :  { %v9360_v31 = vmax.f32 %v1719_v22, 0.0  ;;  %7179 = vmatpush1.bf16.msra.mxu0 %v8145_v43  ;;  %v1637_v38 = vpop.f32.mrb[42].mxu1 }
 0x381   :  { %v1720_v49 = vadd.f32 %v9293_v17, %v1637_v38  ;;  %v1639_v25 = vpop.f32.mrb[43].mxu1  ;;  %7181 = vmatprep.subr.bf16.mxu0 %v8146_v18  ;;  %v8161_v18 = vld [vmem:[#allocation14 + $0xc4] ss:$8 sps:$4 sm:$0xff]  }
 0x382   :  { %v1721_v13 = vadd.f32 %v9296_v23, %v1639_v25  ;;  %2135 = vmatprep.mubr.f32.mxu0 %v9360_v31  ;;  %v8164_v25 = vld [vmem:[#allocation14 + $0xd4] ss:$8 sps:$4 sm:$0xff]  }
 0x383   :  { %2136 = vmatmul.mubr.f32.gmra.mrb[40].mxu0 %v9362_v47  ;;  %v9370_v59 = vmax.f32 %v1720_v49, 0.0 }
 0x384   :  { %v9368_v50 = vmax.f32 %v1721_v13, 0.0  ;;  %7183 = vmatpush1.bf16.msra.mxu0 %v8148_v41  ;;  %v1643_v58 = vpop.f32.mrb[44].mxu1  ;;  %v8163_v41 = vld [vmem:[#allocation14 + $0xc0] ss:$8 sps:$4 sm:$0xff]   ;;  %v8170_v13 = vld [vmem:[#allocation14 + $0xf4] ss:$8 sps:$4 sm:$0xff]  }
 0x385   :  { %v1722_v52 = vadd.f32 %v9293_v17, %v1643_v58  ;;  %v1645_v39 = vpop.f32.mrb[45].mxu1  ;;  %7185 = vmatprep.subr.bf16.mxu0 %v8149_v26  ;;  %v8169_v26 = vld [vmem:[#allocation14 + $0xe0] ss:$8 sps:$4 sm:$0xff]   ;;  %v8172_v58 = vld [vmem:[#allocation14 + $0xf0] ss:$8 sps:$4 sm:$0xff]  }
 0x386   :  { %v1723_v60 = vadd.f32 %v9296_v23, %v1645_v39  ;;  %2141 = vmatprep.mubr.f32.mxu0 %v9368_v50  ;;  %v8176_v39 = vld [vmem:[#allocation14 + $0x214] ss:$8 sps:$4 sm:$0xff]  }
 0x387   :  { %2142 = vmatmul.mubr.f32.gmra.mrb[42].mxu0 %v9370_v59  ;;  %v9378_v9 = vmax.f32 %v1722_v52, 0.0  ;;  %v8175_v52 = vld [vmem:[#allocation14 + $0x200] ss:$8 sps:$4 sm:$0xff]  }
 0x388   :  { %v9376_v45 = vmax.f32 %v1723_v60, 0.0  ;;  %7187 = vmatpush1.bf16.msra.mxu0 %v8151_v35  ;;  %v1649_v61 = vpop.f32.mrb[46].mxu1  ;;  %v8173_v35 = vld [vmem:[#allocation14 + $0x204] ss:$8 sps:$4 sm:$0xff]  }
 0x389   :  { %v1724_v55 = vadd.f32 %v9293_v17, %v1649_v61  ;;  %v1651_v63 = vpop.f32.mrb[47].mxu1  ;;  %7189 = vmatprep.subr.bf16.mxu0 %v8152_v53  ;;  %v8178_v53 = vld [vmem:[#allocation14 + $0x210] ss:$8 sps:$4 sm:$0xff]   ;;  %v8179_v60 = vld [vmem:[#allocation14 + $0x224] ss:$8 sps:$4 sm:$0xff]  }
 0x38a   :  { %v1725_v0 = vadd.f32 %v9296_v23, %v1651_v63  ;;  %2147 = vmatprep.mubr.f32.mxu0 %v9376_v45  ;;  %v8181_v61 = vld [vmem:[#allocation14 + $0x220] ss:$8 sps:$4 sm:$0xff]   ;;  %v8191_v63 = vld [vmem:[#allocation14 + $0x264] ss:$8 sps:$4 sm:$0xff]  }
 0x38b   :  { %2148 = vmatmul.mubr.f32.gmra.mrb[44].mxu0 %v9378_v9  ;;  %v9386_v15 = vmax.f32 %v1724_v55, 0.0  ;;  %v8190_v55 = vld [vmem:[#allocation14 + $0x250] ss:$8 sps:$4 sm:$0xff]  }
 0x38c   :  { %v9384_v16 = vmax.f32 %v1725_v0, 0.0  ;;  %7191 = vmatpush1.bf16.msra.mxu0 %v8154_v54  ;;  %v1655_v20 = vpop.f32.mrb[48].mxu1  ;;  %v8182_v54 = vld [vmem:[#allocation14 + $0x234] ss:$8 sps:$4 sm:$0xff]  }
 0x38d   :  { %v1726_v21 = vadd.f32 %v9293_v17, %v1655_v20  ;;  %v1657_v10 = vpop.f32.mrb[49].mxu1  ;;  %7193 = vmatprep.subr.bf16.mxu0 %v8155_v48  ;;  %v8193_v48 = vld [vmem:[#allocation14 + $0x260] ss:$8 sps:$4 sm:$0xff]   ;;  %v8194_v0 = vld [vmem:[#allocation14 + $0x274] ss:$8 sps:$4 sm:$0xff]  }
 0x38e   :  { %v1727_v8 = vadd.f32 %v9296_v23, %v1657_v10  ;;  %2153 = vmatprep.mubr.f32.mxu0 %v9384_v16  ;;  %v8196_v20 = vld [vmem:[#allocation14 + $0x270] ss:$8 sps:$4 sm:$0xff]   ;;  %v8200_v10 = vld [vmem:[#allocation14 + $0x294] ss:$8 sps:$4 sm:$0xff]  }
 0x38f   :  { %2154 = vmatmul.mubr.f32.gmra.mrb[46].mxu0 %v9386_v15  ;;  %v9394_v43 = vmax.f32 %v1726_v21, 0.0  ;;  %v8199_v21 = vld [vmem:[#allocation14 + $0x280] ss:$8 sps:$4 sm:$0xff]  }
 0x390   :  { %v9392_v51 = vmax.f32 %v1727_v8, 0.0  ;;  %7195 = vmatpush1.bf16.msra.mxu0 %v8157_v56  ;;  %v1661_v30 = vpop.f32.mrb[50].mxu1  ;;  %v8197_v56 = vld [vmem:[#allocation14 + $0x284] ss:$8 sps:$4 sm:$0xff]  }
 0x391   :  { %v9397_v27 = vadd.f32 %v9293_v17, %v1661_v30  ;;  %v1663_v37 = vpop.f32.mrb[51].mxu1  ;;  %7197 = vmatprep.subr.bf16.mxu0 %v8158_v29  ;;  %v8166_v17 = vld [vmem:[#allocation14 + $0xd0] ss:$8 sps:$4 sm:$0xff]   ;;  %v8203_v8 = vld [vmem:[#allocation14 + $0x2a4] ss:$8 sps:$4 sm:$0xff]  }
 0x392   :  { %v9400_v22 = vadd.f32 %v9296_v23, %v1663_v37  ;;  %2159 = vmatprep.mubr.f32.mxu0 %v9392_v51  ;;  %v8167_v23 = vld [vmem:[#allocation14 + $0xe4] ss:$8 sps:$4 sm:$0xff]   ;;  %v8202_v29 = vld [vmem:[#allocation14 + $0x290] ss:$8 sps:$4 sm:$0xff]   ;;  %v8205_v30 = vld [vmem:[#allocation14 + $0x2a0] ss:$8 sps:$4 sm:$0xff]  }
 0x393   :  { %2160 = vmatmul.mubr.f32.gmra.mrb[48].mxu0 %v9394_v43  ;;  %v1754_v49 = vmax.f32 %v9397_v27, 0.0  ;;  %v8208_v37 = vld [vmem:[#allocation14 + $0x2b0] ss:$8 sps:$4 sm:$0xff]  }
 0x394   :  { %v1755_v38 = vmax.f32 %v9400_v22, 0.0  ;;  %7199 = vmatpush1.bf16.msra.mxu0 %v8160_v40  ;;  %v8206_v40 = vld [vmem:[#allocation14 + $0x2b4] ss:$8 sps:$4 sm:$0xff]  }
 0x395   :  { %7201 = vmatprep.subr.bf16.mxu0 %v8161_v18  ;;  %v8209_v18 = vld [vmem:[#allocation14 + $0x2c4] ss:$8 sps:$4 sm:$0xff]  }
 0x396   :  { %2165 = vmatprep.mubr.f32.mxu0 %v1755_v38 }
 0x397   :  { %2166 = vmatmul.mubr.f32.gmra.mrb[50].mxu0 %v1754_v49 }
 0x398   :  { %7203 = vmatpush1.bf16.msra.mxu0 %v8163_v41  ;;  %2236 = vmatprep.mubr.f32.mxu0 %v8440_v1  ;;  %v8211_v41 = vld [vmem:[#allocation14 + $0x2c0] ss:$8 sps:$4 sm:$0xff]  }
 0x399   :  { %7205 = vmatprep.subr.bf16.mxu0 %v8164_v25  ;;  %v8212_v25 = vld [vmem:[#allocation14 + $0x2d4] ss:$8 sps:$4 sm:$0xff]  }
 0x39c   :  { %7207 = vmatpush1.bf16.msra.mxu0 %v8166_v17  ;;  %v8214_v17 = vld [vmem:[#allocation14 + $0x2d0] ss:$8 sps:$4 sm:$0xff]  }
 0x39d   :  { %7209 = vmatprep.subr.bf16.mxu0 %v8167_v23  ;;  %v8215_v23 = vld [vmem:[#allocation14 + $0x2e4] ss:$8 sps:$4 sm:$0xff]  }
 0x3a0   :  { %7211 = vmatpush1.bf16.msra.mxu0 %v8169_v26  ;;  %v8217_v26 = vld [vmem:[#allocation14 + $0x2e0] ss:$8 sps:$4 sm:$0xff]  }
 0x3a1   :  { %7213 = vmatprep.subr.bf16.mxu0 %v8170_v13  ;;  %v8218_v13 = vld [vmem:[#allocation14 + $0x2f4] ss:$8 sps:$4 sm:$0xff]  }
 0x3a4   :  { %7215 = vmatpush1.bf16.msra.mxu0 %v8172_v58  ;;  %v8220_v58 = vld [vmem:[#allocation14 + $0x2f0] ss:$8 sps:$4 sm:$0xff]  }
 0x3a5   :  { %7217 = vmatprep.subr.bf16.mxu0 %v8173_v35  ;;  %v6242_v35 = vld [vmem:[%s10804_s9 + $0xc0] sm:$0xff]  }
 0x3a6   :  { %7313 = vmatprep.subr.bf16.mxu1 %v6242_v35  ;;  %v6249_v35 = vld [vmem:[%s10804_s9 + $0xf8] sm:$0xff]  }
 0x3a7   :  { %2237 = vmatmul.mubr.f32.vlgmr.msra.gmra.mrb[26].mxu0 %v8440_v1 }
 0x3a8   :  { %2242 = vmatprep.mubr.f32.mxu0 %v1731_v62  ;;  %7219 = vmatpush1.bf16.msra.mxu0 %v8175_v52  ;;  %v8185_v62 = vld [vmem:[#allocation14 + $0x244] ss:$8 sps:$4 sm:$0xff]  }
 0x3a9   :  { %7221 = vmatprep.subr.bf16.mxu0 %v8176_v39  ;;  %v6234_v52 = vld [vmem:[%s10804_s9 + $0x80] sm:$0xff]   ;;  %v6243_v39 = vld [vmem:[%s10804_s9 + $0xc8] sm:$0xff]  }
 0x3aa   :  { %7315 = vmatpush3.bf16.msra.mxu1 %v6234_v52 }
 0x3ab   :  { %2243 = vmatmul.mubr.f32.gmra.mrb[28].mxu0 %v1730_v28  ;;  %v8188_v28 = vld [vmem:[#allocation14 + $0x254] ss:$8 sps:$4 sm:$0xff]   ;;  %7317 = vmatprep.subr.bf16.mxu1 %v6243_v39  ;;  %v6241_v39 = vld [vmem:[%s10804_s9 + $0xb8] sm:$0xff]  }
 0x3ac   :  { %2248 = vmatprep.mubr.f32.mxu0 %v9312_v12  ;;  %7223 = vmatpush1.bf16.msra.mxu0 %v8178_v53  ;;  %v6235_v53 = vld [vmem:[%s10804_s9 + $0x88] sm:$0xff]  }
 0x3ad   :  { %7225 = vmatprep.subr.bf16.mxu0 %v8179_v60  ;;  %v6244_v60 = vld [vmem:[%s10804_s9 + $0xd0] sm:$0xff]  }
 0x3ae   :  { %7319 = vmatpush3.bf16.msra.mxu1 %v6235_v53 }
 0x3af   :  { %2249 = vmatmul.mubr.f32.gmra.mrb[30].mxu0 %v9314_v57  ;;  %7321 = vmatprep.subr.bf16.mxu1 %v6244_v60 }
 0x3b0   :  { %2254 = vmatprep.mubr.f32.mxu0 %v9320_v32  ;;  %7227 = vmatpush1.bf16.msra.mxu0 %v8181_v61  ;;  %v6236_v61 = vld [vmem:[%s10804_s9 + $0x90] sm:$0xff]  }
 0x3b1   :  { %7229 = vmatprep.subr.bf16.mxu0 %v8182_v54  ;;  %v6245_v54 = vld [vmem:[%s10804_s9 + $0xd8] sm:$0xff]  }
 0x3b2   :  { %7323 = vmatpush3.bf16.msra.mxu1 %v6236_v61  ;;  %v6219_v61 = vld [vmem:[%s10804_s9 + $0x8] sm:$0xff]  }
 0x3b3   :  { %2255 = vmatmul.mubr.f32.gmra.mrb[32].mxu0 %v9322_v36  ;;  %7325 = vmatprep.subr.bf16.mxu1 %v6245_v54  ;;  %v6228_v54 = vld [vmem:[%s10804_s9 + $0x50] sm:$0xff]  }
 0x3b4   :  { %2260 = vmatprep.mubr.f32.mxu0 %v9328_v42  ;;  %7231 = vmatpush1.bf16.msra.mxu0 %v8184_v44  ;;  %v6237_v44 = vld [vmem:[%s10804_s9 + $0x98] sm:$0xff]  }
 0x3b5   :  { %7233 = vmatprep.subr.bf16.mxu0 %v8185_v62  ;;  %v6246_v62 = vld [vmem:[%s10804_s9 + $0xe0] sm:$0xff]  }
 0x3b6   :  { %7327 = vmatpush3.bf16.msra.mxu1 %v6237_v44 }
 0x3b7   :  { %2261 = vmatmul.mubr.f32.gmra.mrb[34].mxu0 %v9330_v46  ;;  %7329 = vmatprep.subr.bf16.mxu1 %v6246_v62 }
 0x3b8   :  { %2266 = vmatprep.mubr.f32.mxu0 %v9336_v14  ;;  %7235 = vmatpush1.bf16.msra.mxu0 %v8187_v34  ;;  %v6238_v34 = vld [vmem:[%s10804_s9 + $0xa0] sm:$0xff]  }
 0x3b9   :  { %7237 = vmatprep.subr.bf16.mxu0 %v8188_v28  ;;  %v6247_v28 = vld [vmem:[%s10804_s9 + $0xe8] sm:$0xff]  }
 0x3ba   :  { %7331 = vmatpush3.bf16.msra.mxu1 %v6238_v34 }
 0x3bb   :  { %2267 = vmatmul.mubr.f32.gmra.mrb[36].mxu0 %v9338_v19  ;;  %7333 = vmatprep.subr.bf16.mxu1 %v6247_v28  ;;  %v6258_v28 = vld [vmem:[%s10804_s9 + $0x140] sm:$0xff]  }
 0x3bc   :  { %2272 = vmatprep.mubr.f32.mxu0 %v9344_v24  ;;  %7239 = vmatpush1.bf16.msra.mxu0 %v8190_v55  ;;  %v6239_v55 = vld [vmem:[%s10804_s9 + $0xa8] sm:$0xff]  }
 0x3bd   :  { %7241 = vmatprep.subr.bf16.mxu0 %v8191_v63 }
 0x3be   :  { %7335 = vmatpush3.bf16.msra.mxu1 %v6239_v55 }
 0x3bf   :  { %2273 = vmatmul.mubr.f32.gmra.mrb[38].mxu0 %v9346_v7 }
 0x3c0   :  { %2278 = vmatprep.mubr.f32.mxu0 %v9352_v33  ;;  %7243 = vmatpush1.bf16.msra.mxu0 %v8193_v48  ;;  %v6226_v48 = vld [vmem:[%s10804_s9 + $0x40] sm:$0xff]  }
 0x3c1   :  { %7245 = vmatprep.subr.bf16.mxu0 %v8194_v0  ;;  %v5892_v0 = vld [vmem:[%s10804_s9] sm:$0xff]  }
 0x3c3   :  { %2279 = vmatmul.mubr.f32.gmra.mrb[40].mxu0 %v9354_v11 }
 0x3c4   :  { %2284 = vmatprep.mubr.f32.mxu0 %v9360_v31  ;;  %7247 = vmatpush1.bf16.msra.mxu0 %v8196_v20  ;;  %v6248_v20 = vld [vmem:[%s10804_s9 + $0xf0] sm:$0xff]  }
 0x3c5   :  { %7249 = vmatprep.subr.bf16.mxu0 %v8197_v56  ;;  %7337 = vmatprep.subr.bf16.mxu1 %v6248_v20 }
 0x3c7   :  { %2285 = vmatmul.mubr.f32.gmra.mrb[42].mxu0 %v9362_v47 }
 0x3c8   :  { %2290 = vmatprep.mubr.f32.mxu0 %v9368_v50  ;;  %7251 = vmatpush1.bf16.msra.mxu0 %v8199_v21 }
 0x3c9   :  { %7253 = vmatprep.subr.bf16.mxu0 %v8200_v10 }
 0x3cb   :  { %2291 = vmatmul.mubr.f32.gmra.mrb[44].mxu0 %v9370_v59 }
 0x3cc   :  { %2296 = vmatprep.mubr.f32.mxu0 %v9376_v45  ;;  %7255 = vmatpush1.bf16.msra.mxu0 %v8202_v29 }
 0x3cd   :  { %7257 = vmatprep.subr.bf16.mxu0 %v8203_v8 }
 0x3cf   :  { %2297 = vmatmul.mubr.f32.gmra.mrb[46].mxu0 %v9378_v9 }
 0x3d0   :  { %2302 = vmatprep.mubr.f32.mxu0 %v9384_v16  ;;  %7259 = vmatpush1.bf16.msra.mxu0 %v8205_v30  ;;  %v6240_v30 = vld [vmem:[%s10804_s9 + $0xb0] sm:$0xff]  }
 0x3d1   :  { %7261 = vmatprep.subr.bf16.mxu0 %v8206_v40  ;;  %7339 = vmatpush3.bf16.msra.mxu1 %v6240_v30 }
 0x3d2   :  { %7341 = vmatprep.subr.bf16.mxu1 %v6249_v35 }
 0x3d3   :  { %2303 = vmatmul.mubr.f32.gmra.mrb[48].mxu0 %v9386_v15 }
 0x3d4   :  { %2308 = vmatprep.mubr.f32.mxu0 %v9392_v51  ;;  %7263 = vmatpush1.bf16.msra.mxu0 %v8208_v37 }
 0x3d5   :  { %7265 = vmatprep.subr.bf16.mxu0 %v8209_v18  ;;  %7343 = vmatpush3.bf16.msra.mxu1 %v6241_v39 }
 0x3d6   :  { %7345 = vmatprep.subr.bf16.mxu1 %v6258_v28 }
 0x3d7   :  { %2309 = vmatmul.mubr.f32.gmra.mrb[50].mxu0 %v9394_v43 }
 0x3d8   :  { %7267 = vmatpush1.bf16.msra.mxu0 %v8211_v41  ;;  %2476 = vmatprep.mubr.f32.mxu0 %v9312_v12 }
 0x3d9   :  { %7269 = vmatprep.subr.bf16.mxu0 %v8212_v25  ;;  %v9605_v25 = vld [vmem:[%s10803_s8] ss:$0 sm:$0xff] }
 0x3dc   :  { %7271 = vmatpush1.bf16.msra.mxu0 %v8214_v17 }
 0x3dd   :  { %7273 = vmatprep.subr.bf16.mxu0 %v8215_v23 }
 0x3e0   :  { %7275 = vmatpush1.bf16.msra.mxu0 %v8217_v26 }
 0x3e1   :  { %7277 = vmatprep.subr.bf16.mxu0 %v8218_v13 }
 0x3e4   :  { %7279 = vmatpush1.bf16.msra.mxu0 %v8220_v58 }
 0x3e5   :  { %7281 = vmatprep.subr.bf16.mxu0 %v6226_v48 }
 0x3e7   :  { %2477 = vmatmul.mubr.f32.vlgmr.msra.gmra.mrb[26].mxu0 %v9314_v57 }
 0x3e8   :  { %2482 = vmatprep.mubr.f32.mxu0 %v9320_v32  ;;  %7283 = vmatpush3.bf16.msra.mxu0 %v5892_v0 }
 0x3eb   :  { %2483 = vmatmul.mubr.f32.gmra.mrb[28].mxu0 %v9322_v36 }
 0x3ec   :  { %2488 = vmatprep.mubr.f32.mxu0 %v9328_v42 }
 0x3ef   :  { %2489 = vmatmul.mubr.f32.gmra.mrb[30].mxu0 %v9330_v46 }
 0x3f0   :  { %2494 = vmatprep.mubr.f32.mxu0 %v9336_v14 }
 0x3f3   :  { %2495 = vmatmul.mubr.f32.gmra.mrb[32].mxu0 %v9338_v19 }
 0x3f4   :  { %2500 = vmatprep.mubr.f32.mxu0 %v9344_v24 }
 0x3f7   :  { %2501 = vmatmul.mubr.f32.gmra.mrb[34].mxu0 %v9346_v7 }
 0x3f8   :  { %2506 = vmatprep.mubr.f32.mxu0 %v9352_v33 }
 0x3fb   :  { %2507 = vmatmul.mubr.f32.gmra.mrb[36].mxu0 %v9354_v11 }
 0x3fc   :  { %2512 = vmatprep.mubr.f32.mxu0 %v9360_v31 }
 0x3ff   :  { %2513 = vmatmul.mubr.f32.gmra.mrb[38].mxu0 %v9362_v47 }
 0x400   :  { %2518 = vmatprep.mubr.f32.mxu0 %v9368_v50 }
 0x403   :  { %2519 = vmatmul.mubr.f32.gmra.mrb[40].mxu0 %v9370_v59 }
 0x404   :  { %2524 = vmatprep.mubr.f32.mxu0 %v9376_v45 }
 0x407   :  { %2525 = vmatmul.mubr.f32.gmra.mrb[42].mxu0 %v9378_v9 }
 0x408   :  { %2530 = vmatprep.mubr.f32.mxu0 %v9384_v16 }
 0x40b   :  { %2531 = vmatmul.mubr.f32.gmra.mrb[44].mxu0 %v9386_v15 }
 0x40c   :  { %2536 = vmatprep.mubr.f32.mxu0 %v9392_v51 }
 0x40f   :  { %2537 = vmatmul.mubr.f32.gmra.mrb[46].mxu0 %v9394_v43 }
 0x410   :  { %2542 = vmatprep.mubr.f32.mxu0 %v1755_v38 }
 0x413   :  { %2543 = vmatmul.mubr.f32.gmra.mrb[48].mxu0 %v1754_v49 }
 0x414   :  { %2548 = vmatprep.mubr.f32.mxu0 %v8440_v1 }
 0x417   :  { %2549 = vmatmul.mubr.f32.gmra.mrb[50].mxu0 %v8440_v1 }
 0x4ba   :  { %v9466_v12 = vpop.f32.mrb[26].mxu0 }
 0x4bb   :  { %v9468_v57 = vpop.f32.mrb[27].mxu0 }
 0x4be   :  { %v9470_v32 = vpop.f32.mrb[28].mxu0 }
 0x4bf   :  { %v9472_v36 = vpop.f32.mrb[29].mxu0 }
 0x4c2   :  { %v9474_v42 = vpop.f32.mrb[30].mxu0 }
 0x4c3   :  { %v9476_v46 = vpop.f32.mrb[31].mxu0 }
 0x4c6   :  { %v9478_v14 = vpop.f32.mrb[32].mxu0 }
 0x4c7   :  { %v9480_v19 = vpop.f32.mrb[33].mxu0 }
 0x4ca   :  { %v9482_v24 = vpop.f32.mrb[34].mxu0 }
 0x4cb   :  { %v9484_v7 = vpop.f32.mrb[35].mxu0 }
 0x4ce   :  { %v9486_v33 = vpop.f32.mrb[36].mxu0 }
 0x4cf   :  { %2604 = vrot.lane.b32.xlu0 %v9486_v33, %s8443_s30  ;;  %v9490_v11 = vpop.f32.mrb[37].mxu0 }
 0x4d2   :  { %v9492_v31 = vpop.f32.mrb[38].mxu0 }
 0x4d3   :  { %2708 = vrot.lane.b32.xlu0 %v9490_v11, %s8443_s30  ;;  %v9496_v47 = vpop.f32.mrb[39].mxu0 }
 0x4d6   :  { %v9498_v50 = vpop.f32.mrb[40].mxu0 }
 0x4d7   :  { %2608 = vrot.lane.b32.xlu1 %v9498_v50, %s8443_s30  ;;  %v9502_v59 = vpop.f32.mrb[41].mxu0 }
 0x4da   :  { %v9504_v45 = vpop.f32.mrb[42].mxu0 }
 0x4db   :  { %2712 = vrot.lane.b32.xlu1 %v9502_v59, %s8443_s30  ;;  %v9508_v9 = vpop.f32.mrb[43].mxu0 }
 0x4de   :  { %v9510_v16 = vpop.f32.mrb[44].mxu0 }
 0x4df   :  { %2612 = vrot.lane.b32.xlu0 %v9510_v16, %s8443_s30  ;;  %v9514_v15 = vpop.f32.mrb[45].mxu0 }
 0x4e2   :  { %v9516_v51 = vpop.f32.mrb[46].mxu0 }
 0x4e3   :  { %2716 = vrot.lane.b32.xlu0 %v9514_v15, %s8443_s30  ;;  %v9520_v43 = vpop.f32.mrb[47].mxu0 }
 0x4e6   :  { %v9522_v27 = vpop.f32.mrb[48].mxu0 }
 0x4e7   :  { %2596 = vrot.lane.b32.xlu0 %v9470_v32, %s8443_s30  ;;  %2616 = vrot.lane.b32.xlu1 %v9522_v27, %s8443_s30  ;;  %v9528_v22 = vpop.f32.mrb[49].mxu0 }
 0x4ea   :  { %v9530_v38 = vpop.f32.mrb[50].mxu0 }
 0x4eb   :  { %2700 = vrot.lane.b32.xlu0 %v9472_v36, %s8443_s30  ;;  %2720 = vrot.lane.b32.xlu1 %v9528_v22, %s8443_s30  ;;  %v9536_v49 = vpop.f32.mrb[51].mxu0 }
 0x4ef   :  { %2602 = vrot.lane.b32.xlu0 %v9482_v24, %s8443_s30  ;;  %2600 = vrot.lane.b32.xlu1 %v9478_v14, %s8443_s30 }
 0x4f3   :  { %2706 = vrot.lane.b32.xlu0 %v9484_v7, %s8443_s30  ;;  %2704 = vrot.lane.b32.xlu1 %v9480_v19, %s8443_s30 }
 0x4f7   :  { %2606 = vrot.lane.b32.xlu1 %v9492_v31, %s8443_s30 }
 0x4fb   :  { %2710 = vrot.lane.b32.xlu1 %v9496_v47, %s8443_s30 }
 0x541   :  { %v2605_v63 = vpop.permute.xlu0 %2604 }
 0x542   :  { %v2638_v56 = vmax.f32 %v9486_v33, %v2605_v63  ;;  %v2651_v21 = vadd.f32 %v2605_v63, %v9486_v33 }
 0x544   :  { %v2664_v10 = vmax.f32 %v2638_v56, %v9490_v11  ;;  %v2677_v29 = vadd.f32 %v2651_v21, %v9490_v11 }
 0x545   :  { %v2709_v8 = vpop.permute.xlu0 %2708 }
 0x546   :  { %v2755_v40 = vadd.f32 %v2709_v8, %v2677_v29  ;;  %v2742_v37 = vmax.f32 %v2664_v10, %v2709_v8 }
 0x548   :  { %v2768_v18 = vmul.f32 0.25, %v2755_v40 }
 0x549   :  { %v2609_v41 = vpop.permute.xlu1 %2608 }
 0x54a   :  { %v2781_v17 = vadd.f32 %v2768_v18, %v2742_v37  ;;  %v2640_v23 = vmax.f32 %v9498_v50, %v2609_v41  ;;  %v2653_v26 = vadd.f32 %v2609_v41, %v9498_v50  ;;  %v6221_v18 = vld [vmem:[%s10804_s9 + $0x18] sm:$0xff]  }
 0x54c   :  { %v2666_v13 = vmax.f32 %v2640_v23, %v9502_v59  ;;  %v2679_v58 = vadd.f32 %v2653_v26, %v9502_v59  ;;  %v2801_v33 = vadd.f32 %v9605_v25, %v2781_v17  ;;  %v6227_v59 = vld [vmem:[%s10804_s9 + $0x48] sm:$0xff]  }
 0x54d   :  { %v2713_v11 = vpop.permute.xlu1 %2712  ;;  %7285 = vmatprep.subr.bf16.mxu0 %v6227_v59  ;;  %v6231_v59 = vld [vmem:[%s10804_s9 + $0x68] sm:$0xff]  }
 0x54e   :  { %v2757_v52 = vadd.f32 %v2713_v11, %v2679_v58  ;;  %2825 = vrot.lane.b32.xlu0 %v2801_v33, %s8443_s30  ;;  %v2744_v50 = vmax.f32 %v2666_v13, %v2713_v11  ;;  %7287 = vmatpush3.bf16.msra.mxu0 %v6219_v61  ;;  %v6230_v33 = vld [vmem:[%s10804_s9 + $0x60] sm:$0xff]  }
 0x54f   :  { %7289 = vmatprep.subr.bf16.mxu0 %v6228_v54 }
 0x550   :  { %v2770_v53 = vmul.f32 0.25, %v2757_v52 }
 0x551   :  { %v2613_v60 = vpop.permute.xlu0 %2612 }
 0x552   :  { %v2783_v44 = vadd.f32 %v2770_v53, %v2744_v50  ;;  %v2642_v62 = vmax.f32 %v9510_v16, %v2613_v60  ;;  %v2655_v34 = vadd.f32 %v2613_v60, %v9510_v16  ;;  %2610 = vrot.lane.b32.xlu0 %v9504_v45, %s8443_s30  ;;  %v6220_v16 = vld [vmem:[%s10804_s9 + $0x10] sm:$0xff]  }
 0x553   :  { %7291 = vmatpush3.bf16.msra.mxu0 %v6220_v16 }
 0x554   :  { %v2668_v55 = vmax.f32 %v2642_v62, %v9514_v15  ;;  %v2681_v63 = vadd.f32 %v2655_v34, %v9514_v15  ;;  %v2803_v48 = vadd.f32 %v9605_v25, %v2783_v44  ;;  %v6229_v15 = vld [vmem:[%s10804_s9 + $0x58] sm:$0xff]   ;;  %v6223_v34 = vld [vmem:[%s10804_s9 + $0x28] sm:$0xff]  }
 0x555   :  { %v2717_v0 = vpop.permute.xlu0 %2716  ;;  %7293 = vmatprep.subr.bf16.mxu0 %v6229_v15 }
 0x556   :  { %v2759_v20 = vadd.f32 %v2717_v0, %v2681_v63  ;;  %2714 = vrot.lane.b32.xlu0 %v9508_v9, %s8443_s30  ;;  %2831 = vrot.lane.b32.xlu1 %v2803_v48, %s8443_s30  ;;  %v2746_v56 = vmax.f32 %v2668_v55, %v2717_v0 }
 0x557   :  { %7295 = vmatpush3.bf16.msra.mxu0 %v6221_v18 }
 0x558   :  { %v2772_v21 = vmul.f32 0.25, %v2759_v20  ;;  %7297 = vmatprep.subr.bf16.mxu0 %v6230_v33 }
 0x559   :  { %v2597_v10 = vpop.permute.xlu0 %2596  ;;  %v2617_v29 = vpop.permute.xlu1 %2616 }
 0x55a   :  { %v2785_v8 = vadd.f32 %v2772_v21, %v2746_v56  ;;  %v2634_v30 = vmax.f32 %v9470_v32, %v2597_v10  ;;  %v2647_v40 = vadd.f32 %v2597_v10, %v9470_v32  ;;  %v2644_v37 = vmax.f32 %v9522_v27, %v2617_v29  ;;  %2594 = vrot.lane.b32.xlu0 %v9466_v12, %s8443_s30  ;;  %v6232_v56 = vld [vmem:[%s10804_s9 + $0x70] sm:$0xff]  }
 0x55b   :  { %v2657_v41 = vadd.f32 %v2617_v29, %v9522_v27  ;;  %2614 = vrot.lane.b32.xlu1 %v9516_v51, %s8443_s30  ;;  %v6224_v21 = vld [vmem:[%s10804_s9 + $0x30] sm:$0xff]  }
 0x55c   :  { %v2660_v17 = vmax.f32 %v2634_v30, %v9472_v36  ;;  %v2673_v23 = vadd.f32 %v2647_v40, %v9472_v36  ;;  %v2670_v32 = vmax.f32 %v2644_v37, %v9528_v22  ;;  %v6222_v36 = vld [vmem:[%s10804_s9 + $0x20] sm:$0xff]   ;;  %v6233_v40 = vld [vmem:[%s10804_s9 + $0x78] sm:$0xff]  }
 0x55d   :  { %v2701_v26 = vpop.permute.xlu0 %2700  ;;  %v2721_v13 = vpop.permute.xlu1 %2720  ;;  %v2683_v58 = vadd.f32 %v2657_v41, %v9528_v22  ;;  %v2805_v22 = vadd.f32 %v9605_v25, %v2785_v8  ;;  %7299 = vmatpush3.bf16.msra.mxu0 %v6222_v36 }
 0x55e   :  { %v2751_v27 = vadd.f32 %v2701_v26, %v2673_v23  ;;  %2698 = vrot.lane.b32.xlu0 %v9468_v57, %s8443_s30  ;;  %v2738_v35 = vmax.f32 %v2660_v17, %v2701_v26  ;;  %v2748_v39 = vmax.f32 %v2670_v32, %v2721_v13  ;;  %7301 = vmatprep.subr.bf16.mxu0 %v6231_v59  ;;  %v6225_v17 = vld [vmem:[%s10804_s9 + $0x38] sm:$0xff]  }
 0x55f   :  { %v2761_v11 = vadd.f32 %v2721_v13, %v2683_v58  ;;  %2718 = vrot.lane.b32.xlu1 %v9520_v43, %s8443_s30 }
 0x560   :  { %v2764_v52 = vmul.f32 0.25, %v2751_v27 }
 0x561   :  { %v2774_v50 = vmul.f32 0.25, %v2761_v11  ;;  %v2603_v53 = vpop.permute.xlu0 %2602  ;;  %v2601_v60 = vpop.permute.xlu1 %2600  ;;  %7303 = vmatpush3.bf16.msra.mxu0 %v6223_v34 }
 0x562   :  { %v2777_v61 = vadd.f32 %v2764_v52, %v2738_v35  ;;  %v2637_v54 = vmax.f32 %v9482_v24, %v2603_v53  ;;  %v2650_v44 = vadd.f32 %v2603_v53, %v9482_v24  ;;  %v2636_v62 = vmax.f32 %v9478_v14, %v2601_v60  ;;  %2837 = vrot.lane.b32.xlu0 %v2805_v22, %s8443_s30 }
 0x563   :  { %v2787_v28 = vadd.f32 %v2774_v50, %v2748_v39  ;;  %v2649_v55 = vadd.f32 %v2601_v60, %v9478_v14  ;;  %2598 = vrot.lane.b32.xlu1 %v9474_v42, %s8443_s30  ;;  %7305 = vmatprep.subr.bf16.mxu0 %v6232_v56 }
 0x564   :  { %v2663_v63 = vmax.f32 %v2637_v54, %v9484_v7  ;;  %v2676_v48 = vadd.f32 %v2650_v44, %v9484_v7  ;;  %v2662_v24 = vmax.f32 %v2636_v62, %v9480_v19  ;;  %v2797_v11 = vadd.f32 %v9605_v25, %v2777_v61 }
 0x565   :  { %v2707_v0 = vpop.permute.xlu0 %2706  ;;  %v2675_v20 = vadd.f32 %v2649_v55, %v9480_v19  ;;  %v2705_v16 = vpop.permute.xlu1 %2704  ;;  %7307 = vmatpush3.bf16.msra.mxu0 %v6224_v21  ;;  %v2807_v30 = vadd.f32 %v9605_v25, %v2787_v28 }
 0x566   :  { %v2754_v14 = vadd.f32 %v2707_v0, %v2676_v48  ;;  %v2741_v7 = vmax.f32 %v2663_v63, %v2707_v0  ;;  %v2740_v15 = vmax.f32 %v2662_v24, %v2705_v16  ;;  %7309 = vmatprep.subr.bf16.mxu0 %v6233_v40  ;;  %v6251_v40 = vld [vmem:[%s10804_s9 + $0x108] sm:$0xff]  }
 0x567   :  { %v2753_v10 = vadd.f32 %v2705_v16, %v2675_v20  ;;  %2702 = vrot.lane.b32.xlu1 %v9476_v46, %s8443_s30 }
 0x568   :  { %v2767_v29 = vmul.f32 0.25, %v2754_v14 }
 0x569   :  { %v2766_v19 = vmul.f32 0.25, %v2753_v10  ;;  %v2607_v8 = vpop.permute.xlu1 %2606  ;;  %7311 = vmatpush3.bf16.msra.mxu0 %v6225_v17 }
 0x56a   :  { %v2780_v37 = vadd.f32 %v2767_v29, %v2741_v7  ;;  %v2639_v18 = vmax.f32 %v9492_v31, %v2607_v8  ;;  %v2652_v41 = vadd.f32 %v2607_v8, %v9492_v31 }
 0x56b   :  { %v2779_v23 = vadd.f32 %v2766_v19, %v2740_v15  ;;  %2843 = vrot.lane.b32.xlu1 %v2807_v30, %s8443_s30 }
 0x56c   :  { %v2800_v32 = vadd.f32 %v9605_v25, %v2780_v37  ;;  %v2665_v26 = vmax.f32 %v2639_v18, %v9496_v47  ;;  %v2678_v13 = vadd.f32 %v2652_v41, %v9496_v47  ;;  %v6260_v41 = vld [vmem:[%s10804_s9 + $0x150] sm:$0xff]  }
 0x56d   :  { %v2711_v58 = vpop.permute.xlu1 %2710  ;;  %v2799_v33 = vadd.f32 %v9605_v25, %v2779_v23 }
 0x56e   :  { %v2756_v31 = vadd.f32 %v2711_v58, %v2678_v13  ;;  %2823 = vst.msk [vmem:[#allocation5 + $0x10] sm:$0xff] %vm2809_vm1, %v2800_v32  ;;  %v2743_v27 = vmax.f32 %v2665_v26, %v2711_v58 }
 0x56f   :  { %2819 = vrot.lane.b32.xlu0 %v2799_v33, %s8443_s30  ;;  %2618 = vrot.lane.b32.xlu1 %v9530_v38, %s8443_s30 }
 0x570   :  { %v2769_v36 = vmul.f32 0.25, %v2756_v31  ;;  %v6252_v31 = vld [vmem:[%s10804_s9 + $0x110] sm:$0xff]  }
 0x572   :  { %v2782_v35 = vadd.f32 %v2769_v36, %v2743_v27 }
 0x573   :  { %2812 = vrot.lane.b32.xlu1 %v2797_v11, %s8443_s30  ;;  %2722 = vrot.lane.b32.xlu0 %v9536_v49, %s8443_s30 }
 0x574   :  { %v2802_v47 = vadd.f32 %v9605_v25, %v2782_v35 }
 0x576   :  { %2829 = vst.msk [vmem:[#allocation5 + $0x18] sm:$0xff] %vm2809_vm1, %v2802_v47 }
 0x5c0   :  { %v2826_v52 = vpop.permute.xlu0 %2825 }
 0x5c1   :  { %2828 = vst.msk [vmem:[#allocation5 + $0x10] sm:$0xff] %vm2815_vm2, %v2826_v52  ;;  %v6262_v52 = vld [vmem:[%s10804_s9 + $0x160] sm:$0xff]  }
 0x5c4   :  { %v2611_v22 = vpop.permute.xlu0 %2610 }
 0x5c5   :  { %v2641_v39 = vmax.f32 %v9504_v45, %v2611_v22  ;;  %v2654_v50 = vadd.f32 %v2611_v22, %v9504_v45 }
 0x5c7   :  { %v2667_v53 = vmax.f32 %v2641_v39, %v9508_v9  ;;  %v2680_v60 = vadd.f32 %v2654_v50, %v9508_v9  ;;  %v6254_v50 = vld [vmem:[%s10804_s9 + $0x120] sm:$0xff]  }
 0x5c8   :  { %v2715_v59 = vpop.permute.xlu0 %2714  ;;  %v2832_v61 = vpop.permute.xlu1 %2831  ;;  %v2850_v7 = vld [vmem:[#allocation5 + $0x10] sm:$0xff] }
 0x5c9   :  { %v2758_v54 = vadd.f32 %v2715_v59, %v2680_v60  ;;  %2834 = vst.msk [vmem:[#allocation5 + $0x18] sm:$0xff] %vm2815_vm2, %v2832_v61  ;;  %v2745_v44 = vmax.f32 %v2667_v53, %v2715_v59  ;;  %v6263_v59 = vld [vmem:[%s10804_s9 + $0x168] sm:$0xff]  }
 0x5cb   :  { %v2771_v62 = vmul.f32 0.25, %v2758_v54 }
 0x5cc   :  { %v2595_v34 = vpop.permute.xlu0 %2594 }
 0x5cd   :  { %v2784_v28 = vadd.f32 %v2771_v62, %v2745_v44  ;;  %v2633_v55 = vmax.f32 %v9466_v12, %v2595_v34  ;;  %v2646_v63 = vadd.f32 %v2595_v34, %v9466_v12  ;;  %v2615_v48 = vpop.permute.xlu1 %2614  ;;  %v6250_v12 = vld [vmem:[%s10804_s9 + $0x100] sm:$0xff]   ;;  %v6255_v34 = vld [vmem:[%s10804_s9 + $0x128] sm:$0xff]  }
 0x5ce   :  { %v2643_v45 = vmax.f32 %v9516_v51, %v2615_v48  ;;  %v2656_v24 = vadd.f32 %v2615_v48, %v9516_v51  ;;  %v6264_v48 = vld [vmem:[%s10804_s9 + $0x170] sm:$0xff]  }
 0x5cf   :  { %v2804_v9 = vadd.f32 %v9605_v25, %v2784_v28  ;;  %v2659_v0 = vmax.f32 %v2633_v55, %v9468_v57  ;;  %v2672_v20 = vadd.f32 %v2646_v63, %v9468_v57  ;;  %v6259_v57 = vld [vmem:[%s10804_s9 + $0x148] sm:$0xff]  }
 0x5d0   :  { %v2699_v16 = vpop.permute.xlu0 %2698  ;;  %v2669_v56 = vmax.f32 %v2643_v45, %v9520_v43  ;;  %v2682_v14 = vadd.f32 %v2656_v24, %v9520_v43  ;;  %v2851_v21 = vld [vmem:[#allocation5 + $0x18] sm:$0xff] }
 0x5d1   :  { %2835 = vst.msk [vmem:[#allocation5 + $0x20] sm:$0xff] %vm2809_vm1, %v2804_v9  ;;  %v2750_v10 = vadd.f32 %v2699_v16, %v2672_v20  ;;  %v2719_v51 = vpop.permute.xlu1 %2718  ;;  %3207 = vmatprep.mubr.f32.mxu1 %v2851_v21  ;;  %v2737_v15 = vmax.f32 %v2659_v0, %v2699_v16  ;;  %v6265_v9 = vld [vmem:[%s10804_s9 + $0x178] sm:$0xff]   ;;  %v8444_v21 = vmov 0.0|0.0  }
 0x5d2   :  { %v2760_v29 = vadd.f32 %v2719_v51, %v2682_v14  ;;  %3208 = vmatmul.mubr.f32.vlgmr.msra.gmra.mrb[52].mxu1 %v2850_v7  ;;  %v2747_v43 = vmax.f32 %v2669_v56, %v2719_v51  ;;  %v6257_v56 = vld [vmem:[%s10804_s9 + $0x138] sm:$0xff]   ;;  %v6268_v51 = vld [vmem:[%s10804_s9 + $0x190] sm:$0xff]  }
 0x5d3   :  { %v2763_v19 = vmul.f32 0.25, %v2750_v10  ;;  %7347 = vmatpush3.bf16.msra.mxu1 %v6250_v12  ;;  %v6266_v12 = vld [vmem:[%s10804_s9 + $0x180] sm:$0xff]   ;;  %v6267_v10 = vld [vmem:[%s10804_s9 + $0x188] sm:$0xff]   ;;  %v6269_v7 = vld [vmem:[%s10804_s9 + $0x198] sm:$0xff]  }
 0x5d4   :  { %v2773_v8 = vmul.f32 0.25, %v2760_v29  ;;  %v2838_v30 = vpop.permute.xlu0 %2837  ;;  %7349 = vmatprep.subr.bf16.mxu1 %v6259_v57  ;;  %v8221_v29 = vld [vmem:[%s10806_s11 + $0x4] ss:$16 sps:$4 sm:$0xff]  }
 0x5d5   :  { %v2776_v37 = vadd.f32 %v2763_v19, %v2737_v15  ;;  %2840 = vst.msk [vmem:[#allocation5 + $0x20] sm:$0xff] %vm2815_vm2, %v2838_v30  ;;  %v2599_v18 = vpop.permute.xlu1 %2598  ;;  %v8224_v15 = vld [vmem:[%s10806_s11 + $0xc] ss:$16 sps:$4 sm:$0xff]   ;;  %v8223_v19 = vld [vmem:[%s10806_s11] ss:$16 sps:$4 sm:$0xff]  }
 0x5d6   :  { %v2786_v17 = vadd.f32 %v2773_v8, %v2747_v43  ;;  %v2635_v23 = vmax.f32 %v9474_v42, %v2599_v18  ;;  %v2648_v32 = vadd.f32 %v2599_v18, %v9474_v42  ;;  %v6261_v42 = vld [vmem:[%s10804_s9 + $0x158] sm:$0xff]   ;;  %v8227_v8 = vld [vmem:[%s10806_s11 + $0x24] ss:$16 sps:$4 sm:$0xff]   ;;  %7405 = vmatprep.subr.bf16.mxu0 %v8224_v15 }
 0x5d7   :  { %v2796_v26 = vadd.f32 %v9605_v25, %v2776_v37  ;;  %7351 = vmatpush3.bf16.msra.mxu1 %v6251_v40  ;;  %v8226_v43 = vld [vmem:[%s10806_s11 + $0x8] ss:$16 sps:$4 sm:$0xff]   ;;  %v8230_v30 = vld [vmem:[%s10806_s11 + $0x2c] ss:$16 sps:$4 sm:$0xff]   ;;  %v8229_v40 = vld [vmem:[%s10806_s11 + $0x20] ss:$16 sps:$4 sm:$0xff]  }
 0x5d8   :  { %v2806_v13 = vadd.f32 %v9605_v25, %v2786_v17  ;;  %v2661_v58 = vmax.f32 %v2635_v23, %v9476_v46  ;;  %v2674_v33 = vadd.f32 %v2648_v32, %v9476_v46  ;;  %7353 = vmatprep.subr.bf16.mxu1 %v6260_v41  ;;  %v6253_v46 = vld [vmem:[%s10804_s9 + $0x118] sm:$0xff]   ;;  %v8233_v18 = vld [vmem:[%s10806_s11 + $0x44] ss:$16 sps:$4 sm:$0xff]   ;;  %v8235_v17 = vld [vmem:[%s10806_s11 + $0x40] ss:$16 sps:$4 sm:$0xff]  }
 0x5d9   :  { %2810 = vst.msk [vmem:[#allocation5] sm:$0xff] %vm2809_vm1, %v2796_v26  ;;  %v2703_v27 = vpop.permute.xlu1 %2702  ;;  %v8232_v37 = vld [vmem:[%s10806_s11 + $0x28] ss:$16 sps:$4 sm:$0xff]   ;;  %v8236_v41 = vld [vmem:[%s10806_s11 + $0x4c] ss:$16 sps:$4 sm:$0xff]  }
 0x5da   :  { %2841 = vst.msk [vmem:[#allocation5 + $0x28] sm:$0xff] %vm2809_vm1, %v2806_v13  ;;  %v2752_v36 = vadd.f32 %v2703_v27, %v2674_v33  ;;  %v2739_v11 = vmax.f32 %v2661_v58, %v2703_v27  ;;  %v8238_v23 = vld [vmem:[%s10806_s11 + $0x48] ss:$16 sps:$4 sm:$0xff]   ;;  %v8239_v32 = vld [vmem:[%s10806_s11 + $0x64] ss:$16 sps:$4 sm:$0xff]  }
 0x5db   :  { %7355 = vmatpush3.bf16.msra.mxu1 %v6252_v31  ;;  %v8242_v26 = vld [vmem:[%s10806_s11 + $0x6c] ss:$16 sps:$4 sm:$0xff]   ;;  %v8241_v13 = vld [vmem:[%s10806_s11 + $0x60] ss:$16 sps:$4 sm:$0xff]   ;;  %v8244_v58 = vld [vmem:[%s10806_s11 + $0x68] ss:$16 sps:$4 sm:$0xff]  }
 0x5dc   :  { %v2765_v35 = vmul.f32 0.25, %v2752_v36  ;;  %7357 = vmatprep.subr.bf16.mxu1 %v6261_v42  ;;  %v5765_v36 = vld [vmem:[%s10805_s10] ss:$0 sm:$0xff]  ;;  %s8447_s10 = smov [#allocation20]  }
 0x5dd   :  { %v2844_v47 = vpop.permute.xlu1 %2843  ;;  %s5645_s11 = sshll.u32 %s8447_s10, 4  ;;  %s5646_s11 = int_to_ptr.vmem [resolvable:$true] %s5645_s11 }
 0x5de   :  { %v2778_v22 = vadd.f32 %v2765_v35, %v2739_v11  ;;  %2846 = vst.msk [vmem:[#allocation5 + $0x28] sm:$0xff] %vm2815_vm2, %v2844_v47  ;;  %s8399_s29 = scalar_lea.vmem %s5646_s11, 32  ;;  %p8404_p1 = scmp.lt.s32.totalorder %s5646_s11, %s5646_s11 }
 0x5df   :  { %7359 = vmatpush3.bf16.msra.mxu1 %v6253_v46  ;;  %p8400_p0 = scmp.ne.s32.totalorder %s5646_s11, %s8399_s29  ;;  %p8405_p2 = scmp.lt.s32.totalorder %s8399_s29, %s8399_s29 }
 0x5e0   :  { %v2798_v39 = vadd.f32 %v9605_v25, %v2778_v22  ;;  %7361 = vmatprep.subr.bf16.mxu1 %v6262_v52 }
 0x5e1   :  { %v2820_v53 = vpop.permute.xlu0 %2819  ;;  %v2619_v60 = vpop.permute.xlu1 %2618  ;;  %p8406_p3 = por %p8405_p2, %p8404_p1 }
 0x5e2   :  { %2817 = vst.msk [vmem:[#allocation5 + $0x8] sm:$0xff] %vm2809_vm1, %v2798_v39  ;;  %v2645_v61 = vmax.f32 %v9530_v38, %v2619_v60  ;;  %v2658_v54 = vadd.f32 %v2619_v60, %v9530_v38 }
 0x5e3   :  { %2822 = vst.msk [vmem:[#allocation5 + $0x8] sm:$0xff] %vm2815_vm2, %v2820_v53  ;;  %7363 = vmatpush3.bf16.msra.mxu1 %v6254_v50  ;;  %p8407_p4 = pnand %p8406_p3, %p8400_p0 }
 0x5e4   :  { %v2671_v44 = vmax.f32 %v2645_v61, %v9536_v49  ;;  %v2684_v62 = vadd.f32 %v2658_v54, %v9536_v49  ;;  %7365 = vmatprep.subr.bf16.mxu1 %v6263_v59  ;;  %v6256_v49 = vld [vmem:[%s10804_s9 + $0x130] sm:$0xff]   ;;  %v3403_v61 = vld [vmem:[#allocation19] sm:$0xf] }
 0x5e5   :  { %v2813_v28 = vpop.permute.xlu1 %2812  ;;  %v2723_v55 = vpop.permute.xlu0 %2722  ;;  %v2853_v63 = vld [vmem:[#allocation5 + $0x28] sm:$0xff]  ;;  %v3408_v54 = vrot.slane %v3403_v61, %v8636_v3  ;;  %v9893_v3 = vld [vmem:[#allocation6] sm:$0xff] }
 0x5e6   :  { %2816 = vst.msk [vmem:[#allocation5] sm:$0xff] %vm2815_vm2, %v2813_v28  ;;  %v2762_v38 = vadd.f32 %v2723_v55, %v2684_v62  ;;  %3277 = vmatprep.mubr.f32.mxu1 %v2853_v63  ;;  %v2749_v45 = vmax.f32 %v2671_v44, %v2723_v55  ;;  %v3416_v44 = vrot.slane %v3403_v61, %v8645_v6 }
 0x5e7   :  { %7367 = vmatpush3.bf16.msra.mxu1 %v6255_v34  ;;  %v3412_v62 = vrot.slane %v3403_v61, %v8642_v5  ;;  %v3420_v34 = vrot.slane %v3403_v61, %v8639_v4  ;;  %3628 = vst.msk [vmem:[#allocation7] sm:$0xff] %vm138_vm0, %v9893_v3 }
 0x5e8   :  { %v2775_v24 = vmul.f32 0.25, %v2762_v38  ;;  %7369 = vmatprep.subr.bf16.mxu1 %v6264_v48 }
 0x5ea   :  { %v2788_v0 = vadd.f32 %v2775_v24, %v2749_v45  ;;  %v2849_v20 = vld [vmem:[#allocation5 + $0x8] sm:$0xff] }
 0x5eb   :  { %3137 = vmatprep.mubr.f32.mxu0 %v2849_v20  ;;  %7371 = vmatpush3.bf16.msra.mxu1 %v6256_v49  ;;  %v6271_v20 = vld [vmem:[%s10808_s13 + $0x10] sm:$0xff]  }
 0x5ec   :  { %v2808_v16 = vadd.f32 %v9605_v25, %v2788_v0  ;;  %7373 = vmatprep.subr.bf16.mxu1 %v6265_v9  ;;  %v2852_v25 = vld [vmem:[#allocation5 + $0x20] sm:$0xff]  ;;  %v6100_v9 = vld [vmem:[%s10808_s13] sm:$0xff]   ;;  %v6270_v0 = vld [vmem:[%s10808_s13 + $0x8] sm:$0xff]  }
 0x5ed   :  { %v2848_v14 = vld [vmem:[#allocation5] sm:$0xff] }
 0x5ee   :  { %2847 = vst.msk [vmem:[#allocation5 + $0x30] sm:$0xff] %vm2809_vm1, %v2808_v16  ;;  %3138 = vmatmul.mubr.f32.vlgmr.msra.gmra.mrb[52].mxu0 %v2848_v14  ;;  %v6272_v16 = vld [vmem:[%s10808_s13 + $0x18] sm:$0xff]  }
 0x5ef   :  { %7375 = vmatpush3.bf16.msra.mxu1 %v6257_v56  ;;  %3563 = vmatprep.mubr.f32.mxu0 %v8440_v1  ;;  %v6273_v56 = vld [vmem:[%s10808_s13 + $0x20] sm:$0xff]  }
 0x5f0   :  { %7376 = vmatprep.subr.bf16.mxu1 %v8444_v21  ;;  %7407 = vmatpush1.bf16.msra.mxu0 %v8226_v43 }
 0x5f1   :  { %7409 = vmatprep.subr.bf16.mxu0 %v8230_v30 }
 0x5f2   :  { %3278 = vmatmul.mubr.f32.vlgmr.msra.gmra.mrb[54].mxu1 %v2852_v25  ;;  %v6274_v25 = vld [vmem:[%s10808_s13 + $0x28] sm:$0xff]  }
 0x5f3   :  { %7378 = vmatpush3.bf16.msra.mxu1 %v6266_v12  ;;  %6554 = vmatprep.mubr.msk.f32.mxu1 %vm8445_vm3, %v8440_v1 }
 0x5f4   :  { %7379 = vmatprep.subr.bf16.mxu1 %v8444_v21  ;;  %7411 = vmatpush1.bf16.msra.mxu0 %v8232_v37 }
 0x5f5   :  { %v2854_v57 = vld [vmem:[#allocation5 + $0x30] sm:$0xff]  ;;  %7413 = vmatprep.subr.bf16.mxu0 %v8236_v41 }
 0x5f7   :  { %7381 = vmatpush3.bf16.msra.mxu1 %v6267_v10 }
 0x5f8   :  { %7382 = vmatprep.subr.bf16.mxu1 %v8444_v21  ;;  %7415 = vmatpush1.bf16.msra.mxu0 %v8238_v23 }
 0x5f9   :  { %7417 = vmatprep.subr.bf16.mxu0 %v8242_v26 }
 0x5fb   :  { %7384 = vmatpush3.bf16.msra.mxu1 %v6268_v51 }
 0x5fc   :  { %7385 = vmatprep.subr.bf16.mxu1 %v8444_v21  ;;  %7419 = vmatpush1.bf16.msra.mxu0 %v8244_v58 }
 0x5fd   :  { %7420 = vmatprep.subr.bf16.mxu0 %v8444_v21 }
 0x5ff   :  { %7387 = vmatpush3.bf16.msra.mxu1 %v6269_v7 }
 0x600   :  { %7389 = vmatprep.subr.bf16.mxu1 %v8221_v29 }
 0x602   :  { %6555 = vmatmul.mubr.msk.f32.vlgmr.msra.gmra.mrb[56].mxu1 %vm2809_vm1, %v2854_v57 }
 0x603   :  { %3492 = vmatprep.mubr.f32.mxu1 %v8440_v1  ;;  %7391 = vmatpush1.bf16.msra.mxu1 %v8223_v19 }
 0x604   :  { %7393 = vmatprep.subr.bf16.mxu1 %v8227_v8 }
 0x607   :  { %7395 = vmatpush1.bf16.msra.mxu1 %v8229_v40 }
 0x608   :  { %7397 = vmatprep.subr.bf16.mxu1 %v8233_v18 }
 0x60b   :  { %7399 = vmatpush1.bf16.msra.mxu1 %v8235_v17 }
 0x60c   :  { %7401 = vmatprep.subr.bf16.mxu1 %v8239_v32 }
 0x60f   :  { %7403 = vmatpush1.bf16.msra.mxu1 %v8241_v13  ;;  %v9991_v13 = vld [vmem:[#allocation6 + $0x70] sm:$0xff] }
 0x610   :  { %7510 = vmatprep.subr.bf16.mxu1 %v8444_v21 }
 0x6a5   :  { %v6366_v33 = vpop.f32.mrb[52].mxu1 }
 0x6a6   :  { %v6367_v31 = vpop.f32.mrb[53].mxu1 }
 0x6a7   :  { %v6368_v27 = vadd.f32 %v6367_v31, %v6366_v33 }
 0x6c1   :  { %v6331_v42 = vpop.f32.mrb[52].mxu0 }
 0x6c2   :  { %v6332_v11 = vpop.f32.mrb[53].mxu0 }
 0x6c3   :  { %v6333_v35 = vadd.f32 %v6332_v11, %v6331_v42 }
 0x6c5   :  { %v3140_v46 = vadd.f32 %v6333_v35, %v5765_v36  ;;  %v6401_v47 = vpop.f32.mrb[54].mxu1 }
 0x6c6   :  { %v6402_v52 = vpop.f32.mrb[55].mxu1 }
 0x6c7   :  { %v6403_v22 = vadd.f32 %v6402_v52, %v6401_v47  ;;  %v3210_v39 = vadd.f32 %v6368_v27, %v3140_v46 }
 0x6c9   :  { %v3280_v50 = vadd.f32 %v6403_v22, %v3210_v39 }
 0x6d5   :  { %v3349_v53 = vpop.f32.mrb[56].mxu1 }
 0x6d6   :  { %v3350_v60 = vadd.f32 %v3349_v53, %v3280_v50  ;;  %v6556_v59 = vpop.f32.mrb[57].mxu1 }
 0x6d8   :  { %5767 = vmatmul.mubr.msk.f32.vlgmr.msra.gmra.mrb[58].mxu1 %vm2809_vm1, %v3350_v60  ;;  %5768 = vmatmul.mubr.msk.f32.vlgmr.msra.gmra.mrb[54].mxu0 %vm2809_vm1, %v3350_v60  ;;  %3354 = vst.msk [vmem:[#allocation20] sm:$0x3] %vm3353_vm4, %v3350_v60 }
 0x6d9   :  { %6581 = vmatprep.mubr.msk.f32.mxu0 %vm8445_vm3, %v8440_v1  ;;  %6599 = vmatprep.mubr.msk.f32.mxu1 %vm8445_vm3, %v8440_v1 }
 0x6da   :  { %7422 = vmatpush3.bf16.msra.mxu0 %v6100_v9  ;;  %7516 = vmatpush3.bf16.msra.mxu1 %v6100_v9 }
 0x6db   :  { %7423 = vmatprep.subr.bf16.mxu0 %v8444_v21  ;;  %7511 = vmatprep.subr.bf16.mxu1 %v8444_v21 }
 0x6de   :  { %7425 = vmatpush3.bf16.msra.mxu0 %v6270_v0  ;;  %7517 = vmatpush3.bf16.msra.mxu1 %v6270_v0 }
 0x6df   :  { %7426 = vmatprep.subr.bf16.mxu0 %v8444_v21  ;;  %7512 = vmatprep.subr.bf16.mxu1 %v8444_v21 }
 0x6e2   :  { %7428 = vmatpush3.bf16.msra.mxu0 %v6271_v20  ;;  %7518 = vmatpush3.bf16.msra.mxu1 %v6271_v20 }
 0x6e3   :  { %7429 = vmatprep.subr.bf16.mxu0 %v8444_v21  ;;  %7513 = vmatprep.subr.bf16.mxu1 %v8444_v21 }
 0x6e6   :  { %7431 = vmatpush3.bf16.msra.mxu0 %v6272_v16  ;;  %7519 = vmatpush3.bf16.msra.mxu1 %v6272_v16 }
 0x6e7   :  { %7432 = vmatprep.subr.bf16.mxu0 %v8444_v21  ;;  %7514 = vmatprep.subr.bf16.mxu1 %v8444_v21 }
 0x6ea   :  { %7434 = vmatpush3.bf16.msra.mxu0 %v6273_v56  ;;  %7520 = vmatpush3.bf16.msra.mxu1 %v6273_v56  ;;  %v6275_v56 = vld [vmem:[%s10808_s13 + $0x30] sm:$0xff]  }
 0x6eb   :  { %7435 = vmatprep.subr.bf16.mxu0 %v8444_v21  ;;  %7515 = vmatprep.subr.bf16.mxu1 %v8444_v21 }
 0x6ee   :  { %7437 = vmatpush3.bf16.msra.mxu0 %v6274_v25  ;;  %7521 = vmatpush3.bf16.msra.mxu1 %v6274_v25  ;;  %v10076_v25 = vld [vmem:[%s10809_s14] ss:$0 sm:$0xff] }
 0x6ef   :  { %7438 = vmatprep.subr.bf16.mxu0 %v8444_v21  ;;  %7456 = vmatprep.subr.bf16.mxu1 %v8444_v21 }
 0x7ab   :  { %v3494_v28 = vpop.f32.mrb[58].mxu1  ;;  %v3565_v55 = vpop.f32.mrb[54].mxu0 }
 0x7ac   :  { %v3495_v63 = vadd.f32 %v3494_v28, %v3408_v54  ;;  %v3566_v48 = vadd.f32 %v3565_v55, %v3416_v44  ;;  %v3496_v38 = vpop.f32.mrb[59].mxu1  ;;  %v3567_v45 = vpop.f32.mrb[55].mxu0 }
 0x7ad   :  { %v3497_v24 = vadd.f32 %v3496_v38, %v3412_v62  ;;  %v3568_v49 = vadd.f32 %v3567_v45, %v3420_v34 }
 0x7ae   :  { %3570 = vst.msk [vmem:[#allocation6 + $0x8] sm:$0xff] %vm138_vm0, %v3495_v63  ;;  %3598 = vst.msk [vmem:[#allocation6 + $0x48] sm:$0xff] %vm138_vm0, %v3566_v48  ;;  %3576 = vrot.lane.b32.xlu0 %v3495_v63, %s8443_s30  ;;  %3572 = vrot.lane.b32.xlu1 %v3495_v63, %s8441_s3 }
 0x7af   :  { %3584 = vst.msk [vmem:[#allocation6 + $0x28] sm:$0xff] %vm138_vm0, %v3497_v24  ;;  %3612 = vst.msk [vmem:[#allocation6 + $0x68] sm:$0xff] %vm138_vm0, %v3568_v49 }
 0x7b2   :  { %3586 = vrot.lane.b32.xlu0 %v3497_v24, %s8441_s3  ;;  %3580 = vrot.lane.b32.xlu1 %v3495_v63, %s8442_s22 }
 0x7b5   :  { %v3614_v4 = vld [vmem:[#allocation6 + $0x8] sm:$0xff] }
 0x7b6   :  { %v9899_v5 = vld [vmem:[#allocation6 + $0x48] sm:$0xff]  ;;  %3594 = vrot.lane.b32.xlu0 %v3497_v24, %s8442_s22  ;;  %3590 = vrot.lane.b32.xlu1 %v3497_v24, %s8443_s30  ;;  %3629 = vst.msk [vmem:[#allocation7 + $0x8] sm:$0xff] %vm138_vm0, %v3614_v4 }
 0x7b7   :  { %v9904_v6 = vld [vmem:[#allocation6 + $0x28] sm:$0xff]  ;;  %3637 = vst.msk [vmem:[#allocation7 + $0x48] sm:$0xff] %vm138_vm0, %v9899_v5 }
 0x7b8   :  { %3633 = vst.msk [vmem:[#allocation7 + $0x28] sm:$0xff] %vm138_vm0, %v9904_v6  ;;  %v3626_v26 = vld [vmem:[#allocation6 + $0x68] sm:$0xff] }
 0x7ba   :  { %3604 = vrot.lane.b32.xlu0 %v3566_v48, %s8443_s30  ;;  %3600 = vrot.lane.b32.xlu1 %v3566_v48, %s8441_s3 }
 0x7be   :  { %3608 = vrot.lane.b32.xlu1 %v3566_v48, %s8442_s22  ;;  %3654 = vrot.lane.b32.xlu0 %v3614_v4, %s8442_s22 }
 0x820   :  { %v3577_v14 = vpop.permute.xlu0 %3576  ;;  %v3573_v12 = vpop.permute.xlu1 %3572 }
 0x821   :  { %3579 = vst.msk [vmem:[#allocation6 + $0x18] sm:$0xff] %vm138_vm0, %v3577_v14  ;;  %3575 = vst.msk [vmem:[#allocation6 + $0x10] sm:$0xff] %vm138_vm0, %v3573_v12  ;;  %v6276_v14 = vld [vmem:[%s10808_s13 + $0x38] sm:$0xff]   ;;  %v6277_v12 = vld [vmem:[%s10808_s13 + $0x40] sm:$0xff]  }
 0x824   :  { %v3587_v10 = vpop.permute.xlu0 %3586  ;;  %v3581_v51 = vpop.permute.xlu1 %3580 }
 0x825   :  { %3589 = vst.msk [vmem:[#allocation6 + $0x30] sm:$0xff] %vm138_vm0, %v3587_v10  ;;  %3583 = vst.msk [vmem:[#allocation6 + $0x20] sm:$0xff] %vm138_vm0, %v3581_v51  ;;  %v6278_v51 = vld [vmem:[%s10808_s13 + $0x48] sm:$0xff]  }
 0x828   :  { %v3595_v7 = vpop.permute.xlu0 %3594  ;;  %v3591_v57 = vpop.permute.xlu1 %3590  ;;  %v3615_v29 = vld [vmem:[#allocation6 + $0x10] sm:$0xff]  ;;  %v3616_v15 = vld [vmem:[#allocation6 + $0x18] sm:$0xff] }
 0x829   :  { %3597 = vst.msk [vmem:[#allocation6 + $0x40] sm:$0xff] %vm138_vm0, %v3595_v7  ;;  %3593 = vst.msk [vmem:[#allocation6 + $0x38] sm:$0xff] %vm138_vm0, %v3591_v57  ;;  %3708 = vrot.lane.b32.xlu1 %v3615_v29, %s8443_s30  ;;  %3656 = vrot.lane.b32.xlu0 %v3615_v29, %s8442_s22 }
 0x82a   :  { %3630 = vst.msk [vmem:[#allocation7 + $0x10] sm:$0xff] %vm138_vm0, %v3615_v29  ;;  %3631 = vst.msk [vmem:[#allocation7 + $0x18] sm:$0xff] %vm138_vm0, %v3616_v15 }
 0x82c   :  { %v3605_v19 = vpop.permute.xlu0 %3604  ;;  %v3601_v43 = vpop.permute.xlu1 %3600  ;;  %v3617_v8 = vld [vmem:[#allocation6 + $0x20] sm:$0xff]  ;;  %v3619_v30 = vld [vmem:[#allocation6 + $0x30] sm:$0xff] }
 0x82d   :  { %3607 = vst.msk [vmem:[#allocation6 + $0x58] sm:$0xff] %vm138_vm0, %v3605_v19  ;;  %3603 = vst.msk [vmem:[#allocation6 + $0x50] sm:$0xff] %vm138_vm0, %v3601_v43  ;;  %3710 = vrot.lane.b32.xlu1 %v3616_v15, %s8443_s30  ;;  %3658 = vrot.lane.b32.xlu0 %v3616_v15, %s8442_s22  ;;  %v6279_v19 = vld [vmem:[%s10808_s13 + $0x50] sm:$0xff]  }
 0x82e   :  { %3632 = vst.msk [vmem:[#allocation7 + $0x20] sm:$0xff] %vm138_vm0, %v3617_v8  ;;  %3634 = vst.msk [vmem:[#allocation7 + $0x30] sm:$0xff] %vm138_vm0, %v3619_v30 }
 0x830   :  { %v3609_v40 = vpop.permute.xlu1 %3608  ;;  %v3655_v37 = vpop.permute.xlu0 %3654  ;;  %v3620_v18 = vld [vmem:[#allocation6 + $0x38] sm:$0xff]  ;;  %v3621_v41 = vld [vmem:[#allocation6 + $0x40] sm:$0xff] }
 0x831   :  { %3611 = vst.msk [vmem:[#allocation6 + $0x60] sm:$0xff] %vm138_vm0, %v3609_v40  ;;  %3712 = vrot.lane.b32.xlu1 %v3617_v8, %s8443_s30  ;;  %3660 = vrot.lane.b32.xlu0 %v3617_v8, %s8442_s22  ;;  %3635 = vst.msk [vmem:[#allocation7 + $0x38] sm:$0xff] %vm138_vm0, %v3620_v18 }
 0x832   :  { %3694 = vst.msk [vmem:[#allocation7] sm:$0xff] %vm3693_vm5, %v3655_v37  ;;  %v6280_v37 = vld [vmem:[%s10808_s13 + $0x58] sm:$0xff]  }
 0x833   :  { %3636 = vst.msk [vmem:[#allocation7 + $0x40] sm:$0xff] %vm138_vm0, %v3621_v41 }
 0x834   :  { %v3623_v17 = vld [vmem:[#allocation6 + $0x50] sm:$0xff]  ;;  %v3624_v23 = vld [vmem:[#allocation6 + $0x58] sm:$0xff] }
 0x835   :  { %3714 = vrot.lane.b32.xlu1 %v9904_v6, %s8443_s30  ;;  %3662 = vrot.lane.b32.xlu0 %v9904_v6, %s8442_s22  ;;  %3638 = vst.msk [vmem:[#allocation7 + $0x50] sm:$0xff] %vm138_vm0, %v3623_v17  ;;  %3639 = vst.msk [vmem:[#allocation7 + $0x58] sm:$0xff] %vm138_vm0, %v3624_v23 }
 0x838   :  { %v3625_v32 = vld [vmem:[#allocation6 + $0x60] sm:$0xff] }
 0x839   :  { %3716 = vrot.lane.b32.xlu1 %v3619_v30, %s8443_s30  ;;  %3664 = vrot.lane.b32.xlu0 %v3619_v30, %s8442_s22  ;;  %3640 = vst.msk [vmem:[#allocation7 + $0x60] sm:$0xff] %vm138_vm0, %v3625_v32 }
 0x83d   :  { %3718 = vrot.lane.b32.xlu1 %v3620_v18, %s8443_s30  ;;  %3666 = vrot.lane.b32.xlu0 %v3620_v18, %s8442_s22 }
 0x841   :  { %3720 = vrot.lane.b32.xlu1 %v3621_v41, %s8443_s30  ;;  %3668 = vrot.lane.b32.xlu0 %v3621_v41, %s8442_s22 }
 0x845   :  { %3722 = vrot.lane.b32.xlu1 %v9899_v5, %s8443_s30  ;;  %3670 = vrot.lane.b32.xlu0 %v9899_v5, %s8442_s22 }
 0x849   :  { %3724 = vrot.lane.b32.xlu1 %v3623_v17, %s8443_s30  ;;  %3672 = vrot.lane.b32.xlu0 %v3623_v17, %s8442_s22 }
 0x84d   :  { %3726 = vrot.lane.b32.xlu1 %v3624_v23, %s8443_s30  ;;  %3674 = vrot.lane.b32.xlu0 %v3624_v23, %s8442_s22 }
 0x851   :  { %3728 = vrot.lane.b32.xlu1 %v3625_v32, %s8443_s30  ;;  %3676 = vrot.lane.b32.xlu0 %v3625_v32, %s8442_s22 }
 0x855   :  { %3730 = vrot.lane.b32.xlu1 %v3626_v26, %s8443_s30  ;;  %3678 = vrot.lane.b32.xlu0 %v3626_v26, %s8442_s22 }
 0x859   :  { %3732 = vrot.lane.b32.xlu1 %v9991_v13, %s8443_s30 }
 0x89b   :  { %v3709_v58 = vpop.permute.xlu1 %3708  ;;  %v3657_v33 = vpop.permute.xlu0 %3656 }
 0x89c   :  { %3748 = vst.msk [vmem:[#allocation7] sm:$0xff] %vm3747_vm6, %v3709_v58 }
 0x89d   :  { %3695 = vst.msk [vmem:[#allocation7 + $0x8] sm:$0xff] %vm3693_vm5, %v3657_v33 }
 0x89f   :  { %v3711_v31 = vpop.permute.xlu1 %3710  ;;  %v3659_v27 = vpop.permute.xlu0 %3658 }
 0x8a0   :  { %3749 = vst.msk [vmem:[#allocation7 + $0x8] sm:$0xff] %vm3747_vm6, %v3711_v31 }
 0x8a1   :  { %3696 = vst.msk [vmem:[#allocation7 + $0x10] sm:$0xff] %vm3693_vm5, %v3659_v27 }
 0x8a3   :  { %v3713_v42 = vpop.permute.xlu1 %3712  ;;  %v3661_v36 = vpop.permute.xlu0 %3660  ;;  %v3761_v11 = vld [vmem:[#allocation7] sm:$0xff] }
 0x8a4   :  { %3750 = vst.msk [vmem:[#allocation7 + $0x10] sm:$0xff] %vm3747_vm6, %v3713_v42  ;;  %6582 = vmatmul.mubr.msk.f32.vlgmr.msra.gmra.mrb[56].mxu0 %vm3805_vm7, %v3761_v11 }
 0x8a5   :  { %3697 = vst.msk [vmem:[#allocation7 + $0x18] sm:$0xff] %vm3693_vm5, %v3661_v36  ;;  %6584 = vmatprep.mubr.msk.f32.mxu0 %vm8445_vm3, %v8440_v1  ;;  %7440 = vmatpush3.bf16.msra.mxu0 %v6275_v56 }
 0x8a6   :  { %4016 = vst.msk [vmem:[#allocation7] sm:$0xff] %vm138_vm0, %v9893_v3  ;;  %7441 = vmatprep.subr.bf16.mxu0 %v8444_v21 }
 0x8a7   :  { %v3715_v35 = vpop.permute.xlu1 %3714  ;;  %v3663_v46 = vpop.permute.xlu0 %3662  ;;  %v3762_v47 = vld [vmem:[#allocation7 + $0x8] sm:$0xff] }
 0x8a8   :  { %3751 = vst.msk [vmem:[#allocation7 + $0x18] sm:$0xff] %vm3747_vm6, %v3715_v35  ;;  %6585 = vmatmul.mubr.msk.f32.gmra.mrb[58].mxu0 %vm3805_vm7, %v3762_v47 }
 0x8a9   :  { %3698 = vst.msk [vmem:[#allocation7 + $0x20] sm:$0xff] %vm3693_vm5, %v3663_v46  ;;  %6587 = vmatprep.mubr.msk.f32.mxu0 %vm8445_vm3, %v8440_v1  ;;  %7443 = vmatpush3.bf16.msra.mxu0 %v6276_v14 }
 0x8aa   :  { %7444 = vmatprep.subr.bf16.mxu0 %v8444_v21 }
 0x8ab   :  { %v3717_v52 = vpop.permute.xlu1 %3716  ;;  %v3665_v22 = vpop.permute.xlu0 %3664  ;;  %v3763_v39 = vld [vmem:[#allocation7 + $0x10] sm:$0xff] }
 0x8ac   :  { %3752 = vst.msk [vmem:[#allocation7 + $0x20] sm:$0xff] %vm3747_vm6, %v3717_v52  ;;  %6588 = vmatmul.mubr.msk.f32.gmra.mrb[60].mxu0 %vm3805_vm7, %v3763_v39 }
 0x8ad   :  { %3699 = vst.msk [vmem:[#allocation7 + $0x28] sm:$0xff] %vm3693_vm5, %v3665_v22  ;;  %6590 = vmatprep.mubr.msk.f32.mxu0 %vm8445_vm3, %v8440_v1  ;;  %7446 = vmatpush3.bf16.msra.mxu0 %v6277_v12 }
 0x8ae   :  { %7447 = vmatprep.subr.bf16.mxu0 %v8444_v21 }
 0x8af   :  { %v3719_v50 = vpop.permute.xlu1 %3718  ;;  %v3667_v53 = vpop.permute.xlu0 %3666  ;;  %v3764_v60 = vld [vmem:[#allocation7 + $0x18] sm:$0xff] }
 0x8b0   :  { %3753 = vst.msk [vmem:[#allocation7 + $0x28] sm:$0xff] %vm3747_vm6, %v3719_v50  ;;  %6591 = vmatmul.mubr.msk.f32.gmra.mrb[62].mxu0 %vm3805_vm7, %v3764_v60 }
 0x8b1   :  { %3700 = vst.msk [vmem:[#allocation7 + $0x30] sm:$0xff] %vm3693_vm5, %v3667_v53  ;;  %6593 = vmatprep.mubr.msk.f32.mxu0 %vm8445_vm3, %v8440_v1  ;;  %7449 = vmatpush3.bf16.msra.mxu0 %v6278_v51 }
 0x8b2   :  { %7450 = vmatprep.subr.bf16.mxu0 %v8444_v21 }
 0x8b3   :  { %v3721_v59 = vpop.permute.xlu1 %3720  ;;  %v3669_v61 = vpop.permute.xlu0 %3668  ;;  %v3765_v54 = vld [vmem:[#allocation7 + $0x20] sm:$0xff] }
 0x8b4   :  { %3754 = vst.msk [vmem:[#allocation7 + $0x30] sm:$0xff] %vm3747_vm6, %v3721_v59  ;;  %6594 = vmatmul.mubr.msk.f32.gmra.mrb[64].mxu0 %vm3805_vm7, %v3765_v54 }
 0x8b5   :  { %3701 = vst.msk [vmem:[#allocation7 + $0x38] sm:$0xff] %vm3693_vm5, %v3669_v61  ;;  %6596 = vmatprep.mubr.msk.f32.mxu0 %vm8445_vm3, %v8440_v1  ;;  %7452 = vmatpush3.bf16.msra.mxu0 %v6279_v19 }
 0x8b6   :  { %7453 = vmatprep.subr.bf16.mxu0 %v8444_v21 }
 0x8b7   :  { %v3723_v44 = vpop.permute.xlu1 %3722  ;;  %v3671_v62 = vpop.permute.xlu0 %3670  ;;  %v3766_v34 = vld [vmem:[#allocation7 + $0x28] sm:$0xff] }
 0x8b8   :  { %3755 = vst.msk [vmem:[#allocation7 + $0x38] sm:$0xff] %vm3747_vm6, %v3723_v44  ;;  %6597 = vmatmul.mubr.msk.f32.gmra.mrb[66].mxu0 %vm3805_vm7, %v3766_v34 }
 0x8b9   :  { %3702 = vst.msk [vmem:[#allocation7 + $0x40] sm:$0xff] %vm3693_vm5, %v3671_v62  ;;  %6644 = vmatprep.mubr.msk.f32.mxu0 %vm8445_vm3, %v8440_v1  ;;  %7455 = vmatpush3.bf16.msra.mxu0 %v6280_v37 }
 0x8ba   :  { %7474 = vmatprep.subr.bf16.mxu0 %v8444_v21 }
 0x8bb   :  { %v3725_v28 = vpop.permute.xlu1 %3724  ;;  %v3673_v55 = vpop.permute.xlu0 %3672  ;;  %v3767_v63 = vld [vmem:[#allocation7 + $0x30] sm:$0xff] }
 0x8bc   :  { %3756 = vst.msk [vmem:[#allocation7 + $0x40] sm:$0xff] %vm3747_vm6, %v3725_v28  ;;  %6600 = vmatmul.mubr.msk.f32.vlgmr.msra.gmra.mrb[60].mxu1 %vm3805_vm7, %v3767_v63 }
 0x8bd   :  { %3703 = vst.msk [vmem:[#allocation7 + $0x48] sm:$0xff] %vm3693_vm5, %v3673_v55  ;;  %6602 = vmatprep.mubr.msk.f32.mxu1 %vm8445_vm3, %v8440_v1 }
 0x8bf   :  { %v3727_v48 = vpop.permute.xlu1 %3726  ;;  %v3675_v38 = vpop.permute.xlu0 %3674  ;;  %v3768_v45 = vld [vmem:[#allocation7 + $0x38] sm:$0xff] }
 0x8c0   :  { %3757 = vst.msk [vmem:[#allocation7 + $0x48] sm:$0xff] %vm3747_vm6, %v3727_v48  ;;  %6603 = vmatmul.mubr.msk.f32.gmra.mrb[62].mxu1 %vm3805_vm7, %v3768_v45 }
 0x8c1   :  { %3704 = vst.msk [vmem:[#allocation7 + $0x50] sm:$0xff] %vm3693_vm5, %v3675_v38  ;;  %6605 = vmatprep.mubr.msk.f32.mxu1 %vm8445_vm3, %v8440_v1 }
 0x8c3   :  { %v3729_v24 = vpop.permute.xlu1 %3728  ;;  %v3677_v49 = vpop.permute.xlu0 %3676  ;;  %v3769_v3 = vld [vmem:[#allocation7 + $0x40] sm:$0xff] }
 0x8c4   :  { %3758 = vst.msk [vmem:[#allocation7 + $0x50] sm:$0xff] %vm3747_vm6, %v3729_v24  ;;  %6606 = vmatmul.mubr.msk.f32.gmra.mrb[64].mxu1 %vm3805_vm7, %v3769_v3 }
 0x8c5   :  { %3705 = vst.msk [vmem:[#allocation7 + $0x58] sm:$0xff] %vm3693_vm5, %v3677_v49  ;;  %6608 = vmatprep.mubr.msk.f32.mxu1 %vm8445_vm3, %v8440_v1 }
 0x8c7   :  { %v3731_v4 = vpop.permute.xlu1 %3730  ;;  %v3679_v5 = vpop.permute.xlu0 %3678  ;;  %v3770_v6 = vld [vmem:[#allocation7 + $0x48] sm:$0xff] }
 0x8c8   :  { %3759 = vst.msk [vmem:[#allocation7 + $0x58] sm:$0xff] %vm3747_vm6, %v3731_v4  ;;  %6609 = vmatmul.mubr.msk.f32.gmra.mrb[66].mxu1 %vm3805_vm7, %v3770_v6 }
 0x8c9   :  { %3706 = vst.msk [vmem:[#allocation7 + $0x60] sm:$0xff] %vm3693_vm5, %v3679_v5  ;;  %6611 = vmatprep.mubr.msk.f32.mxu1 %vm8445_vm3, %v8440_v1 }
 0x8cb   :  { %v3733_v9 = vpop.permute.xlu1 %3732  ;;  %v3771_v0 = vld [vmem:[#allocation7 + $0x50] sm:$0xff] }
 0x8cc   :  { %3760 = vst.msk [vmem:[#allocation7 + $0x60] sm:$0xff] %vm3747_vm6, %v3733_v9  ;;  %6612 = vmatmul.mubr.msk.f32.gmra.mrb[68].mxu1 %vm3805_vm7, %v3771_v0 }
 0x8cd   :  { %6614 = vmatprep.mubr.msk.f32.mxu1 %vm8445_vm3, %v8440_v1 }
 0x8cf   :  { %v3772_v20 = vld [vmem:[#allocation7 + $0x58] sm:$0xff] }
 0x8d0   :  { %6615 = vmatmul.mubr.msk.f32.gmra.mrb[70].mxu1 %vm3805_vm7, %v3772_v20 }
 0x8d1   :  { %6617 = vmatprep.mubr.msk.f32.mxu1 %vm8445_vm3, %v8440_v1 }
 0x8d3   :  { %v3773_v16 = vld [vmem:[#allocation7 + $0x60] sm:$0xff] }
 0x8d4   :  { %6618 = vmatmul.mubr.msk.f32.gmra.mrb[72].mxu1 %vm3805_vm7, %v3773_v16 }
 0x8d5   :  { %6707 = vmatprep.mubr.msk.f32.mxu1 %vm8445_vm3, %v8440_v1 }
 0x977   :  { %v3911_v10 = vpop.f32.mrb[56].mxu0 }
 0x978   :  { %v3912_v7 = vadd.f32 %v10076_v25, %v3911_v10  ;;  %v6583_v57 = vpop.f32.mrb[57].mxu0 }
 0x97a   :  { %v3975_v29 = vmax.f32 %v3912_v7, 0.0 }
 0x97b   :  { %v3916_v15 = vpop.f32.mrb[58].mxu0 }
 0x97c   :  { %3988 = vst.msk [vmem:[#allocation6 + $0x8] sm:$0xff] %vm138_vm0, %v3975_v29  ;;  %v3917_v43 = vadd.f32 %v10076_v25, %v3916_v15  ;;  %v6586_v8 = vpop.f32.mrb[59].mxu0 }
 0x97e   :  { %v3976_v30 = vmax.f32 %v3917_v43, 0.0 }
 0x97f   :  { %v3921_v40 = vpop.f32.mrb[60].mxu0 }
 0x980   :  { %3989 = vst.msk [vmem:[#allocation6 + $0x10] sm:$0xff] %vm138_vm0, %v3976_v30  ;;  %v3922_v18 = vadd.f32 %v10076_v25, %v3921_v40  ;;  %v6589_v41 = vpop.f32.mrb[61].mxu0 }
 0x982   :  { %v3977_v17 = vmax.f32 %v3922_v18, 0.0 }
 0x983   :  { %v3926_v23 = vpop.f32.mrb[62].mxu0  ;;  %v4002_v32 = vld [vmem:[#allocation6 + $0x8] sm:$0xff] }
 0x984   :  { %3990 = vst.msk [vmem:[#allocation6 + $0x18] sm:$0xff] %vm138_vm0, %v3977_v17  ;;  %v3927_v26 = vadd.f32 %v10076_v25, %v3926_v23  ;;  %4042 = vrot.lane.b32.xlu0 %v4002_v32, %s8442_s22  ;;  %4017 = vst.msk [vmem:[#allocation7 + $0x8] sm:$0xff] %vm138_vm0, %v4002_v32  ;;  %v6592_v58 = vpop.f32.mrb[63].mxu0 }
 0x986   :  { %v3978_v33 = vmax.f32 %v3927_v26, 0.0 }
 0x987   :  { %v3931_v31 = vpop.f32.mrb[64].mxu0  ;;  %v4003_v27 = vld [vmem:[#allocation6 + $0x10] sm:$0xff] }
 0x988   :  { %3991 = vst.msk [vmem:[#allocation6 + $0x20] sm:$0xff] %vm138_vm0, %v3978_v33  ;;  %v3932_v42 = vadd.f32 %v10076_v25, %v3931_v31  ;;  %4044 = vrot.lane.b32.xlu0 %v4003_v27, %s8442_s22  ;;  %4018 = vst.msk [vmem:[#allocation7 + $0x10] sm:$0xff] %vm138_vm0, %v4003_v27  ;;  %4095 = vrot.lane.b32.xlu1 %v4003_v27, %s8443_s30  ;;  %v6595_v36 = vpop.f32.mrb[65].mxu0 }
 0x98a   :  { %v3979_v11 = vmax.f32 %v3932_v42, 0.0 }
 0x98b   :  { %v3936_v35 = vpop.f32.mrb[66].mxu0  ;;  %v4004_v46 = vld [vmem:[#allocation6 + $0x18] sm:$0xff] }
 0x98c   :  { %3992 = vst.msk [vmem:[#allocation6 + $0x28] sm:$0xff] %vm138_vm0, %v3979_v11  ;;  %v3937_v47 = vadd.f32 %v10076_v25, %v3936_v35  ;;  %4046 = vrot.lane.b32.xlu0 %v4004_v46, %s8442_s22  ;;  %4019 = vst.msk [vmem:[#allocation7 + $0x18] sm:$0xff] %vm138_vm0, %v4004_v46  ;;  %4097 = vrot.lane.b32.xlu1 %v4004_v46, %s8443_s30  ;;  %v6598_v52 = vpop.f32.mrb[67].mxu0 }
 0x98e   :  { %v3980_v22 = vmax.f32 %v3937_v47, 0.0 }
 0x98f   :  { %v3941_v39 = vpop.f32.mrb[60].mxu1  ;;  %v4005_v50 = vld [vmem:[#allocation6 + $0x20] sm:$0xff] }
 0x990   :  { %3993 = vst.msk [vmem:[#allocation6 + $0x30] sm:$0xff] %vm138_vm0, %v3980_v22  ;;  %v3942_v53 = vadd.f32 %v10076_v25, %v3941_v39  ;;  %v6601_v60 = vpop.f32.mrb[61].mxu1  ;;  %4048 = vrot.lane.b32.xlu0 %v4005_v50, %s8442_s22  ;;  %4020 = vst.msk [vmem:[#allocation7 + $0x20] sm:$0xff] %vm138_vm0, %v4005_v50  ;;  %4099 = vrot.lane.b32.xlu1 %v4005_v50, %s8443_s30 }
 0x992   :  { %v3981_v59 = vmax.f32 %v3942_v53, 0.0 }
 0x993   :  { %v3946_v61 = vpop.f32.mrb[62].mxu1  ;;  %v4006_v54 = vld [vmem:[#allocation6 + $0x28] sm:$0xff] }
 0x994   :  { %3994 = vst.msk [vmem:[#allocation6 + $0x38] sm:$0xff] %vm138_vm0, %v3981_v59  ;;  %v3947_v44 = vadd.f32 %v10076_v25, %v3946_v61  ;;  %v6604_v62 = vpop.f32.mrb[63].mxu1  ;;  %4050 = vrot.lane.b32.xlu0 %v4006_v54, %s8442_s22  ;;  %4021 = vst.msk [vmem:[#allocation7 + $0x28] sm:$0xff] %vm138_vm0, %v4006_v54  ;;  %4101 = vrot.lane.b32.xlu1 %v4006_v54, %s8443_s30 }
 0x996   :  { %v3982_v34 = vmax.f32 %v3947_v44, 0.0 }
 0x997   :  { %v3951_v28 = vpop.f32.mrb[64].mxu1  ;;  %v4007_v55 = vld [vmem:[#allocation6 + $0x30] sm:$0xff] }
 0x998   :  { %3995 = vst.msk [vmem:[#allocation6 + $0x40] sm:$0xff] %vm138_vm0, %v3982_v34  ;;  %v3952_v63 = vadd.f32 %v10076_v25, %v3951_v28  ;;  %v6607_v48 = vpop.f32.mrb[65].mxu1  ;;  %4052 = vrot.lane.b32.xlu0 %v4007_v55, %s8442_s22  ;;  %4022 = vst.msk [vmem:[#allocation7 + $0x30] sm:$0xff] %vm138_vm0, %v4007_v55  ;;  %4103 = vrot.lane.b32.xlu1 %v4007_v55, %s8443_s30 }
 0x99a   :  { %v3983_v38 = vmax.f32 %v3952_v63, 0.0 }
 0x99b   :  { %v3956_v45 = vpop.f32.mrb[66].mxu1  ;;  %v4008_v24 = vld [vmem:[#allocation6 + $0x38] sm:$0xff] }
 0x99c   :  { %3996 = vst.msk [vmem:[#allocation6 + $0x48] sm:$0xff] %vm138_vm0, %v3983_v38  ;;  %v3957_v49 = vadd.f32 %v10076_v25, %v3956_v45  ;;  %v6610_v3 = vpop.f32.mrb[67].mxu1  ;;  %4054 = vrot.lane.b32.xlu0 %v4008_v24, %s8442_s22  ;;  %4023 = vst.msk [vmem:[#allocation7 + $0x38] sm:$0xff] %vm138_vm0, %v4008_v24  ;;  %4105 = vrot.lane.b32.xlu1 %v4008_v24, %s8443_s30 }
 0x99d   :  { %v10223_v3 = vld [vmem:[#allocation6] sm:$0xff] }
 0x99e   :  { %v3984_v4 = vmax.f32 %v3957_v49, 0.0  ;;  %v6281_v49 = vld [vmem:[%s10808_s13 + $0x60] sm:$0xff]  }
 0x99f   :  { %v3961_v5 = vpop.f32.mrb[68].mxu1  ;;  %v4009_v6 = vld [vmem:[#allocation6 + $0x40] sm:$0xff]  ;;  %7458 = vmatpush3.bf16.msra.mxu1 %v6281_v49 }
 0x9a0   :  { %3997 = vst.msk [vmem:[#allocation6 + $0x50] sm:$0xff] %vm138_vm0, %v3984_v4  ;;  %v3962_v9 = vadd.f32 %v10076_v25, %v3961_v5  ;;  %v6613_v0 = vpop.f32.mrb[69].mxu1  ;;  %4056 = vrot.lane.b32.xlu0 %v4009_v6, %s8442_s22  ;;  %4024 = vst.msk [vmem:[#allocation7 + $0x40] sm:$0xff] %vm138_vm0, %v4009_v6  ;;  %4107 = vrot.lane.b32.xlu1 %v4009_v6, %s8443_s30  ;;  %v6282_v4 = vld [vmem:[%s10808_s13 + $0x68] sm:$0xff]   ;;  %v6283_v5 = vld [vmem:[%s10808_s13 + $0x70] sm:$0xff]  }
 0x9a1   :  { %7459 = vmatprep.subr.bf16.mxu1 %v8444_v21  ;;  %v6284_v6 = vld [vmem:[%s10808_s13 + $0x78] sm:$0xff]  }
 0x9a2   :  { %v3985_v20 = vmax.f32 %v3962_v9, 0.0  ;;  %v10243_v9 = vld [vmem:[%s10809_s14 + $0x1] ss:$0 sm:$0xff] }
 0x9a3   :  { %v3966_v16 = vpop.f32.mrb[70].mxu1  ;;  %v4010_v56 = vld [vmem:[#allocation6 + $0x48] sm:$0xff]  ;;  %7461 = vmatpush3.bf16.msra.mxu1 %v6282_v4 }
 0x9a4   :  { %3998 = vst.msk [vmem:[#allocation6 + $0x58] sm:$0xff] %vm138_vm0, %v3985_v20  ;;  %v3967_v14 = vadd.f32 %v10076_v25, %v3966_v16  ;;  %v6616_v12 = vpop.f32.mrb[71].mxu1  ;;  %4058 = vrot.lane.b32.xlu0 %v4010_v56, %s8442_s22  ;;  %4025 = vst.msk [vmem:[#allocation7 + $0x48] sm:$0xff] %vm138_vm0, %v4010_v56  ;;  %4109 = vrot.lane.b32.xlu1 %v4010_v56, %s8443_s30  ;;  %v6285_v20 = vld [vmem:[%s10808_s13 + $0x80] sm:$0xff]  }
 0x9a5   :  { %7462 = vmatprep.subr.bf16.mxu1 %v8444_v21 }
 0x9a6   :  { %v3986_v10 = vmax.f32 %v3967_v14, 0.0 }
 0x9a7   :  { %v3971_v51 = vpop.f32.mrb[72].mxu1  ;;  %v4011_v7 = vld [vmem:[#allocation6 + $0x50] sm:$0xff]  ;;  %7464 = vmatpush3.bf16.msra.mxu1 %v6283_v5 }
 0x9a8   :  { %3999 = vst.msk [vmem:[#allocation6 + $0x60] sm:$0xff] %vm138_vm0, %v3986_v10  ;;  %v3972_v57 = vadd.f32 %v10076_v25, %v3971_v51  ;;  %v6619_v29 = vpop.f32.mrb[73].mxu1  ;;  %4060 = vrot.lane.b32.xlu0 %v4011_v7, %s8442_s22  ;;  %4026 = vst.msk [vmem:[#allocation7 + $0x50] sm:$0xff] %vm138_vm0, %v4011_v7  ;;  %4111 = vrot.lane.b32.xlu1 %v4011_v7, %s8443_s30 }
 0x9a9   :  { %7465 = vmatprep.subr.bf16.mxu1 %v8444_v21  ;;  %v6286_v29 = vld [vmem:[%s10808_s13 + $0x88] sm:$0xff]  }
 0x9aa   :  { %v3987_v15 = vmax.f32 %v3972_v57, 0.0 }
 0x9ab   :  { %v4012_v19 = vld [vmem:[#allocation6 + $0x58] sm:$0xff]  ;;  %7467 = vmatpush3.bf16.msra.mxu1 %v6284_v6 }
 0x9ac   :  { %4000 = vst.msk [vmem:[#allocation6 + $0x68] sm:$0xff] %vm138_vm0, %v3987_v15  ;;  %4062 = vrot.lane.b32.xlu0 %v4012_v19, %s8442_s22  ;;  %4027 = vst.msk [vmem:[#allocation7 + $0x58] sm:$0xff] %vm138_vm0, %v4012_v19  ;;  %4113 = vrot.lane.b32.xlu1 %v4012_v19, %s8443_s30 }
 0x9ad   :  { %7468 = vmatprep.subr.bf16.mxu1 %v8444_v21 }
 0x9af   :  { %v4013_v43 = vld [vmem:[#allocation6 + $0x60] sm:$0xff]  ;;  %7470 = vmatpush3.bf16.msra.mxu1 %v6285_v20 }
 0x9b0   :  { %4064 = vrot.lane.b32.xlu0 %v4013_v43, %s8442_s22  ;;  %4028 = vst.msk [vmem:[#allocation7 + $0x60] sm:$0xff] %vm138_vm0, %v4013_v43  ;;  %4115 = vrot.lane.b32.xlu1 %v4013_v43, %s8443_s30 }
 0x9b1   :  { %7471 = vmatprep.subr.bf16.mxu1 %v8444_v21 }
 0x9b3   :  { %v4014_v25 = vld [vmem:[#allocation6 + $0x68] sm:$0xff]  ;;  %7473 = vmatpush3.bf16.msra.mxu1 %v6286_v29 }
 0x9b4   :  { %4066 = vrot.lane.b32.xlu0 %v4014_v25, %s8442_s22  ;;  %4117 = vrot.lane.b32.xlu1 %v4014_v25, %s8443_s30 }
 0x9b5   :  { %7492 = vmatprep.subr.bf16.mxu1 %v8444_v21 }
 0x9b8   :  { %4119 = vrot.lane.b32.xlu1 %v9991_v13, %s8443_s30 }
 0x9f6   :  { %v4043_v8 = vpop.permute.xlu0 %4042 }
 0x9f7   :  { %4081 = vst.msk [vmem:[#allocation7] sm:$0xff] %vm3693_vm5, %v4043_v8 }
 0x9fa   :  { %v4045_v30 = vpop.permute.xlu0 %4044  ;;  %v4096_v40 = vpop.permute.xlu1 %4095 }
 0x9fb   :  { %4082 = vst.msk [vmem:[#allocation7 + $0x8] sm:$0xff] %vm3693_vm5, %v4045_v30 }
 0x9fc   :  { %4134 = vst.msk [vmem:[#allocation7] sm:$0xff] %vm3747_vm6, %v4096_v40 }
 0x9fe   :  { %v4047_v37 = vpop.permute.xlu0 %4046  ;;  %v4098_v18 = vpop.permute.xlu1 %4097 }
 0x9ff   :  { %4083 = vst.msk [vmem:[#allocation7 + $0x10] sm:$0xff] %vm3693_vm5, %v4047_v37 }
 0xa00   :  { %4135 = vst.msk [vmem:[#allocation7 + $0x8] sm:$0xff] %vm3747_vm6, %v4098_v18 }
 0xa02   :  { %v4049_v41 = vpop.permute.xlu0 %4048  ;;  %v4100_v17 = vpop.permute.xlu1 %4099 }
 0xa03   :  { %v4147_v23 = vld [vmem:[#allocation7] sm:$0xff]  ;;  %4084 = vst.msk [vmem:[#allocation7 + $0x18] sm:$0xff] %vm3693_vm5, %v4049_v41 }
 0xa04   :  { %4136 = vst.msk [vmem:[#allocation7 + $0x10] sm:$0xff] %vm3747_vm6, %v4100_v17  ;;  %6645 = vmatmul.mubr.msk.f32.vlgmr.msra.gmra.mrb[68].mxu0 %vm3805_vm7, %v4147_v23 }
 0xa05   :  { %6647 = vmatprep.mubr.msk.f32.mxu0 %vm8445_vm3, %v8440_v1  ;;  %4403 = vst.msk [vmem:[#allocation7] sm:$0xff] %vm138_vm0, %v10223_v3 }
 0xa06   :  { %v4051_v32 = vpop.permute.xlu0 %4050  ;;  %v4102_v26 = vpop.permute.xlu1 %4101 }
 0xa07   :  { %v4148_v58 = vld [vmem:[#allocation7 + $0x8] sm:$0xff]  ;;  %4085 = vst.msk [vmem:[#allocation7 + $0x20] sm:$0xff] %vm3693_vm5, %v4051_v32 }
 0xa08   :  { %4137 = vst.msk [vmem:[#allocation7 + $0x18] sm:$0xff] %vm3747_vm6, %v4102_v26  ;;  %6648 = vmatmul.mubr.msk.f32.gmra.mrb[70].mxu0 %vm3805_vm7, %v4148_v58 }
 0xa09   :  { %6650 = vmatprep.mubr.msk.f32.mxu0 %vm8445_vm3, %v8440_v1 }
 0xa0a   :  { %v4053_v33 = vpop.permute.xlu0 %4052  ;;  %v4104_v31 = vpop.permute.xlu1 %4103 }
 0xa0b   :  { %v4149_v27 = vld [vmem:[#allocation7 + $0x10] sm:$0xff]  ;;  %4086 = vst.msk [vmem:[#allocation7 + $0x28] sm:$0xff] %vm3693_vm5, %v4053_v33 }
 0xa0c   :  { %4138 = vst.msk [vmem:[#allocation7 + $0x20] sm:$0xff] %vm3747_vm6, %v4104_v31  ;;  %6651 = vmatmul.mubr.msk.f32.gmra.mrb[72].mxu0 %vm3805_vm7, %v4149_v27 }
 0xa0d   :  { %6653 = vmatprep.mubr.msk.f32.mxu0 %vm8445_vm3, %v8440_v1 }
 0xa0e   :  { %v4055_v42 = vpop.permute.xlu0 %4054  ;;  %v4106_v36 = vpop.permute.xlu1 %4105 }
 0xa0f   :  { %v4150_v11 = vld [vmem:[#allocation7 + $0x18] sm:$0xff]  ;;  %4087 = vst.msk [vmem:[#allocation7 + $0x30] sm:$0xff] %vm3693_vm5, %v4055_v42 }
 0xa10   :  { %4139 = vst.msk [vmem:[#allocation7 + $0x28] sm:$0xff] %vm3747_vm6, %v4106_v36  ;;  %6654 = vmatmul.mubr.msk.f32.gmra.mrb[74].mxu0 %vm3805_vm7, %v4150_v11 }
 0xa11   :  { %6656 = vmatprep.mubr.msk.f32.mxu0 %vm8445_vm3, %v8440_v1 }
 0xa12   :  { %v4057_v35 = vpop.permute.xlu0 %4056  ;;  %v4108_v46 = vpop.permute.xlu1 %4107 }
 0xa13   :  { %v4151_v47 = vld [vmem:[#allocation7 + $0x20] sm:$0xff]  ;;  %4088 = vst.msk [vmem:[#allocation7 + $0x38] sm:$0xff] %vm3693_vm5, %v4057_v35 }
 0xa14   :  { %4140 = vst.msk [vmem:[#allocation7 + $0x30] sm:$0xff] %vm3747_vm6, %v4108_v46  ;;  %6657 = vmatmul.mubr.msk.f32.gmra.mrb[76].mxu0 %vm3805_vm7, %v4151_v47 }
 0xa15   :  { %6659 = vmatprep.mubr.msk.f32.mxu0 %vm8445_vm3, %v8440_v1 }
 0xa16   :  { %v4059_v52 = vpop.permute.xlu0 %4058  ;;  %v4110_v22 = vpop.permute.xlu1 %4109 }
 0xa17   :  { %v4152_v39 = vld [vmem:[#allocation7 + $0x28] sm:$0xff]  ;;  %4089 = vst.msk [vmem:[#allocation7 + $0x40] sm:$0xff] %vm3693_vm5, %v4059_v52 }
 0xa18   :  { %4141 = vst.msk [vmem:[#allocation7 + $0x38] sm:$0xff] %vm3747_vm6, %v4110_v22  ;;  %6660 = vmatmul.mubr.msk.f32.gmra.mrb[78].mxu0 %vm3805_vm7, %v4152_v39 }
 0xa19   :  { %6662 = vmatprep.mubr.msk.f32.mxu0 %vm8445_vm3, %v8440_v1 }
 0xa1a   :  { %v4061_v50 = vpop.permute.xlu0 %4060  ;;  %v4112_v53 = vpop.permute.xlu1 %4111 }
 0xa1b   :  { %v4153_v60 = vld [vmem:[#allocation7 + $0x30] sm:$0xff]  ;;  %4090 = vst.msk [vmem:[#allocation7 + $0x48] sm:$0xff] %vm3693_vm5, %v4061_v50 }
 0xa1c   :  { %4142 = vst.msk [vmem:[#allocation7 + $0x40] sm:$0xff] %vm3747_vm6, %v4112_v53  ;;  %6663 = vmatmul.mubr.msk.f32.gmra.mrb[80].mxu0 %vm3805_vm7, %v4153_v60 }
 0xa1d   :  { %6665 = vmatprep.mubr.msk.f32.mxu0 %vm8445_vm3, %v8440_v1 }
 0xa1e   :  { %v4063_v59 = vpop.permute.xlu0 %4062  ;;  %v4114_v61 = vpop.permute.xlu1 %4113 }
 0xa1f   :  { %v4154_v54 = vld [vmem:[#allocation7 + $0x38] sm:$0xff]  ;;  %4091 = vst.msk [vmem:[#allocation7 + $0x50] sm:$0xff] %vm3693_vm5, %v4063_v59 }
 0xa20   :  { %4143 = vst.msk [vmem:[#allocation7 + $0x48] sm:$0xff] %vm3747_vm6, %v4114_v61  ;;  %6666 = vmatmul.mubr.msk.f32.gmra.mrb[82].mxu0 %vm3805_vm7, %v4154_v54 }
 0xa21   :  { %6668 = vmatprep.mubr.msk.f32.mxu0 %vm8445_vm3, %v8440_v1 }
 0xa22   :  { %v4065_v44 = vpop.permute.xlu0 %4064  ;;  %v4116_v62 = vpop.permute.xlu1 %4115 }
 0xa23   :  { %v4155_v34 = vld [vmem:[#allocation7 + $0x40] sm:$0xff]  ;;  %4092 = vst.msk [vmem:[#allocation7 + $0x58] sm:$0xff] %vm3693_vm5, %v4065_v44 }
 0xa24   :  { %4144 = vst.msk [vmem:[#allocation7 + $0x50] sm:$0xff] %vm3747_vm6, %v4116_v62  ;;  %6669 = vmatmul.mubr.msk.f32.gmra.mrb[84].mxu0 %vm3805_vm7, %v4155_v34 }
 0xa25   :  { %6671 = vmatprep.mubr.msk.f32.mxu0 %vm8445_vm3, %v8440_v1 }
 0xa26   :  { %v4067_v28 = vpop.permute.xlu0 %4066  ;;  %v4118_v55 = vpop.permute.xlu1 %4117 }
 0xa27   :  { %v4156_v63 = vld [vmem:[#allocation7 + $0x48] sm:$0xff]  ;;  %4093 = vst.msk [vmem:[#allocation7 + $0x60] sm:$0xff] %vm3693_vm5, %v4067_v28 }
 0xa28   :  { %4145 = vst.msk [vmem:[#allocation7 + $0x58] sm:$0xff] %vm3747_vm6, %v4118_v55  ;;  %6672 = vmatmul.mubr.msk.f32.gmra.mrb[86].mxu0 %vm3805_vm7, %v4156_v63 }
 0xa29   :  { %6674 = vmatprep.mubr.msk.f32.mxu0 %vm8445_vm3, %v8440_v1 }
 0xa2a   :  { %v4120_v48 = vpop.permute.xlu1 %4119 }
 0xa2b   :  { %v4157_v38 = vld [vmem:[#allocation7 + $0x50] sm:$0xff]  ;;  %4146 = vst.msk [vmem:[#allocation7 + $0x60] sm:$0xff] %vm3747_vm6, %v4120_v48 }
 0xa2c   :  { %6675 = vmatmul.mubr.msk.f32.gmra.mrb[88].mxu0 %vm3805_vm7, %v4157_v38 }
 0xa2d   :  { %6677 = vmatprep.mubr.msk.f32.mxu0 %vm8445_vm3, %v8440_v1 }
 0xa2f   :  { %v4158_v45 = vld [vmem:[#allocation7 + $0x58] sm:$0xff] }
 0xa30   :  { %6678 = vmatmul.mubr.msk.f32.gmra.mrb[90].mxu0 %vm3805_vm7, %v4158_v45 }
 0xa31   :  { %6680 = vmatprep.mubr.msk.f32.mxu0 %vm8445_vm3, %v8440_v1 }
 0xa32   :  { %v4159_v24 = vld [vmem:[#allocation7 + $0x60] sm:$0xff] }
 0xa34   :  { %6681 = vmatmul.mubr.msk.f32.gmra.mrb[92].mxu0 %vm3805_vm7, %v4159_v24 }
 0xa35   :  { %6770 = vmatprep.mubr.msk.f32.mxu0 %vm8445_vm3, %v8440_v1 }
 0xad7   :  { %v4298_v0 = vpop.f32.mrb[68].mxu0 }
 0xad8   :  { %v4299_v16 = vadd.f32 %v10243_v9, %v4298_v0  ;;  %v6646_v56 = vpop.f32.mrb[69].mxu0 }
 0xada   :  { %v4362_v14 = vmax.f32 %v4299_v16, 0.0 }
 0xadb   :  { %v4303_v12 = vpop.f32.mrb[70].mxu0 }
 0xadc   :  { %4375 = vst.msk [vmem:[#allocation6 + $0x8] sm:$0xff] %vm138_vm0, %v4362_v14  ;;  %v4304_v10 = vadd.f32 %v10243_v9, %v4303_v12  ;;  %v6649_v51 = vpop.f32.mrb[71].mxu0 }
 0xade   :  { %v4363_v7 = vmax.f32 %v4304_v10, 0.0 }
 0xadf   :  { %v4308_v57 = vpop.f32.mrb[72].mxu0 }
 0xae0   :  { %4376 = vst.msk [vmem:[#allocation6 + $0x10] sm:$0xff] %vm138_vm0, %v4363_v7  ;;  %v4309_v15 = vadd.f32 %v10243_v9, %v4308_v57  ;;  %v6652_v19 = vpop.f32.mrb[73].mxu0 }
 0xae2   :  { %v4364_v43 = vmax.f32 %v4309_v15, 0.0 }
 0xae3   :  { %v4313_v25 = vpop.f32.mrb[74].mxu0  ;;  %v4389_v8 = vld [vmem:[#allocation6 + $0x8] sm:$0xff] }
 0xae4   :  { %4377 = vst.msk [vmem:[#allocation6 + $0x18] sm:$0xff] %vm138_vm0, %v4364_v43  ;;  %v4314_v30 = vadd.f32 %v10243_v9, %v4313_v25  ;;  %4429 = vrot.lane.b32.xlu0 %v4389_v8, %s8442_s22  ;;  %4404 = vst.msk [vmem:[#allocation7 + $0x8] sm:$0xff] %vm138_vm0, %v4389_v8  ;;  %v6655_v40 = vpop.f32.mrb[75].mxu0 }
 0xae6   :  { %v4365_v37 = vmax.f32 %v4314_v30, 0.0 }
 0xae7   :  { %v4318_v18 = vpop.f32.mrb[76].mxu0  ;;  %v4390_v41 = vld [vmem:[#allocation6 + $0x10] sm:$0xff] }
 0xae8   :  { %4378 = vst.msk [vmem:[#allocation6 + $0x20] sm:$0xff] %vm138_vm0, %v4365_v37  ;;  %v4319_v17 = vadd.f32 %v10243_v9, %v4318_v18  ;;  %4431 = vrot.lane.b32.xlu0 %v4390_v41, %s8442_s22  ;;  %4405 = vst.msk [vmem:[#allocation7 + $0x10] sm:$0xff] %vm138_vm0, %v4390_v41  ;;  %4482 = vrot.lane.b32.xlu1 %v4390_v41, %s8443_s30  ;;  %v6658_v23 = vpop.f32.mrb[77].mxu0 }
 0xaea   :  { %v4366_v32 = vmax.f32 %v4319_v17, 0.0 }
 0xaeb   :  { %v4323_v26 = vpop.f32.mrb[78].mxu0  ;;  %v4391_v58 = vld [vmem:[#allocation6 + $0x18] sm:$0xff] }
 0xaec   :  { %4379 = vst.msk [vmem:[#allocation6 + $0x28] sm:$0xff] %vm138_vm0, %v4366_v32  ;;  %v4324_v33 = vadd.f32 %v10243_v9, %v4323_v26  ;;  %4433 = vrot.lane.b32.xlu0 %v4391_v58, %s8442_s22  ;;  %4406 = vst.msk [vmem:[#allocation7 + $0x18] sm:$0xff] %vm138_vm0, %v4391_v58  ;;  %4484 = vrot.lane.b32.xlu1 %v4391_v58, %s8443_s30  ;;  %v6661_v31 = vpop.f32.mrb[79].mxu0 }
 0xaee   :  { %v4367_v27 = vmax.f32 %v4324_v33, 0.0 }
 0xaef   :  { %v4328_v42 = vpop.f32.mrb[80].mxu0  ;;  %v4392_v36 = vld [vmem:[#allocation6 + $0x20] sm:$0xff] }
 0xaf0   :  { %4380 = vst.msk [vmem:[#allocation6 + $0x30] sm:$0xff] %vm138_vm0, %v4367_v27  ;;  %v4329_v11 = vadd.f32 %v10243_v9, %v4328_v42  ;;  %4435 = vrot.lane.b32.xlu0 %v4392_v36, %s8442_s22  ;;  %4407 = vst.msk [vmem:[#allocation7 + $0x20] sm:$0xff] %vm138_vm0, %v4392_v36  ;;  %4486 = vrot.lane.b32.xlu1 %v4392_v36, %s8443_s30  ;;  %v6664_v35 = vpop.f32.mrb[81].mxu0 }
 0xaf2   :  { %v4368_v46 = vmax.f32 %v4329_v11, 0.0 }
 0xaf3   :  { %v4333_v47 = vpop.f32.mrb[82].mxu0  ;;  %v4393_v52 = vld [vmem:[#allocation6 + $0x28] sm:$0xff] }
 0xaf4   :  { %4381 = vst.msk [vmem:[#allocation6 + $0x38] sm:$0xff] %vm138_vm0, %v4368_v46  ;;  %v4334_v22 = vadd.f32 %v10243_v9, %v4333_v47  ;;  %4437 = vrot.lane.b32.xlu0 %v4393_v52, %s8442_s22  ;;  %4408 = vst.msk [vmem:[#allocation7 + $0x28] sm:$0xff] %vm138_vm0, %v4393_v52  ;;  %4488 = vrot.lane.b32.xlu1 %v4393_v52, %s8443_s30  ;;  %v6667_v39 = vpop.f32.mrb[83].mxu0 }
 0xaf6   :  { %v4369_v50 = vmax.f32 %v4334_v22, 0.0 }
 0xaf7   :  { %v4338_v53 = vpop.f32.mrb[84].mxu0  ;;  %v4394_v60 = vld [vmem:[#allocation6 + $0x30] sm:$0xff] }
 0xaf8   :  { %4382 = vst.msk [vmem:[#allocation6 + $0x40] sm:$0xff] %vm138_vm0, %v4369_v50  ;;  %v4339_v59 = vadd.f32 %v10243_v9, %v4338_v53  ;;  %4439 = vrot.lane.b32.xlu0 %v4394_v60, %s8442_s22  ;;  %4409 = vst.msk [vmem:[#allocation7 + $0x30] sm:$0xff] %vm138_vm0, %v4394_v60  ;;  %4490 = vrot.lane.b32.xlu1 %v4394_v60, %s8443_s30  ;;  %v6670_v61 = vpop.f32.mrb[85].mxu0 }
 0xafa   :  { %v4370_v54 = vmax.f32 %v4339_v59, 0.0 }
 0xafb   :  { %v4343_v44 = vpop.f32.mrb[86].mxu0  ;;  %v4395_v62 = vld [vmem:[#allocation6 + $0x38] sm:$0xff] }
 0xafc   :  { %4383 = vst.msk [vmem:[#allocation6 + $0x48] sm:$0xff] %vm138_vm0, %v4370_v54  ;;  %v4344_v34 = vadd.f32 %v10243_v9, %v4343_v44  ;;  %4441 = vrot.lane.b32.xlu0 %v4395_v62, %s8442_s22  ;;  %4410 = vst.msk [vmem:[#allocation7 + $0x38] sm:$0xff] %vm138_vm0, %v4395_v62  ;;  %4492 = vrot.lane.b32.xlu1 %v4395_v62, %s8443_s30  ;;  %v6673_v28 = vpop.f32.mrb[87].mxu0 }
 0xafd   :  { %v6288_v28 = vld [vmem:[%s10808_s13 + $0x98] sm:$0xff]  }
 0xafe   :  { %v4371_v55 = vmax.f32 %v4344_v34, 0.0  ;;  %v6287_v34 = vld [vmem:[%s10808_s13 + $0x90] sm:$0xff]  }
 0xaff   :  { %v4348_v63 = vpop.f32.mrb[88].mxu0  ;;  %v4396_v48 = vld [vmem:[#allocation6 + $0x40] sm:$0xff]  ;;  %7476 = vmatpush3.bf16.msra.mxu0 %v6287_v34 }
 0xb00   :  { %4384 = vst.msk [vmem:[#allocation6 + $0x50] sm:$0xff] %vm138_vm0, %v4371_v55  ;;  %v4349_v38 = vadd.f32 %v10243_v9, %v4348_v63  ;;  %4443 = vrot.lane.b32.xlu0 %v4396_v48, %s8442_s22  ;;  %4411 = vst.msk [vmem:[#allocation7 + $0x40] sm:$0xff] %vm138_vm0, %v4396_v48  ;;  %4494 = vrot.lane.b32.xlu1 %v4396_v48, %s8443_s30  ;;  %v6676_v45 = vpop.f32.mrb[89].mxu0  ;;  %v6289_v55 = vld [vmem:[%s10808_s13 + $0xa0] sm:$0xff]   ;;  %v6290_v63 = vld [vmem:[%s10808_s13 + $0xa8] sm:$0xff]  }
 0xb01   :  { %7477 = vmatprep.subr.bf16.mxu0 %v8444_v21  ;;  %v6291_v48 = vld [vmem:[%s10808_s13 + $0xb0] sm:$0xff]  }
 0xb02   :  { %v4372_v24 = vmax.f32 %v4349_v38, 0.0  ;;  %v10408_v38 = vld [vmem:[%s10809_s14 + $0x2] ss:$0 sm:$0xff] }
 0xb03   :  { %v4353_v49 = vpop.f32.mrb[90].mxu0  ;;  %v4397_v4 = vld [vmem:[#allocation6 + $0x48] sm:$0xff]  ;;  %7479 = vmatpush3.bf16.msra.mxu0 %v6288_v28 }
 0xb04   :  { %4385 = vst.msk [vmem:[#allocation6 + $0x58] sm:$0xff] %vm138_vm0, %v4372_v24  ;;  %v4354_v5 = vadd.f32 %v10243_v9, %v4353_v49  ;;  %4445 = vrot.lane.b32.xlu0 %v4397_v4, %s8442_s22  ;;  %4412 = vst.msk [vmem:[#allocation7 + $0x48] sm:$0xff] %vm138_vm0, %v4397_v4  ;;  %4496 = vrot.lane.b32.xlu1 %v4397_v4, %s8443_s30  ;;  %v6679_v6 = vpop.f32.mrb[91].mxu0 }
 0xb05   :  { %7480 = vmatprep.subr.bf16.mxu0 %v8444_v21  ;;  %v6292_v6 = vld [vmem:[%s10808_s13 + $0xb8] sm:$0xff]  }
 0xb06   :  { %v4373_v0 = vmax.f32 %v4354_v5, 0.0 }
 0xb07   :  { %v4358_v20 = vpop.f32.mrb[92].mxu0  ;;  %v4398_v16 = vld [vmem:[#allocation6 + $0x50] sm:$0xff]  ;;  %7482 = vmatpush3.bf16.msra.mxu0 %v6289_v55 }
 0xb08   :  { %4386 = vst.msk [vmem:[#allocation6 + $0x60] sm:$0xff] %vm138_vm0, %v4373_v0  ;;  %v4359_v56 = vadd.f32 %v10243_v9, %v4358_v20  ;;  %4447 = vrot.lane.b32.xlu0 %v4398_v16, %s8442_s22  ;;  %4413 = vst.msk [vmem:[#allocation7 + $0x50] sm:$0xff] %vm138_vm0, %v4398_v16  ;;  %4498 = vrot.lane.b32.xlu1 %v4398_v16, %s8443_s30  ;;  %v6682_v14 = vpop.f32.mrb[93].mxu0 }
 0xb09   :  { %7483 = vmatprep.subr.bf16.mxu0 %v8444_v21 }
 0xb0a   :  { %v4374_v12 = vmax.f32 %v4359_v56, 0.0 }
 0xb0b   :  { %v4399_v10 = vld [vmem:[#allocation6 + $0x58] sm:$0xff]  ;;  %7485 = vmatpush3.bf16.msra.mxu0 %v6290_v63 }
 0xb0c   :  { %4387 = vst.msk [vmem:[#allocation6 + $0x68] sm:$0xff] %vm138_vm0, %v4374_v12  ;;  %4449 = vrot.lane.b32.xlu0 %v4399_v10, %s8442_s22  ;;  %4414 = vst.msk [vmem:[#allocation7 + $0x58] sm:$0xff] %vm138_vm0, %v4399_v10  ;;  %4500 = vrot.lane.b32.xlu1 %v4399_v10, %s8443_s30 }
 0xb0d   :  { %7486 = vmatprep.subr.bf16.mxu0 %v8444_v21 }
 0xb0f   :  { %v4400_v51 = vld [vmem:[#allocation6 + $0x60] sm:$0xff]  ;;  %7488 = vmatpush3.bf16.msra.mxu0 %v6291_v48 }
 0xb10   :  { %4451 = vrot.lane.b32.xlu0 %v4400_v51, %s8442_s22  ;;  %4415 = vst.msk [vmem:[#allocation7 + $0x60] sm:$0xff] %vm138_vm0, %v4400_v51  ;;  %4502 = vrot.lane.b32.xlu1 %v4400_v51, %s8443_s30 }
 0xb11   :  { %7489 = vmatprep.subr.bf16.mxu0 %v8444_v21 }
 0xb13   :  { %v4401_v9 = vld [vmem:[#allocation6 + $0x68] sm:$0xff]  ;;  %7491 = vmatpush3.bf16.msra.mxu0 %v6292_v6 }
 0xb14   :  { %4453 = vrot.lane.b32.xlu0 %v4401_v9, %s8442_s22  ;;  %4504 = vrot.lane.b32.xlu1 %v4401_v9, %s8443_s30 }
 0xb18   :  { %4506 = vrot.lane.b32.xlu1 %v9991_v13, %s8443_s30 }
 0xb56   :  { %v4430_v7 = vpop.permute.xlu0 %4429 }
 0xb57   :  { %4468 = vst.msk [vmem:[#allocation7] sm:$0xff] %vm3693_vm5, %v4430_v7 }
 0xb5a   :  { %v4432_v57 = vpop.permute.xlu0 %4431  ;;  %v4483_v29 = vpop.permute.xlu1 %4482 }
 0xb5b   :  { %4469 = vst.msk [vmem:[#allocation7 + $0x8] sm:$0xff] %vm3693_vm5, %v4432_v57 }
 0xb5c   :  { %4521 = vst.msk [vmem:[#allocation7] sm:$0xff] %vm3747_vm6, %v4483_v29 }
 0xb5e   :  { %v4434_v15 = vpop.permute.xlu0 %4433  ;;  %v4485_v19 = vpop.permute.xlu1 %4484 }
 0xb5f   :  { %4470 = vst.msk [vmem:[#allocation7 + $0x10] sm:$0xff] %vm3693_vm5, %v4434_v15 }
 0xb60   :  { %4522 = vst.msk [vmem:[#allocation7 + $0x8] sm:$0xff] %vm3747_vm6, %v4485_v19 }
 0xb62   :  { %v4436_v43 = vpop.permute.xlu0 %4435  ;;  %v4487_v25 = vpop.permute.xlu1 %4486 }
 0xb63   :  { %v4534_v8 = vld [vmem:[#allocation7] sm:$0xff]  ;;  %4471 = vst.msk [vmem:[#allocation7 + $0x18] sm:$0xff] %vm3693_vm5, %v4436_v43 }
 0xb64   :  { %4523 = vst.msk [vmem:[#allocation7 + $0x10] sm:$0xff] %vm3747_vm6, %v4487_v25  ;;  %6708 = vmatmul.mubr.msk.f32.vlgmr.msra.gmra.mrb[74].mxu1 %vm3805_vm7, %v4534_v8 }
 0xb65   :  { %4790 = vst.msk [vmem:[#allocation7] sm:$0xff] %vm138_vm0, %v10223_v3  ;;  %6710 = vmatprep.mubr.msk.f32.mxu1 %vm8445_vm3, %v8440_v1 }
 0xb66   :  { %v4438_v13 = vpop.permute.xlu0 %4437  ;;  %v4489_v30 = vpop.permute.xlu1 %4488 }
 0xb67   :  { %v4535_v40 = vld [vmem:[#allocation7 + $0x8] sm:$0xff]  ;;  %4472 = vst.msk [vmem:[#allocation7 + $0x20] sm:$0xff] %vm3693_vm5, %v4438_v13 }
 0xb68   :  { %4524 = vst.msk [vmem:[#allocation7 + $0x18] sm:$0xff] %vm3747_vm6, %v4489_v30  ;;  %6711 = vmatmul.mubr.msk.f32.gmra.mrb[76].mxu1 %vm3805_vm7, %v4535_v40 }
 0xb69   :  { %6713 = vmatprep.mubr.msk.f32.mxu1 %vm8445_vm3, %v8440_v1 }
 0xb6a   :  { %v4440_v37 = vpop.permute.xlu0 %4439  ;;  %v4491_v18 = vpop.permute.xlu1 %4490 }
 0xb6b   :  { %v4536_v41 = vld [vmem:[#allocation7 + $0x10] sm:$0xff]  ;;  %4473 = vst.msk [vmem:[#allocation7 + $0x28] sm:$0xff] %vm3693_vm5, %v4440_v37 }
 0xb6c   :  { %4525 = vst.msk [vmem:[#allocation7 + $0x20] sm:$0xff] %vm3747_vm6, %v4491_v18  ;;  %6714 = vmatmul.mubr.msk.f32.gmra.mrb[78].mxu1 %vm3805_vm7, %v4536_v41 }
 0xb6d   :  { %6716 = vmatprep.mubr.msk.f32.mxu1 %vm8445_vm3, %v8440_v1 }
 0xb6e   :  { %v4442_v17 = vpop.permute.xlu0 %4441  ;;  %v4493_v23 = vpop.permute.xlu1 %4492 }
 0xb6f   :  { %v4537_v32 = vld [vmem:[#allocation7 + $0x18] sm:$0xff]  ;;  %4474 = vst.msk [vmem:[#allocation7 + $0x30] sm:$0xff] %vm3693_vm5, %v4442_v17 }
 0xb70   :  { %4526 = vst.msk [vmem:[#allocation7 + $0x28] sm:$0xff] %vm3747_vm6, %v4493_v23  ;;  %6717 = vmatmul.mubr.msk.f32.gmra.mrb[80].mxu1 %vm3805_vm7, %v4537_v32 }
 0xb71   :  { %6719 = vmatprep.mubr.msk.f32.mxu1 %vm8445_vm3, %v8440_v1 }
 0xb72   :  { %v4444_v26 = vpop.permute.xlu0 %4443  ;;  %v4495_v58 = vpop.permute.xlu1 %4494 }
 0xb73   :  { %v4538_v33 = vld [vmem:[#allocation7 + $0x20] sm:$0xff]  ;;  %4475 = vst.msk [vmem:[#allocation7 + $0x38] sm:$0xff] %vm3693_vm5, %v4444_v26 }
 0xb74   :  { %4527 = vst.msk [vmem:[#allocation7 + $0x30] sm:$0xff] %vm3747_vm6, %v4495_v58  ;;  %6720 = vmatmul.mubr.msk.f32.gmra.mrb[82].mxu1 %vm3805_vm7, %v4538_v33 }
 0xb75   :  { %6722 = vmatprep.mubr.msk.f32.mxu1 %vm8445_vm3, %v8440_v1 }
 0xb76   :  { %v4446_v31 = vpop.permute.xlu0 %4445  ;;  %v4497_v27 = vpop.permute.xlu1 %4496 }
 0xb77   :  { %v4539_v42 = vld [vmem:[#allocation7 + $0x28] sm:$0xff]  ;;  %4476 = vst.msk [vmem:[#allocation7 + $0x40] sm:$0xff] %vm3693_vm5, %v4446_v31 }
 0xb78   :  { %4528 = vst.msk [vmem:[#allocation7 + $0x38] sm:$0xff] %vm3747_vm6, %v4497_v27  ;;  %6723 = vmatmul.mubr.msk.f32.gmra.mrb[84].mxu1 %vm3805_vm7, %v4539_v42 }
 0xb79   :  { %6725 = vmatprep.mubr.msk.f32.mxu1 %vm8445_vm3, %v8440_v1 }
 0xb7a   :  { %v4448_v36 = vpop.permute.xlu0 %4447  ;;  %v4499_v11 = vpop.permute.xlu1 %4498 }
 0xb7b   :  { %v4540_v35 = vld [vmem:[#allocation7 + $0x30] sm:$0xff]  ;;  %4477 = vst.msk [vmem:[#allocation7 + $0x48] sm:$0xff] %vm3693_vm5, %v4448_v36 }
 0xb7c   :  { %4529 = vst.msk [vmem:[#allocation7 + $0x40] sm:$0xff] %vm3747_vm6, %v4499_v11  ;;  %6726 = vmatmul.mubr.msk.f32.gmra.mrb[86].mxu1 %vm3805_vm7, %v4540_v35 }
 0xb7d   :  { %6728 = vmatprep.mubr.msk.f32.mxu1 %vm8445_vm3, %v8440_v1 }
 0xb7e   :  { %v4450_v46 = vpop.permute.xlu0 %4449  ;;  %v4501_v47 = vpop.permute.xlu1 %4500 }
 0xb7f   :  { %v4541_v52 = vld [vmem:[#allocation7 + $0x38] sm:$0xff]  ;;  %4478 = vst.msk [vmem:[#allocation7 + $0x50] sm:$0xff] %vm3693_vm5, %v4450_v46 }
 0xb80   :  { %4530 = vst.msk [vmem:[#allocation7 + $0x48] sm:$0xff] %vm3747_vm6, %v4501_v47  ;;  %6729 = vmatmul.mubr.msk.f32.gmra.mrb[88].mxu1 %vm3805_vm7, %v4541_v52 }
 0xb81   :  { %6731 = vmatprep.mubr.msk.f32.mxu1 %vm8445_vm3, %v8440_v1 }
 0xb82   :  { %v4452_v22 = vpop.permute.xlu0 %4451  ;;  %v4503_v39 = vpop.permute.xlu1 %4502 }
 0xb83   :  { %v4542_v50 = vld [vmem:[#allocation7 + $0x40] sm:$0xff]  ;;  %4479 = vst.msk [vmem:[#allocation7 + $0x58] sm:$0xff] %vm3693_vm5, %v4452_v22 }
 0xb84   :  { %4531 = vst.msk [vmem:[#allocation7 + $0x50] sm:$0xff] %vm3747_vm6, %v4503_v39  ;;  %6732 = vmatmul.mubr.msk.f32.gmra.mrb[90].mxu1 %vm3805_vm7, %v4542_v50 }
 0xb85   :  { %6734 = vmatprep.mubr.msk.f32.mxu1 %vm8445_vm3, %v8440_v1 }
 0xb86   :  { %v4454_v53 = vpop.permute.xlu0 %4453  ;;  %v4505_v60 = vpop.permute.xlu1 %4504 }
 0xb87   :  { %v4543_v59 = vld [vmem:[#allocation7 + $0x48] sm:$0xff]  ;;  %4480 = vst.msk [vmem:[#allocation7 + $0x60] sm:$0xff] %vm3693_vm5, %v4454_v53 }
 0xb88   :  { %4532 = vst.msk [vmem:[#allocation7 + $0x58] sm:$0xff] %vm3747_vm6, %v4505_v60  ;;  %6735 = vmatmul.mubr.msk.f32.gmra.mrb[92].mxu1 %vm3805_vm7, %v4543_v59 }
 0xb89   :  { %6737 = vmatprep.mubr.msk.f32.mxu1 %vm8445_vm3, %v8440_v1 }
 0xb8a   :  { %v4507_v61 = vpop.permute.xlu1 %4506 }
 0xb8b   :  { %v4544_v54 = vld [vmem:[#allocation7 + $0x50] sm:$0xff]  ;;  %4533 = vst.msk [vmem:[#allocation7 + $0x60] sm:$0xff] %vm3747_vm6, %v4507_v61 }
 0xb8c   :  { %6738 = vmatmul.mubr.msk.f32.gmra.mrb[94].mxu1 %vm3805_vm7, %v4544_v54 }
 0xb8d   :  { %6740 = vmatprep.mubr.msk.f32.mxu1 %vm8445_vm3, %v8440_v1 }
 0xb8f   :  { %v4545_v44 = vld [vmem:[#allocation7 + $0x58] sm:$0xff] }
 0xb90   :  { %6741 = vmatmul.mubr.msk.f32.gmra.mrb[96].mxu1 %vm3805_vm7, %v4545_v44 }
 0xb91   :  { %6743 = vmatprep.mubr.msk.f32.mxu1 %vm8445_vm3, %v8440_v1 }
 0xb92   :  { %v4546_v62 = vld [vmem:[#allocation7 + $0x60] sm:$0xff] }
 0xb94   :  { %6744 = vmatmul.mubr.msk.f32.gmra.mrb[98].mxu1 %vm3805_vm7, %v4546_v62 }
 0xb95   :  { %6833 = vmatprep.mubr.msk.f32.mxu1 %vm8445_vm3, %v8440_v1 }
 0xc37   :  { %v4685_v45 = vpop.f32.mrb[74].mxu1 }
 0xc38   :  { %v4686_v24 = vadd.f32 %v10408_v38, %v4685_v45  ;;  %v6709_v49 = vpop.f32.mrb[75].mxu1 }
 0xc3a   :  { %v4749_v4 = vmax.f32 %v4686_v24, 0.0 }
 0xc3b   :  { %v4690_v5 = vpop.f32.mrb[76].mxu1 }
 0xc3c   :  { %4762 = vst.msk [vmem:[#allocation6 + $0x8] sm:$0xff] %vm138_vm0, %v4749_v4  ;;  %v4691_v0 = vadd.f32 %v10408_v38, %v4690_v5  ;;  %v6712_v20 = vpop.f32.mrb[77].mxu1 }
 0xc3e   :  { %v4750_v16 = vmax.f32 %v4691_v0, 0.0  ;;  %v10476_v0 = vld [vmem:[#allocation6 + $0x70] sm:$0xff] }
 0xc3f   :  { %v4695_v56 = vpop.f32.mrb[78].mxu1 }
 0xc40   :  { %4763 = vst.msk [vmem:[#allocation6 + $0x10] sm:$0xff] %vm138_vm0, %v4750_v16  ;;  %v4696_v14 = vadd.f32 %v10408_v38, %v4695_v56  ;;  %v6715_v12 = vpop.f32.mrb[79].mxu1 }
 0xc42   :  { %v4751_v10 = vmax.f32 %v4696_v14, 0.0 }
 0xc43   :  { %v4700_v51 = vpop.f32.mrb[80].mxu1  ;;  %v4776_v9 = vld [vmem:[#allocation6 + $0x8] sm:$0xff] }
 0xc44   :  { %4764 = vst.msk [vmem:[#allocation6 + $0x18] sm:$0xff] %vm138_vm0, %v4751_v10  ;;  %v4701_v7 = vadd.f32 %v10408_v38, %v4700_v51  ;;  %v6718_v57 = vpop.f32.mrb[81].mxu1  ;;  %4816 = vrot.lane.b32.xlu0 %v4776_v9, %s8442_s22  ;;  %4791 = vst.msk [vmem:[#allocation7 + $0x8] sm:$0xff] %vm138_vm0, %v4776_v9 }
 0xc46   :  { %v4752_v29 = vmax.f32 %v4701_v7, 0.0 }
 0xc47   :  { %v4705_v15 = vpop.f32.mrb[82].mxu1  ;;  %v4777_v19 = vld [vmem:[#allocation6 + $0x10] sm:$0xff] }
 0xc48   :  { %4765 = vst.msk [vmem:[#allocation6 + $0x20] sm:$0xff] %vm138_vm0, %v4752_v29  ;;  %v4706_v43 = vadd.f32 %v10408_v38, %v4705_v15  ;;  %v6721_v25 = vpop.f32.mrb[83].mxu1  ;;  %4818 = vrot.lane.b32.xlu0 %v4777_v19, %s8442_s22  ;;  %4792 = vst.msk [vmem:[#allocation7 + $0x10] sm:$0xff] %vm138_vm0, %v4777_v19  ;;  %4869 = vrot.lane.b32.xlu1 %v4777_v19, %s8443_s30 }
 0xc4a   :  { %v4753_v8 = vmax.f32 %v4706_v43, 0.0 }
 0xc4b   :  { %v4710_v13 = vpop.f32.mrb[84].mxu1  ;;  %v4778_v30 = vld [vmem:[#allocation6 + $0x18] sm:$0xff] }
 0xc4c   :  { %4766 = vst.msk [vmem:[#allocation6 + $0x28] sm:$0xff] %vm138_vm0, %v4753_v8  ;;  %v4711_v40 = vadd.f32 %v10408_v38, %v4710_v13  ;;  %v6724_v37 = vpop.f32.mrb[85].mxu1  ;;  %4820 = vrot.lane.b32.xlu0 %v4778_v30, %s8442_s22  ;;  %4793 = vst.msk [vmem:[#allocation7 + $0x18] sm:$0xff] %vm138_vm0, %v4778_v30  ;;  %4871 = vrot.lane.b32.xlu1 %v4778_v30, %s8443_s30 }
 0xc4e   :  { %v4754_v18 = vmax.f32 %v4711_v40, 0.0 }
 0xc4f   :  { %v4715_v41 = vpop.f32.mrb[86].mxu1  ;;  %v4779_v17 = vld [vmem:[#allocation6 + $0x20] sm:$0xff] }
 0xc50   :  { %4767 = vst.msk [vmem:[#allocation6 + $0x30] sm:$0xff] %vm138_vm0, %v4754_v18  ;;  %v4716_v23 = vadd.f32 %v10408_v38, %v4715_v41  ;;  %v6727_v32 = vpop.f32.mrb[87].mxu1  ;;  %4822 = vrot.lane.b32.xlu0 %v4779_v17, %s8442_s22  ;;  %4794 = vst.msk [vmem:[#allocation7 + $0x20] sm:$0xff] %vm138_vm0, %v4779_v17  ;;  %4873 = vrot.lane.b32.xlu1 %v4779_v17, %s8443_s30 }
 0xc52   :  { %v4755_v26 = vmax.f32 %v4716_v23, 0.0 }
 0xc53   :  { %v4720_v58 = vpop.f32.mrb[88].mxu1  ;;  %v4780_v33 = vld [vmem:[#allocation6 + $0x28] sm:$0xff] }
 0xc54   :  { %4768 = vst.msk [vmem:[#allocation6 + $0x38] sm:$0xff] %vm138_vm0, %v4755_v26  ;;  %v4721_v31 = vadd.f32 %v10408_v38, %v4720_v58  ;;  %v6730_v27 = vpop.f32.mrb[89].mxu1  ;;  %4824 = vrot.lane.b32.xlu0 %v4780_v33, %s8442_s22  ;;  %4795 = vst.msk [vmem:[#allocation7 + $0x28] sm:$0xff] %vm138_vm0, %v4780_v33  ;;  %4875 = vrot.lane.b32.xlu1 %v4780_v33, %s8443_s30 }
 0xc56   :  { %v4756_v42 = vmax.f32 %v4721_v31, 0.0 }
 0xc57   :  { %v4725_v36 = vpop.f32.mrb[90].mxu1  ;;  %v4781_v11 = vld [vmem:[#allocation6 + $0x30] sm:$0xff] }
 0xc58   :  { %4769 = vst.msk [vmem:[#allocation6 + $0x40] sm:$0xff] %vm138_vm0, %v4756_v42  ;;  %v4726_v35 = vadd.f32 %v10408_v38, %v4725_v36  ;;  %v6733_v46 = vpop.f32.mrb[91].mxu1  ;;  %4826 = vrot.lane.b32.xlu0 %v4781_v11, %s8442_s22  ;;  %4796 = vst.msk [vmem:[#allocation7 + $0x30] sm:$0xff] %vm138_vm0, %v4781_v11  ;;  %4877 = vrot.lane.b32.xlu1 %v4781_v11, %s8443_s30 }
 0xc5a   :  { %v4757_v47 = vmax.f32 %v4726_v35, 0.0 }
 0xc5b   :  { %v4730_v52 = vpop.f32.mrb[92].mxu1  ;;  %v4782_v22 = vld [vmem:[#allocation6 + $0x38] sm:$0xff] }
 0xc5c   :  { %4770 = vst.msk [vmem:[#allocation6 + $0x48] sm:$0xff] %vm138_vm0, %v4757_v47  ;;  %v4731_v39 = vadd.f32 %v10408_v38, %v4730_v52  ;;  %v6736_v50 = vpop.f32.mrb[93].mxu1  ;;  %4828 = vrot.lane.b32.xlu0 %v4782_v22, %s8442_s22  ;;  %4797 = vst.msk [vmem:[#allocation7 + $0x38] sm:$0xff] %vm138_vm0, %v4782_v22  ;;  %4879 = vrot.lane.b32.xlu1 %v4782_v22, %s8443_s30 }
 0xc5d   :  { %v6294_v50 = vld [vmem:[%s10808_s13 + $0xc8] sm:$0xff]  }
 0xc5e   :  { %v4758_v53 = vmax.f32 %v4731_v39, 0.0  ;;  %v6293_v39 = vld [vmem:[%s10808_s13 + $0xc0] sm:$0xff]  }
 0xc5f   :  { %v4735_v60 = vpop.f32.mrb[94].mxu1  ;;  %v4783_v59 = vld [vmem:[#allocation6 + $0x40] sm:$0xff]  ;;  %7494 = vmatpush3.bf16.msra.mxu1 %v6293_v39 }
 0xc60   :  { %4771 = vst.msk [vmem:[#allocation6 + $0x50] sm:$0xff] %vm138_vm0, %v4758_v53  ;;  %v4736_v61 = vadd.f32 %v10408_v38, %v4735_v60  ;;  %v6739_v54 = vpop.f32.mrb[95].mxu1  ;;  %4830 = vrot.lane.b32.xlu0 %v4783_v59, %s8442_s22  ;;  %4798 = vst.msk [vmem:[#allocation7 + $0x40] sm:$0xff] %vm138_vm0, %v4783_v59  ;;  %4881 = vrot.lane.b32.xlu1 %v4783_v59, %s8443_s30  ;;  %v6295_v53 = vld [vmem:[%s10808_s13 + $0xd0] sm:$0xff]   ;;  %v6296_v60 = vld [vmem:[%s10808_s13 + $0xd8] sm:$0xff]  }
 0xc61   :  { %7495 = vmatprep.subr.bf16.mxu1 %v8444_v21  ;;  %v6297_v59 = vld [vmem:[%s10808_s13 + $0xe0] sm:$0xff]  }
 0xc62   :  { %v4759_v44 = vmax.f32 %v4736_v61, 0.0  ;;  %v10568_v61 = vld [vmem:[%s10809_s14 + $0x3] ss:$0 sm:$0xff] }
 0xc63   :  { %v4740_v62 = vpop.f32.mrb[96].mxu1  ;;  %v4784_v34 = vld [vmem:[#allocation6 + $0x48] sm:$0xff]  ;;  %7497 = vmatpush3.bf16.msra.mxu1 %v6294_v50 }
 0xc64   :  { %4772 = vst.msk [vmem:[#allocation6 + $0x58] sm:$0xff] %vm138_vm0, %v4759_v44  ;;  %v4741_v28 = vadd.f32 %v10408_v38, %v4740_v62  ;;  %4832 = vrot.lane.b32.xlu0 %v4784_v34, %s8442_s22  ;;  %4799 = vst.msk [vmem:[#allocation7 + $0x48] sm:$0xff] %vm138_vm0, %v4784_v34  ;;  %4883 = vrot.lane.b32.xlu1 %v4784_v34, %s8443_s30  ;;  %v6742_v55 = vpop.f32.mrb[97].mxu1 }
 0xc65   :  { %7498 = vmatprep.subr.bf16.mxu1 %v8444_v21  ;;  %v6298_v55 = vld [vmem:[%s10808_s13 + $0xe8] sm:$0xff]  }
 0xc66   :  { %v4760_v63 = vmax.f32 %v4741_v28, 0.0 }
 0xc67   :  { %v4745_v48 = vpop.f32.mrb[98].mxu1  ;;  %v4785_v45 = vld [vmem:[#allocation6 + $0x50] sm:$0xff]  ;;  %7500 = vmatpush3.bf16.msra.mxu1 %v6295_v53 }
 0xc68   :  { %4773 = vst.msk [vmem:[#allocation6 + $0x60] sm:$0xff] %vm138_vm0, %v4760_v63  ;;  %v4746_v24 = vadd.f32 %v10408_v38, %v4745_v48  ;;  %4834 = vrot.lane.b32.xlu0 %v4785_v45, %s8442_s22  ;;  %4800 = vst.msk [vmem:[#allocation7 + $0x50] sm:$0xff] %vm138_vm0, %v4785_v45  ;;  %4885 = vrot.lane.b32.xlu1 %v4785_v45, %s8443_s30  ;;  %v6745_v49 = vpop.f32.mrb[99].mxu1 }
 0xc69   :  { %7501 = vmatprep.subr.bf16.mxu1 %v8444_v21 }
 0xc6a   :  { %v4761_v4 = vmax.f32 %v4746_v24, 0.0 }
 0xc6b   :  { %v4786_v5 = vld [vmem:[#allocation6 + $0x58] sm:$0xff]  ;;  %7503 = vmatpush3.bf16.msra.mxu1 %v6296_v60 }
 0xc6c   :  { %4774 = vst.msk [vmem:[#allocation6 + $0x68] sm:$0xff] %vm138_vm0, %v4761_v4  ;;  %4836 = vrot.lane.b32.xlu0 %v4786_v5, %s8442_s22  ;;  %4801 = vst.msk [vmem:[#allocation7 + $0x58] sm:$0xff] %vm138_vm0, %v4786_v5  ;;  %4887 = vrot.lane.b32.xlu1 %v4786_v5, %s8443_s30 }
 0xc6d   :  { %7504 = vmatprep.subr.bf16.mxu1 %v8444_v21 }
 0xc6f   :  { %v4787_v6 = vld [vmem:[#allocation6 + $0x60] sm:$0xff]  ;;  %7506 = vmatpush3.bf16.msra.mxu1 %v6297_v59 }
 0xc70   :  { %4838 = vrot.lane.b32.xlu0 %v4787_v6, %s8442_s22  ;;  %4802 = vst.msk [vmem:[#allocation7 + $0x60] sm:$0xff] %vm138_vm0, %v4787_v6  ;;  %4889 = vrot.lane.b32.xlu1 %v4787_v6, %s8443_s30 }
 0xc71   :  { %7507 = vmatprep.subr.bf16.mxu1 %v8444_v21 }
 0xc73   :  { %v4788_v38 = vld [vmem:[#allocation6 + $0x68] sm:$0xff]  ;;  %7509 = vmatpush3.bf16.msra.mxu1 %v6298_v55 }
 0xc74   :  { %4840 = vrot.lane.b32.xlu0 %v4788_v38, %s8442_s22  ;;  %4891 = vrot.lane.b32.xlu1 %v4788_v38, %s8443_s30 }
 0xc78   :  { %4893 = vrot.lane.b32.xlu1 %v10476_v0, %s8443_s30 }
 0xcb6   :  { %v4817_v20 = vpop.permute.xlu0 %4816 }
 0xcb7   :  { %4855 = vst.msk [vmem:[#allocation7] sm:$0xff] %vm3693_vm5, %v4817_v20 }
 0xcba   :  { %v4819_v16 = vpop.permute.xlu0 %4818  ;;  %v4870_v56 = vpop.permute.xlu1 %4869 }
 0xcbb   :  { %4856 = vst.msk [vmem:[#allocation7 + $0x8] sm:$0xff] %vm3693_vm5, %v4819_v16 }
 0xcbc   :  { %4908 = vst.msk [vmem:[#allocation7] sm:$0xff] %vm3747_vm6, %v4870_v56 }
 0xcbe   :  { %v4821_v14 = vpop.permute.xlu0 %4820  ;;  %v4872_v12 = vpop.permute.xlu1 %4871 }
 0xcbf   :  { %4857 = vst.msk [vmem:[#allocation7 + $0x10] sm:$0xff] %vm3693_vm5, %v4821_v14 }
 0xcc0   :  { %4909 = vst.msk [vmem:[#allocation7 + $0x8] sm:$0xff] %vm3747_vm6, %v4872_v12 }
 0xcc2   :  { %v4823_v10 = vpop.permute.xlu0 %4822  ;;  %v4874_v51 = vpop.permute.xlu1 %4873 }
 0xcc3   :  { %v4921_v9 = vld [vmem:[#allocation7] sm:$0xff]  ;;  %4858 = vst.msk [vmem:[#allocation7 + $0x18] sm:$0xff] %vm3693_vm5, %v4823_v10 }
 0xcc4   :  { %4910 = vst.msk [vmem:[#allocation7 + $0x10] sm:$0xff] %vm3747_vm6, %v4874_v51  ;;  %6771 = vmatmul.mubr.msk.f32.vlgmr.msra.gmra.mrb[94].mxu0 %vm3805_vm7, %v4921_v9 }
 0xcc5   :  { %5177 = vst.msk [vmem:[#allocation7] sm:$0xff] %vm138_vm0, %v10223_v3  ;;  %6773 = vmatprep.mubr.msk.f32.mxu0 %vm8445_vm3, %v8440_v1 }
 0xcc6   :  { %v4825_v7 = vpop.permute.xlu0 %4824  ;;  %v4876_v57 = vpop.permute.xlu1 %4875 }
 0xcc7   :  { %v4922_v29 = vld [vmem:[#allocation7 + $0x8] sm:$0xff]  ;;  %4859 = vst.msk [vmem:[#allocation7 + $0x20] sm:$0xff] %vm3693_vm5, %v4825_v7 }
 0xcc8   :  { %4911 = vst.msk [vmem:[#allocation7 + $0x18] sm:$0xff] %vm3747_vm6, %v4876_v57  ;;  %6774 = vmatmul.mubr.msk.f32.gmra.mrb[96].mxu0 %vm3805_vm7, %v4922_v29 }
 0xcc9   :  { %6776 = vmatprep.mubr.msk.f32.mxu0 %vm8445_vm3, %v8440_v1 }
 0xcca   :  { %v4827_v15 = vpop.permute.xlu0 %4826  ;;  %v4878_v19 = vpop.permute.xlu1 %4877 }
 0xccb   :  { %v4923_v43 = vld [vmem:[#allocation7 + $0x10] sm:$0xff]  ;;  %4860 = vst.msk [vmem:[#allocation7 + $0x28] sm:$0xff] %vm3693_vm5, %v4827_v15 }
 0xccc   :  { %4912 = vst.msk [vmem:[#allocation7 + $0x20] sm:$0xff] %vm3747_vm6, %v4878_v19  ;;  %6777 = vmatmul.mubr.msk.f32.gmra.mrb[98].mxu0 %vm3805_vm7, %v4923_v43 }
 0xccd   :  { %6779 = vmatprep.mubr.msk.f32.mxu0 %vm8445_vm3, %v8440_v1 }
 0xcce   :  { %v4829_v3 = vpop.permute.xlu0 %4828  ;;  %v4880_v25 = vpop.permute.xlu1 %4879 }
 0xccf   :  { %v4924_v8 = vld [vmem:[#allocation7 + $0x18] sm:$0xff]  ;;  %4861 = vst.msk [vmem:[#allocation7 + $0x30] sm:$0xff] %vm3693_vm5, %v4829_v3 }
 0xcd0   :  { %4913 = vst.msk [vmem:[#allocation7 + $0x28] sm:$0xff] %vm3747_vm6, %v4880_v25  ;;  %6780 = vmatmul.mubr.msk.f32.gmra.mrb[100].mxu0 %vm3805_vm7, %v4924_v8 }
 0xcd1   :  { %6782 = vmatprep.mubr.msk.f32.mxu0 %vm8445_vm3, %v8440_v1 }
 0xcd2   :  { %v4831_v13 = vpop.permute.xlu0 %4830  ;;  %v4882_v30 = vpop.permute.xlu1 %4881 }
 0xcd3   :  { %v4925_v40 = vld [vmem:[#allocation7 + $0x20] sm:$0xff]  ;;  %4862 = vst.msk [vmem:[#allocation7 + $0x38] sm:$0xff] %vm3693_vm5, %v4831_v13 }
 0xcd4   :  { %4914 = vst.msk [vmem:[#allocation7 + $0x30] sm:$0xff] %vm3747_vm6, %v4882_v30  ;;  %6783 = vmatmul.mubr.msk.f32.gmra.mrb[102].mxu0 %vm3805_vm7, %v4925_v40 }
 0xcd5   :  { %6785 = vmatprep.mubr.msk.f32.mxu0 %vm8445_vm3, %v8440_v1 }
 0xcd6   :  { %v4833_v37 = vpop.permute.xlu0 %4832  ;;  %v4884_v18 = vpop.permute.xlu1 %4883 }
 0xcd7   :  { %v4926_v41 = vld [vmem:[#allocation7 + $0x28] sm:$0xff]  ;;  %4863 = vst.msk [vmem:[#allocation7 + $0x40] sm:$0xff] %vm3693_vm5, %v4833_v37 }
 0xcd8   :  { %4915 = vst.msk [vmem:[#allocation7 + $0x38] sm:$0xff] %vm3747_vm6, %v4884_v18  ;;  %6786 = vmatmul.mubr.msk.f32.gmra.mrb[104].mxu0 %vm3805_vm7, %v4926_v41 }
 0xcd9   :  { %6788 = vmatprep.mubr.msk.f32.mxu0 %vm8445_vm3, %v8440_v1 }
 0xcda   :  { %v4835_v17 = vpop.permute.xlu0 %4834  ;;  %v4886_v23 = vpop.permute.xlu1 %4885 }
 0xcdb   :  { %v4927_v32 = vld [vmem:[#allocation7 + $0x30] sm:$0xff]  ;;  %4864 = vst.msk [vmem:[#allocation7 + $0x48] sm:$0xff] %vm3693_vm5, %v4835_v17 }
 0xcdc   :  { %4916 = vst.msk [vmem:[#allocation7 + $0x40] sm:$0xff] %vm3747_vm6, %v4886_v23  ;;  %6789 = vmatmul.mubr.msk.f32.gmra.mrb[106].mxu0 %vm3805_vm7, %v4927_v32 }
 0xcdd   :  { %6791 = vmatprep.mubr.msk.f32.mxu0 %vm8445_vm3, %v8440_v1 }
 0xcde   :  { %v4837_v26 = vpop.permute.xlu0 %4836  ;;  %v4888_v58 = vpop.permute.xlu1 %4887 }
 0xcdf   :  { %v4928_v33 = vld [vmem:[#allocation7 + $0x38] sm:$0xff]  ;;  %4865 = vst.msk [vmem:[#allocation7 + $0x50] sm:$0xff] %vm3693_vm5, %v4837_v26 }
 0xce0   :  { %4917 = vst.msk [vmem:[#allocation7 + $0x48] sm:$0xff] %vm3747_vm6, %v4888_v58  ;;  %6792 = vmatmul.mubr.msk.f32.gmra.mrb[108].mxu0 %vm3805_vm7, %v4928_v33 }
 0xce1   :  { %6794 = vmatprep.mubr.msk.f32.mxu0 %vm8445_vm3, %v8440_v1 }
 0xce2   :  { %v4839_v31 = vpop.permute.xlu0 %4838  ;;  %v4890_v27 = vpop.permute.xlu1 %4889 }
 0xce3   :  { %v4929_v42 = vld [vmem:[#allocation7 + $0x40] sm:$0xff]  ;;  %4866 = vst.msk [vmem:[#allocation7 + $0x58] sm:$0xff] %vm3693_vm5, %v4839_v31 }
 0xce4   :  { %4918 = vst.msk [vmem:[#allocation7 + $0x50] sm:$0xff] %vm3747_vm6, %v4890_v27  ;;  %6795 = vmatmul.mubr.msk.f32.gmra.mrb[110].mxu0 %vm3805_vm7, %v4929_v42 }
 0xce5   :  { %6797 = vmatprep.mubr.msk.f32.mxu0 %vm8445_vm3, %v8440_v1 }
 0xce6   :  { %v4841_v36 = vpop.permute.xlu0 %4840  ;;  %v4892_v11 = vpop.permute.xlu1 %4891 }
 0xce7   :  { %v4930_v35 = vld [vmem:[#allocation7 + $0x48] sm:$0xff]  ;;  %4867 = vst.msk [vmem:[#allocation7 + $0x60] sm:$0xff] %vm3693_vm5, %v4841_v36 }
 0xce8   :  { %4919 = vst.msk [vmem:[#allocation7 + $0x58] sm:$0xff] %vm3747_vm6, %v4892_v11  ;;  %6798 = vmatmul.mubr.msk.f32.gmra.mrb[112].mxu0 %vm3805_vm7, %v4930_v35 }
 0xce9   :  { %6800 = vmatprep.mubr.msk.f32.mxu0 %vm8445_vm3, %v8440_v1 }
 0xcea   :  { %v4894_v46 = vpop.permute.xlu1 %4893 }
 0xceb   :  { %v4931_v47 = vld [vmem:[#allocation7 + $0x50] sm:$0xff]  ;;  %4920 = vst.msk [vmem:[#allocation7 + $0x60] sm:$0xff] %vm3747_vm6, %v4894_v46 }
 0xcec   :  { %6801 = vmatmul.mubr.msk.f32.gmra.mrb[114].mxu0 %vm3805_vm7, %v4931_v47 }
 0xced   :  { %6803 = vmatprep.mubr.msk.f32.mxu0 %vm8445_vm3, %v8440_v1 }
 0xcef   :  { %v4932_v52 = vld [vmem:[#allocation7 + $0x58] sm:$0xff] }
 0xcf0   :  { %6804 = vmatmul.mubr.msk.f32.gmra.mrb[116].mxu0 %vm3805_vm7, %v4932_v52 }
 0xcf1   :  { %6806 = vmatprep.mubr.msk.f32.mxu0 %vm8445_vm3, %v8440_v1 }
 0xcf2   :  { %v4933_v22 = vld [vmem:[#allocation7 + $0x60] sm:$0xff] }
 0xcf4   :  { %6807 = vmatmul.mubr.msk.f32.gmra.mrb[118].mxu0 %vm3805_vm7, %v4933_v22 }
 0xd97   :  { %v5072_v54 = vpop.f32.mrb[94].mxu0 }
 0xd98   :  { %v5073_v44 = vadd.f32 %v10568_v61, %v5072_v54  ;;  %v6772_v62 = vpop.f32.mrb[95].mxu0 }
 0xd9a   :  { %v5136_v34 = vmax.f32 %v5073_v44, 0.0 }
 0xd9b   :  { %v5077_v28 = vpop.f32.mrb[96].mxu0 }
 0xd9c   :  { %5149 = vst.msk [vmem:[#allocation6 + $0x8] sm:$0xff] %vm138_vm0, %v5136_v34  ;;  %v5078_v63 = vadd.f32 %v10568_v61, %v5077_v28  ;;  %v6775_v21 = vpop.f32.mrb[97].mxu0 }
 0xd9e   :  { %v5137_v48 = vmax.f32 %v5078_v63, 0.0 }
 0xd9f   :  { %v5082_v45 = vpop.f32.mrb[98].mxu0 }
 0xda0   :  { %5150 = vst.msk [vmem:[#allocation6 + $0x10] sm:$0xff] %vm138_vm0, %v5137_v48  ;;  %v5083_v24 = vadd.f32 %v10568_v61, %v5082_v45  ;;  %v6778_v49 = vpop.f32.mrb[99].mxu0 }
 0xda2   :  { %v5138_v4 = vmax.f32 %v5083_v24, 0.0 }
 0xda3   :  { %v5087_v5 = vpop.f32.mrb[100].mxu0  ;;  %v5163_v6 = vld [vmem:[#allocation6 + $0x8] sm:$0xff] }
 0xda4   :  { %5151 = vst.msk [vmem:[#allocation6 + $0x18] sm:$0xff] %vm138_vm0, %v5138_v4  ;;  %v5088_v38 = vadd.f32 %v10568_v61, %v5087_v5  ;;  %5203 = vrot.lane.b32.xlu0 %v5163_v6, %s8442_s22  ;;  %5178 = vst.msk [vmem:[#allocation7 + $0x8] sm:$0xff] %vm138_vm0, %v5163_v6  ;;  %v6781_v20 = vpop.f32.mrb[101].mxu0 }
 0xda6   :  { %v5139_v16 = vmax.f32 %v5088_v38, 0.0 }
 0xda7   :  { %v5092_v56 = vpop.f32.mrb[102].mxu0  ;;  %v5164_v14 = vld [vmem:[#allocation6 + $0x10] sm:$0xff] }
 0xda8   :  { %5152 = vst.msk [vmem:[#allocation6 + $0x20] sm:$0xff] %vm138_vm0, %v5139_v16  ;;  %v5093_v12 = vadd.f32 %v10568_v61, %v5092_v56  ;;  %5205 = vrot.lane.b32.xlu0 %v5164_v14, %s8442_s22  ;;  %5179 = vst.msk [vmem:[#allocation7 + $0x10] sm:$0xff] %vm138_vm0, %v5164_v14  ;;  %5256 = vrot.lane.b32.xlu1 %v5164_v14, %s8443_s30  ;;  %v6784_v10 = vpop.f32.mrb[103].mxu0 }
 0xdaa   :  { %v5140_v51 = vmax.f32 %v5093_v12, 0.0 }
 0xdab   :  { %v5097_v9 = vpop.f32.mrb[104].mxu0  ;;  %v5165_v7 = vld [vmem:[#allocation6 + $0x18] sm:$0xff] }
 0xdac   :  { %5153 = vst.msk [vmem:[#allocation6 + $0x28] sm:$0xff] %vm138_vm0, %v5140_v51  ;;  %v5098_v57 = vadd.f32 %v10568_v61, %v5097_v9  ;;  %5207 = vrot.lane.b32.xlu0 %v5165_v7, %s8442_s22  ;;  %5180 = vst.msk [vmem:[#allocation7 + $0x18] sm:$0xff] %vm138_vm0, %v5165_v7  ;;  %5258 = vrot.lane.b32.xlu1 %v5165_v7, %s8443_s30  ;;  %v6787_v29 = vpop.f32.mrb[105].mxu0 }
 0xdae   :  { %v5141_v15 = vmax.f32 %v5098_v57, 0.0 }
 0xdaf   :  { %v5102_v19 = vpop.f32.mrb[106].mxu0  ;;  %v5166_v43 = vld [vmem:[#allocation6 + $0x20] sm:$0xff] }
 0xdb0   :  { %5154 = vst.msk [vmem:[#allocation6 + $0x30] sm:$0xff] %vm138_vm0, %v5141_v15  ;;  %v5103_v3 = vadd.f32 %v10568_v61, %v5102_v19  ;;  %5209 = vrot.lane.b32.xlu0 %v5166_v43, %s8442_s22  ;;  %5181 = vst.msk [vmem:[#allocation7 + $0x20] sm:$0xff] %vm138_vm0, %v5166_v43  ;;  %5260 = vrot.lane.b32.xlu1 %v5166_v43, %s8443_s30  ;;  %v6790_v25 = vpop.f32.mrb[107].mxu0 }
 0xdb2   :  { %v5142_v8 = vmax.f32 %v5103_v3, 0.0 }
 0xdb3   :  { %v5107_v13 = vpop.f32.mrb[108].mxu0  ;;  %v5167_v30 = vld [vmem:[#allocation6 + $0x28] sm:$0xff] }
 0xdb4   :  { %5155 = vst.msk [vmem:[#allocation6 + $0x38] sm:$0xff] %vm138_vm0, %v5142_v8  ;;  %v5108_v40 = vadd.f32 %v10568_v61, %v5107_v13  ;;  %5211 = vrot.lane.b32.xlu0 %v5167_v30, %s8442_s22  ;;  %5182 = vst.msk [vmem:[#allocation7 + $0x28] sm:$0xff] %vm138_vm0, %v5167_v30  ;;  %5262 = vrot.lane.b32.xlu1 %v5167_v30, %s8443_s30  ;;  %v6793_v37 = vpop.f32.mrb[109].mxu0 }
 0xdb6   :  { %v5143_v18 = vmax.f32 %v5108_v40, 0.0 }
 0xdb7   :  { %v5112_v41 = vpop.f32.mrb[110].mxu0  ;;  %v5168_v17 = vld [vmem:[#allocation6 + $0x30] sm:$0xff] }
 0xdb8   :  { %5156 = vst.msk [vmem:[#allocation6 + $0x40] sm:$0xff] %vm138_vm0, %v5143_v18  ;;  %v5113_v23 = vadd.f32 %v10568_v61, %v5112_v41  ;;  %5213 = vrot.lane.b32.xlu0 %v5168_v17, %s8442_s22  ;;  %5183 = vst.msk [vmem:[#allocation7 + $0x30] sm:$0xff] %vm138_vm0, %v5168_v17  ;;  %5264 = vrot.lane.b32.xlu1 %v5168_v17, %s8443_s30  ;;  %v6796_v32 = vpop.f32.mrb[111].mxu0 }
 0xdba   :  { %v5144_v26 = vmax.f32 %v5113_v23, 0.0 }
 0xdbb   :  { %v5117_v58 = vpop.f32.mrb[112].mxu0  ;;  %v5169_v33 = vld [vmem:[#allocation6 + $0x38] sm:$0xff] }
 0xdbc   :  { %5157 = vst.msk [vmem:[#allocation6 + $0x48] sm:$0xff] %vm138_vm0, %v5144_v26  ;;  %v5118_v31 = vadd.f32 %v10568_v61, %v5117_v58  ;;  %5215 = vrot.lane.b32.xlu0 %v5169_v33, %s8442_s22  ;;  %5184 = vst.msk [vmem:[#allocation7 + $0x38] sm:$0xff] %vm138_vm0, %v5169_v33  ;;  %5266 = vrot.lane.b32.xlu1 %v5169_v33, %s8443_s30  ;;  %v6799_v27 = vpop.f32.mrb[113].mxu0  ;;  %v8446_v58 = vmov 1983009808  }
 0xdbd   :  { %v5527_v33 = vunpack.c.l.s4 %v8446_v58 }
 0xdbe   :  { %v5145_v42 = vmax.f32 %v5118_v31, 0.0  ;;  %v10704_v31 = vld [vmem:[%s10809_s14 + $0x4] ss:$0 sm:$0xff] }
 0xdbf   :  { %v5122_v36 = vpop.f32.mrb[114].mxu0  ;;  %v5170_v11 = vld [vmem:[#allocation6 + $0x40] sm:$0xff]  ;;  %v5528_v27 = vunpack.c.0.s8 %v5527_v33 }
 0xdc0   :  { %5158 = vst.msk [vmem:[#allocation6 + $0x50] sm:$0xff] %vm138_vm0, %v5145_v42  ;;  %v5123_v35 = vadd.f32 %v10568_v61, %v5122_v36  ;;  %5217 = vrot.lane.b32.xlu0 %v5170_v11, %s8442_s22  ;;  %5185 = vst.msk [vmem:[#allocation7 + $0x40] sm:$0xff] %vm138_vm0, %v5170_v11  ;;  %5268 = vrot.lane.b32.xlu1 %v5170_v11, %s8443_s30  ;;  %v6802_v46 = vpop.f32.mrb[115].mxu0 }
 0xdc2   :  { %v5146_v47 = vmax.f32 %v5123_v35, 0.0 }
 0xdc3   :  { %v5127_v52 = vpop.f32.mrb[116].mxu0  ;;  %v5171_v22 = vld [vmem:[#allocation6 + $0x48] sm:$0xff] }
 0xdc4   :  { %5159 = vst.msk [vmem:[#allocation6 + $0x58] sm:$0xff] %vm138_vm0, %v5146_v47  ;;  %v5128_v39 = vadd.f32 %v10568_v61, %v5127_v52  ;;  %5219 = vrot.lane.b32.xlu0 %v5171_v22, %s8442_s22  ;;  %5186 = vst.msk [vmem:[#allocation7 + $0x48] sm:$0xff] %vm138_vm0, %v5171_v22  ;;  %5270 = vrot.lane.b32.xlu1 %v5171_v22, %s8443_s30  ;;  %v6805_v50 = vpop.f32.mrb[117].mxu0 }
 0xdc6   :  { %v5147_v53 = vmax.f32 %v5128_v39, 0.0 }
 0xdc7   :  { %v5132_v60 = vpop.f32.mrb[118].mxu0  ;;  %v5172_v59 = vld [vmem:[#allocation6 + $0x50] sm:$0xff] }
 0xdc8   :  { %5160 = vst.msk [vmem:[#allocation6 + $0x60] sm:$0xff] %vm138_vm0, %v5147_v53  ;;  %v5133_v54 = vadd.f32 %v10568_v61, %v5132_v60  ;;  %5221 = vrot.lane.b32.xlu0 %v5172_v59, %s8442_s22  ;;  %5187 = vst.msk [vmem:[#allocation7 + $0x50] sm:$0xff] %vm138_vm0, %v5172_v59  ;;  %5272 = vrot.lane.b32.xlu1 %v5172_v59, %s8443_s30  ;;  %v6808_v44 = vpop.f32.mrb[119].mxu0 }
 0xdca   :  { %v5148_v62 = vmax.f32 %v5133_v54, 0.0 }
 0xdcb   :  { %v5173_v34 = vld [vmem:[#allocation6 + $0x58] sm:$0xff] }
 0xdcc   :  { %5161 = vst.msk [vmem:[#allocation6 + $0x68] sm:$0xff] %vm138_vm0, %v5148_v62  ;;  %5223 = vrot.lane.b32.xlu0 %v5173_v34, %s8442_s22  ;;  %5188 = vst.msk [vmem:[#allocation7 + $0x58] sm:$0xff] %vm138_vm0, %v5173_v34  ;;  %5274 = vrot.lane.b32.xlu1 %v5173_v34, %s8443_s30 }
 0xdcf   :  { %v5174_v28 = vld [vmem:[#allocation6 + $0x60] sm:$0xff] }
 0xdd0   :  { %5225 = vrot.lane.b32.xlu0 %v5174_v28, %s8442_s22  ;;  %5189 = vst.msk [vmem:[#allocation7 + $0x60] sm:$0xff] %vm138_vm0, %v5174_v28  ;;  %5276 = vrot.lane.b32.xlu1 %v5174_v28, %s8443_s30 }
 0xdd3   :  { %v5175_v61 = vld [vmem:[#allocation6 + $0x68] sm:$0xff] }
 0xdd4   :  { %5227 = vrot.lane.b32.xlu0 %v5175_v61, %s8442_s22  ;;  %5278 = vrot.lane.b32.xlu1 %v5175_v61, %s8443_s30 }
 0xdd8   :  { %5280 = vrot.lane.b32.xlu1 %v10476_v0, %s8443_s30 }
 0xe16   :  { %v5204_v55 = vpop.permute.xlu0 %5203 }
 0xe17   :  { %5242 = vst.msk [vmem:[#allocation7] sm:$0xff] %vm3693_vm5, %v5204_v55 }
 0xe1a   :  { %v5206_v63 = vpop.permute.xlu0 %5205  ;;  %v5257_v21 = vpop.permute.xlu1 %5256 }
 0xe1b   :  { %5243 = vst.msk [vmem:[#allocation7 + $0x8] sm:$0xff] %vm3693_vm5, %v5206_v63 }
 0xe1c   :  { %5295 = vst.msk [vmem:[#allocation7] sm:$0xff] %vm3747_vm6, %v5257_v21 }
 0xe1e   :  { %v5208_v48 = vpop.permute.xlu0 %5207  ;;  %v5259_v45 = vpop.permute.xlu1 %5258 }
 0xe1f   :  { %5244 = vst.msk [vmem:[#allocation7 + $0x10] sm:$0xff] %vm3693_vm5, %v5208_v48 }
 0xe20   :  { %5296 = vst.msk [vmem:[#allocation7 + $0x8] sm:$0xff] %vm3747_vm6, %v5259_v45 }
 0xe22   :  { %v5210_v24 = vpop.permute.xlu0 %5209  ;;  %v5261_v49 = vpop.permute.xlu1 %5260 }
 0xe23   :  { %v5308_v4 = vld [vmem:[#allocation7] sm:$0xff]  ;;  %5245 = vst.msk [vmem:[#allocation7 + $0x18] sm:$0xff] %vm3693_vm5, %v5210_v24 }
 0xe24   :  { %5297 = vst.msk [vmem:[#allocation7 + $0x10] sm:$0xff] %vm3747_vm6, %v5261_v49  ;;  %6834 = vmatmul.mubr.msk.f32.vlgmr.msra.gmra.mrb[100].mxu1 %vm3805_vm7, %v5308_v4 }
 0xe25   :  { %6836 = vmatprep.mubr.msk.f32.mxu1 %vm8445_vm3, %v8440_v1 }
 0xe26   :  { %v5212_v0 = vpop.permute.xlu0 %5211  ;;  %v5263_v5 = vpop.permute.xlu1 %5262 }
 0xe27   :  { %v5309_v6 = vld [vmem:[#allocation7 + $0x8] sm:$0xff]  ;;  %5246 = vst.msk [vmem:[#allocation7 + $0x20] sm:$0xff] %vm3693_vm5, %v5212_v0 }
 0xe28   :  { %5298 = vst.msk [vmem:[#allocation7 + $0x18] sm:$0xff] %vm3747_vm6, %v5263_v5  ;;  %6837 = vmatmul.mubr.msk.f32.gmra.mrb[102].mxu1 %vm3805_vm7, %v5309_v6 }
 0xe29   :  { %6839 = vmatprep.mubr.msk.f32.mxu1 %vm8445_vm3, %v8440_v1 }
 0xe2a   :  { %v5214_v38 = vpop.permute.xlu0 %5213  ;;  %v5265_v20 = vpop.permute.xlu1 %5264 }
 0xe2b   :  { %v5310_v16 = vld [vmem:[#allocation7 + $0x10] sm:$0xff]  ;;  %5247 = vst.msk [vmem:[#allocation7 + $0x28] sm:$0xff] %vm3693_vm5, %v5214_v38 }
 0xe2c   :  { %5299 = vst.msk [vmem:[#allocation7 + $0x20] sm:$0xff] %vm3747_vm6, %v5265_v20  ;;  %6840 = vmatmul.mubr.msk.f32.gmra.mrb[104].mxu1 %vm3805_vm7, %v5310_v16 }
 0xe2d   :  { %6842 = vmatprep.mubr.msk.f32.mxu1 %vm8445_vm3, %v8440_v1 }
 0xe2e   :  { %v5216_v56 = vpop.permute.xlu0 %5215  ;;  %v5267_v14 = vpop.permute.xlu1 %5266 }
 0xe2f   :  { %v5311_v12 = vld [vmem:[#allocation7 + $0x18] sm:$0xff]  ;;  %5248 = vst.msk [vmem:[#allocation7 + $0x30] sm:$0xff] %vm3693_vm5, %v5216_v56 }
 0xe30   :  { %5300 = vst.msk [vmem:[#allocation7 + $0x28] sm:$0xff] %vm3747_vm6, %v5267_v14  ;;  %6843 = vmatmul.mubr.msk.f32.gmra.mrb[106].mxu1 %vm3805_vm7, %v5311_v12 }
 0xe31   :  { %6845 = vmatprep.mubr.msk.f32.mxu1 %vm8445_vm3, %v8440_v1 }
 0xe32   :  { %v5218_v10 = vpop.permute.xlu0 %5217  ;;  %v5269_v51 = vpop.permute.xlu1 %5268 }
 0xe33   :  { %v5312_v9 = vld [vmem:[#allocation7 + $0x20] sm:$0xff]  ;;  %5249 = vst.msk [vmem:[#allocation7 + $0x38] sm:$0xff] %vm3693_vm5, %v5218_v10 }
 0xe34   :  { %5301 = vst.msk [vmem:[#allocation7 + $0x30] sm:$0xff] %vm3747_vm6, %v5269_v51  ;;  %6846 = vmatmul.mubr.msk.f32.gmra.mrb[108].mxu1 %vm3805_vm7, %v5312_v9 }
 0xe35   :  { %6848 = vmatprep.mubr.msk.f32.mxu1 %vm8445_vm3, %v8440_v1 }
 0xe36   :  { %v5220_v7 = vpop.permute.xlu0 %5219  ;;  %v5271_v57 = vpop.permute.xlu1 %5270 }
 0xe37   :  { %v5313_v29 = vld [vmem:[#allocation7 + $0x28] sm:$0xff]  ;;  %5250 = vst.msk [vmem:[#allocation7 + $0x40] sm:$0xff] %vm3693_vm5, %v5220_v7 }
 0xe38   :  { %5302 = vst.msk [vmem:[#allocation7 + $0x38] sm:$0xff] %vm3747_vm6, %v5271_v57  ;;  %6849 = vmatmul.mubr.msk.f32.gmra.mrb[110].mxu1 %vm3805_vm7, %v5313_v29 }
 0xe39   :  { %6851 = vmatprep.mubr.msk.f32.mxu1 %vm8445_vm3, %v8440_v1 }
 0xe3a   :  { %v5222_v15 = vpop.permute.xlu0 %5221  ;;  %v5273_v19 = vpop.permute.xlu1 %5272 }
 0xe3b   :  { %v5314_v43 = vld [vmem:[#allocation7 + $0x30] sm:$0xff]  ;;  %5251 = vst.msk [vmem:[#allocation7 + $0x48] sm:$0xff] %vm3693_vm5, %v5222_v15 }
 0xe3c   :  { %5303 = vst.msk [vmem:[#allocation7 + $0x40] sm:$0xff] %vm3747_vm6, %v5273_v19  ;;  %6852 = vmatmul.mubr.msk.f32.gmra.mrb[112].mxu1 %vm3805_vm7, %v5314_v43 }
 0xe3d   :  { %6854 = vmatprep.mubr.msk.f32.mxu1 %vm8445_vm3, %v8440_v1 }
 0xe3e   :  { %v5224_v3 = vpop.permute.xlu0 %5223  ;;  %v5275_v25 = vpop.permute.xlu1 %5274 }
 0xe3f   :  { %v5315_v8 = vld [vmem:[#allocation7 + $0x38] sm:$0xff]  ;;  %5252 = vst.msk [vmem:[#allocation7 + $0x50] sm:$0xff] %vm3693_vm5, %v5224_v3 }
 0xe40   :  { %5304 = vst.msk [vmem:[#allocation7 + $0x48] sm:$0xff] %vm3747_vm6, %v5275_v25  ;;  %6855 = vmatmul.mubr.msk.f32.gmra.mrb[114].mxu1 %vm3805_vm7, %v5315_v8 }
 0xe41   :  { %6857 = vmatprep.mubr.msk.f32.mxu1 %vm8445_vm3, %v8440_v1 }
 0xe42   :  { %v5226_v13 = vpop.permute.xlu0 %5225  ;;  %v5277_v30 = vpop.permute.xlu1 %5276 }
 0xe43   :  { %v5316_v40 = vld [vmem:[#allocation7 + $0x40] sm:$0xff]  ;;  %5253 = vst.msk [vmem:[#allocation7 + $0x58] sm:$0xff] %vm3693_vm5, %v5226_v13 }
 0xe44   :  { %5305 = vst.msk [vmem:[#allocation7 + $0x50] sm:$0xff] %vm3747_vm6, %v5277_v30  ;;  %6858 = vmatmul.mubr.msk.f32.gmra.mrb[116].mxu1 %vm3805_vm7, %v5316_v40 }
 0xe45   :  { %6860 = vmatprep.mubr.msk.f32.mxu1 %vm8445_vm3, %v8440_v1 }
 0xe46   :  { %v5228_v37 = vpop.permute.xlu0 %5227  ;;  %v5279_v18 = vpop.permute.xlu1 %5278 }
 0xe47   :  { %v5317_v41 = vld [vmem:[#allocation7 + $0x48] sm:$0xff]  ;;  %5254 = vst.msk [vmem:[#allocation7 + $0x60] sm:$0xff] %vm3693_vm5, %v5228_v37 }
 0xe48   :  { %5306 = vst.msk [vmem:[#allocation7 + $0x58] sm:$0xff] %vm3747_vm6, %v5279_v18  ;;  %6861 = vmatmul.mubr.msk.f32.gmra.mrb[118].mxu1 %vm3805_vm7, %v5317_v41 }
 0xe49   :  { %6863 = vmatprep.mubr.msk.f32.mxu1 %vm8445_vm3, %v8440_v1 }
 0xe4a   :  { %v5281_v23 = vpop.permute.xlu1 %5280 }
 0xe4b   :  { %v5318_v17 = vld [vmem:[#allocation7 + $0x50] sm:$0xff]  ;;  %5307 = vst.msk [vmem:[#allocation7 + $0x60] sm:$0xff] %vm3747_vm6, %v5281_v23 }
 0xe4c   :  { %6864 = vmatmul.mubr.msk.f32.gmra.mrb[120].mxu1 %vm3805_vm7, %v5318_v17 }
 0xe4d   :  { %6866 = vmatprep.mubr.msk.f32.mxu1 %vm8445_vm3, %v8440_v1 }
 0xe4f   :  { %v5319_v32 = vld [vmem:[#allocation7 + $0x58] sm:$0xff] }
 0xe50   :  { %6867 = vmatmul.mubr.msk.f32.gmra.mrb[122].mxu1 %vm3805_vm7, %v5319_v32 }
 0xe51   :  { %6869 = vmatprep.mubr.msk.f32.mxu1 %vm8445_vm3, %v8440_v1  ;;  %v10712_v1 = vsub.s32 %v5528_v27, %v8633_v2 }
 0xe52   :  { %v5320_v26 = vld [vmem:[#allocation7 + $0x60] sm:$0xff] }
 0xe54   :  { %6870 = vmatmul.mubr.msk.f32.gmra.mrb[124].mxu1 %vm3805_vm7, %v5320_v26 }
 0xef7   :  { %v5459_v42 = vpop.f32.mrb[100].mxu1 }
 0xef8   :  { %v5460_v36 = vadd.f32 %v10704_v31, %v5459_v42  ;;  %v6835_v11 = vpop.f32.mrb[101].mxu1 }
 0xefa   :  { %5524 = vst.msk [vmem:[%s10811_s16] sm:$0x3] %vm5523_vm8, %v5460_v36 }
 0xefb   :  { %v5464_v35 = vpop.f32.mrb[102].mxu1 }
 0xefc   :  { %v5465_v46 = vadd.f32 %v10704_v31, %v5464_v35  ;;  %v6838_v47 = vpop.f32.mrb[103].mxu1 }
 0xefe   :  { %v5532_v52 = vrot.slane %v5465_v46, %v10712_v1 }
 0xeff   :  { %v5469_v22 = vpop.f32.mrb[104].mxu1 }
 0xf00   :  { %v5470_v39 = vadd.f32 %v10704_v31, %v5469_v22  ;;  %v6841_v50 = vpop.f32.mrb[105].mxu1  ;;  %5533 = vrot.lane.b32.xlu0 %v5532_v52, %s8442_s22 }
 0xf02   :  { %v5545_v53 = vrot.slane %v5470_v39, %v10712_v1 }
 0xf03   :  { %v5474_v60 = vpop.f32.mrb[106].mxu1 }
 0xf04   :  { %v5475_v59 = vadd.f32 %v10704_v31, %v5474_v60  ;;  %v6844_v54 = vpop.f32.mrb[107].mxu1  ;;  %5546 = vrot.lane.b32.xlu1 %v5545_v53, %s8443_s30 }
 0xf06   :  { %v5558_v2 = vrot.slane %v5475_v59, %v10712_v1 }
 0xf07   :  { %v5479_v44 = vpop.f32.mrb[108].mxu1 }
 0xf08   :  { %v5480_v62 = vadd.f32 %v10704_v31, %v5479_v44  ;;  %v6847_v34 = vpop.f32.mrb[109].mxu1  ;;  %5559 = vrot.lane.b32.xlu0 %v5558_v2, %s8441_s3 }
 0xf0a   :  { %5564 = vst.msk [vmem:[%s10811_s16 + $0x2] sm:$0x3] %vm5523_vm8, %v5480_v62 }
 0xf0b   :  { %v5484_v28 = vpop.f32.mrb[110].mxu1 }
 0xf0c   :  { %v5485_v61 = vadd.f32 %v10704_v31, %v5484_v28  ;;  %v6850_v55 = vpop.f32.mrb[111].mxu1 }
 0xf0e   :  { %v5572_v63 = vrot.slane %v5485_v61, %v10712_v1 }
 0xf0f   :  { %v5489_v21 = vpop.f32.mrb[112].mxu1 }
 0xf10   :  { %v5490_v48 = vadd.f32 %v10704_v31, %v5489_v21  ;;  %v6853_v45 = vpop.f32.mrb[113].mxu1  ;;  %5573 = vrot.lane.b32.xlu1 %v5572_v63, %s8442_s22 }
 0xf12   :  { %v5584_v24 = vrot.slane %v5490_v48, %v10712_v1 }
 0xf13   :  { %v5494_v49 = vpop.f32.mrb[114].mxu1 }
 0xf14   :  { %v6856_v4 = vpop.f32.mrb[115].mxu1  ;;  %5585 = vrot.lane.b32.xlu0 %v5584_v24, %s8443_s30 }
 0xf17   :  { %v5499_v0 = vpop.f32.mrb[116].mxu1 }
 0xf18   :  { %v5500_v5 = vadd.f32 %v10704_v31, %v5499_v0  ;;  %v6859_v6 = vpop.f32.mrb[117].mxu1 }
 0xf1a   :  { %5601 = vst.msk [vmem:[%s10811_s16 + $0x4] sm:$0x3] %vm5523_vm8, %v5500_v5 }
 0xf1b   :  { %v5504_v38 = vpop.f32.mrb[118].mxu1 }
 0xf1c   :  { %8410 = shalt.err (!%p8407_p4)
}
 0xf1d   :  { %s8411_s18 = scalar_lea.hbm %s10810_s15, 32 }
 0xf1e   :  { %p8412_p5 = scmp.ne.s32.totalorder %s10810_s15, %s8411_s18  ;;  %p8415_p6 = scmp.lt.u32.totalorder %s8411_s18, %s10810_s15 }
 0xf20   :  { %p8417_p7 = pnand %p8415_p6, %p8412_p5 }
 0xf22   :  { %8420 = shalt.err (!%p8417_p7)
}
 0xf23   :  { %5648 = dma.vmem_to_hbm [thread:$0]  %s5646_s11, 32, %s10810_s15, [#allocation10]   ;;  %v5505_v20 = vadd.f32 %v10704_v31, %v5504_v38  ;;  %v6862_v16 = vpop.f32.mrb[119].mxu1  ;;  %v5495_v51 = vadd.f32 %v10704_v31, %v5494_v49  ;;  %vm5536_vm9 = vcmask 517376   ;;  %vm5549_vm10 = vcmask 779776  }
 0xf24   :  { %v5509_v14 = vpop.f32.mrb[120].mxu1  ;;  %vm5562_vm11 = vcmask 1042176  }
 0xf25   :  { %v5609_v56 = vrot.slane %v5505_v20, %v10712_v1  ;;  %v5510_v12 = vadd.f32 %v10704_v31, %v5509_v14  ;;  %v6865_v10 = vpop.f32.mrb[121].mxu1  ;;  %v5596_v15 = vrot.slane %v5495_v51, %v10712_v1 }
 0xf26   :  { %v5514_v7 = vpop.f32.mrb[122].mxu1 }
 0xf27   :  { %5610 = vrot.lane.b32.xlu0 %v5609_v56, %s8442_s22  ;;  %v5621_v9 = vrot.slane %v5510_v12, %v10712_v1  ;;  %v5515_v57 = vadd.f32 %v10704_v31, %v5514_v7  ;;  %v6868_v29 = vpop.f32.mrb[123].mxu1 }
 0xf28   :  { %v5519_v43 = vpop.f32.mrb[124].mxu1 }
 0xf29   :  { %5622 = vrot.lane.b32.xlu1 %v5621_v9, %s8443_s30  ;;  %v5633_v19 = vrot.slane %v5515_v57, %v10712_v1  ;;  %v5520_v3 = vadd.f32 %v10704_v31, %v5519_v43  ;;  %v6871_v25 = vpop.f32.mrb[125].mxu1 }
 0xf2b   :  { %5634 = vrot.lane.b32.xlu0 %v5633_v19, %s8441_s3  ;;  %5638 = vst.msk [vmem:[%s10811_s16 + $0x6] sm:$0x3] %vm5523_vm8, %v5520_v3 }
 0xf2d   :  { %5597 = vrot.lane.b32.xlu1 %v5596_v15, %s8441_s3 }
 0xf72   :  { %v5534_v8 = vpop.permute.xlu0 %5533 }
 0xf73   :  { %5537 = vst.msk [vmem:[%s10811_s16] sm:$0x3] %vm5536_vm9, %v5534_v8 }
 0xf76   :  { %v5547_v13 = vpop.permute.xlu1 %5546 }
 0xf77   :  { %5550 = vst.msk [vmem:[%s10811_s16] sm:$0x3] %vm5549_vm10, %v5547_v13 }
 0xf7a   :  { %v5560_v30 = vpop.permute.xlu0 %5559 }
 0xf7b   :  { %5563 = vst.msk [vmem:[%s10811_s16] sm:$0x3] %vm5562_vm11, %v5560_v30 }
 0xf82   :  { %v5574_v40 = vpop.permute.xlu1 %5573 }
 0xf83   :  { %5576 = vst.msk [vmem:[%s10811_s16 + $0x2] sm:$0x3] %vm5536_vm9, %v5574_v40 }
 0xf86   :  { %v5586_v37 = vpop.permute.xlu0 %5585 }
 0xf87   :  { %5588 = vst.msk [vmem:[%s10811_s16 + $0x2] sm:$0x3] %vm5549_vm10, %v5586_v37 }
 0xf99   :  { %v5611_v18 = vpop.permute.xlu0 %5610 }
 0xf9a   :  { %5613 = vst.msk [vmem:[%s10811_s16 + $0x4] sm:$0x3] %vm5536_vm9, %v5611_v18 }
 0xf9b   :  { %v5623_v41 = vpop.permute.xlu1 %5622 }
 0xf9c   :  { %5625 = vst.msk [vmem:[%s10811_s16 + $0x4] sm:$0x3] %vm5549_vm10, %v5623_v41 }
 0xf9d   :  { %v5635_v17 = vpop.permute.xlu0 %5634 }
 0xf9e   :  { %5637 = vst.msk [vmem:[%s10811_s16 + $0x4] sm:$0x3] %vm5562_vm11, %v5635_v17 }
 0xf9f   :  { %v5598_v23 = vpop.permute.xlu1 %5597 }
 0xfa0   :  { %5600 = vst.msk [vmem:[%s10811_s16 + $0x2] sm:$0x3] %vm5562_vm11, %v5598_v23 }
 0xfa1   :  { %8429 = dma.done.wait [#allocation10], 32  }
 0xfa2   :  { %8430 = vsyncadd [#allocation10], 4294967264 }
 0xfa3   :  { %5656 = vsyncpa [#allocation9], 1 }
 0xfa4   :  { %5657 = vsyncpa [#allocation12], 1 }
 0xfa5   :  { %5658 = vsyncpa [#allocation15], 1 }
 0xfa6   :  { %5659 = vsyncpa [#allocation18], 1 }
 0xfa7   :  { %5660 = vsyncpa [#allocation10], 1 }

</bundles_post_ra>
